<compile_context>
chip_gen: v7x
topology: tpu7x:2x2x1
jax: 0.10.0
libtpu: 0.0.40
codegen_flags: <defaults>
</compile_context>

<pallas_src>
import math
from functools import partial

import jax
import jax.numpy as jnp
from jax import lax
from jax.experimental import pallas as pl
from jax.experimental.pallas import tpu as pltpu

DP = 128  # padded feature width (lane-dense)


# ---------------------------------------------------------------------------
# Tile selection / static edge preprocessing (cacheable across training steps)
# ---------------------------------------------------------------------------
def pick_tiles(n_nodes):
    n_pad = ((n_nodes + 127) // 128) * 128
    tm = 256 if n_pad % 256 == 0 else 128                      # target-row tile
    tk = next(t for t in (512, 256, 128) if n_pad % t == 0)    # source tile
    return n_pad, tm, tk


def preprocess_edges(edges_matrix, n_nodes, n_pad, tm, tk):
    """Static per-graph preprocessing (do NOT rebuild every training step)."""
    n_edges = edges_matrix.shape[1]                                  # edge_threshold
    src = jnp.repeat(jnp.arange(n_nodes, dtype=jnp.int32), n_edges)  # source node
    dst = edges_matrix.reshape(-1).astype(jnp.int32)                 # target node
    # edges_T[e, j] = target of the e-th outgoing edge of source node j
    # (padded source columns get -1 => never match any target row id)
    edges_T = jnp.full((n_edges, n_pad), -1, jnp.int32)
    edges_T = edges_T.at[:, :n_nodes].set(edges_matrix.T.astype(jnp.int32))
    # per-(tm, tk)-block work table: edge count + diagonal (self-loop) coverage
    nbi, nbk = n_pad // tm, n_pad // tk
    cnt = jnp.zeros((nbi, nbk), jnp.int32)
    cnt = cnt.at[dst // tm, src // tk].add(1)
    g = jnp.arange(n_pad, dtype=jnp.int32)
    cnt = cnt.at[g // tm, g // tk].add(1)
    return edges_T, cnt.reshape(-1)                            # 1-D for SMEM


# ---------------------------------------------------------------------------
# Kernel A: XW = x @ W,  a_dst = <XW, att_dst>,  a_src = <XW, att_src> (row-major)
# ---------------------------------------------------------------------------
def xw_kernel(x_ref, w_ref, asrc_ref, adst_ref,
              xw_ref, adst_out_ref, asrc_out_ref):
    xw = jnp.dot(x_ref[...], w_ref[...], preferred_element_type=jnp.float32)
    xw_ref[...] = xw.astype(xw_ref.dtype)                            # bf16 out
    adst_out_ref[...] = jnp.sum(xw * adst_ref[...], axis=1, keepdims=True)
    # a_src emitted lane-major (1, tm) so Kernel B never transposes / re-dots.
    asrc_out_ref[...] = lax.dot_general(
        asrc_ref[...], xw, (((1,), (1,)), ((), ())),
        preferred_element_type=jnp.float32)


def compute_xw(x_pad, w_pad, asrc_pad, adst_pad, tm):
    n_pad = x_pad.shape[0]
    return pl.pallas_call(
        xw_kernel,
        out_shape=(jax.ShapeDtypeStruct((n_pad, DP), jnp.bfloat16),
                   jax.ShapeDtypeStruct((n_pad, 1), jnp.float32),
                   jax.ShapeDtypeStruct((1, n_pad), jnp.float32)),
        grid_spec=pltpu.PrefetchScalarGridSpec(
            num_scalar_prefetch=0,
            grid=(n_pad // tm,),
            in_specs=[pl.BlockSpec((tm, DP), lambda i: (i, 0)),
                      pl.BlockSpec((DP, DP), lambda i: (0, 0)),
                      pl.BlockSpec((1, DP), lambda i: (0, 0)),
                      pl.BlockSpec((1, DP), lambda i: (0, 0))],
            out_specs=(pl.BlockSpec((tm, DP), lambda i: (i, 0)),
                       pl.BlockSpec((tm, 1), lambda i: (i, 0)),
                       pl.BlockSpec((1, tm), lambda i: (0, i))),
        ),
        compiler_params=pltpu.CompilerParams(
            dimension_semantics=("parallel",)),
    )(x_pad, w_pad, asrc_pad, adst_pad)


# ---------------------------------------------------------------------------
# Kernel B: tiled GATConv (online masked softmax + aggregation + F.normalize)
# ---------------------------------------------------------------------------
def attn_kernel(cnt_ref,                                   # scalar prefetch (SMEM)
                xw_ref, adst_ref, asrc_ref, edges_ref, bias_ref,
                o_ref,
                m_sc, l_sc, acc_sc, *, tm, tk, n_edges):
    i = pl.program_id(0)
    k = pl.program_id(1)
    nk = pl.num_programs(1)

    @pl.when(k == 0)
    def _init():
        m_sc[...] = jnp.full_like(m_sc, -1e30)
        l_sc[...] = jnp.zeros_like(l_sc)
        acc_sc[...] = jnp.zeros_like(acc_sc)

    # skip tiles that contain neither edges nor the diagonal (sparse graph)
    @pl.when(cnt_ref[i * nk + k] > 0)
    def _compute():
        # attention logits: broadcast add of precomputed per-node terms
        s = adst_ref[...] + asrc_ref[...]                          # (tm,1)+(1,tk)
        s = jnp.where(s > 0.0, s, 0.2 * s)                         # LeakyReLU(0.2)

        # Rebuild the adjacency multiplicity mask for this tile from the edge
        # list (no dense NxN mask in HBM).  mask[i,j] = #edges(src=j -> dst=i),
        # diagonal forced to exactly 1 (= remove_self_loops + add_self_loops).
        row_ids = i * tm + lax.broadcasted_iota(jnp.int32, (tm, tk), 0)
        col_ids = k * tk + lax.broadcasted_iota(jnp.int32, (tm, tk), 1)
        mcnt = jnp.zeros((tm, tk), jnp.int32)
        for e in range(n_edges):                                   # static unroll
            tgt = edges_ref[pl.ds(e, 1), :]                        # (1, tk)
            mcnt = mcnt + (row_ids == tgt).astype(jnp.int32)
        mask = jnp.where(row_ids == col_ids, 1, mcnt).astype(jnp.float32)

        # online (flash-style) weighted softmax over source tiles, f32 math
        s_v = jnp.where(mask > 0.0, s, -1e30)
        m_new = jnp.maximum(m_sc[...], jnp.max(s_v, axis=1, keepdims=True))
        alpha = jnp.exp(m_sc[...] - m_new)
        p = mask * jnp.exp(s_v - m_new)                            # (tm, tk)
        l_sc[...] = alpha * l_sc[...] + jnp.sum(p, axis=1, keepdims=True)
        # bf16 feeds to the MXU, f32 accumulation (xw already stored bf16)
        acc_sc[...] = alpha * acc_sc[...] + jnp.dot(
            p.astype(jnp.bfloat16), xw_ref[...],
            preferred_element_type=jnp.float32)
        m_sc[...] = m_new

    @pl.when(k == nk - 1)
    def _finalize():
        out = acc_sc[...] * pl.reciprocal(l_sc[...], approx=True) + bias_ref[...]
        # TODO(synk): nn.Dropout(p=0.5) omitted (stochastic; eval-mode identity).
        nrm = jnp.sqrt(jnp.sum(out * out, axis=1, keepdims=True))
        out = out / jnp.maximum(nrm, 1e-12)                        # F.normalize
        o_ref[...] = out.astype(o_ref.dtype)


def gat_conv_forward(all_embed, gat_params, edges_T, block_cnt, n_pad, tm, tk):
    n_nodes, d = all_embed.shape
    w, att_src, att_dst, bias = gat_params
    n_edges = edges_T.shape[0]

    # zero-pad feature dim to 128 lanes and node dim to n_pad rows
    x_pad = jnp.zeros((n_pad, DP), jnp.float32).at[:n_nodes, :d].set(all_embed)
    w_pad = jnp.zeros((DP, DP), jnp.float32).at[:d, :d].set(w)
    asrc_pad = jnp.zeros((1, DP), jnp.float32).at[:, :d].set(att_src)
    adst_pad = jnp.zeros((1, DP), jnp.float32).at[:, :d].set(att_dst)
    bias_pad = jnp.zeros((1, DP), jnp.float32).at[:, :d].set(bias)

    # hoisted: XW (bf16), a_dst (column) and a_src (lane-major row) computed once
    xw, a_dst, a_src = compute_xw(x_pad, w_pad, asrc_pad, adst_pad, tm)

    nbi, nbk = n_pad // tm, n_pad // tk
    gcn_pad = pl.pallas_call(
        partial(attn_kernel, tm=tm, tk=tk, n_edges=n_edges),
        out_shape=jax.ShapeDtypeStruct((n_pad, DP), jnp.float32),
        grid_spec=pltpu.PrefetchScalarGridSpec(
            num_scalar_prefetch=1,
            grid=(nbi, nbk),
            in_specs=[
                pl.BlockSpec((tk, DP), lambda i, k, cnt: (k, 0)),        # XW (sources)
                pl.BlockSpec((tm, 1), lambda i, k, cnt: (i, 0)),         # a_dst (targets)
                pl.BlockSpec((1, tk), lambda i, k, cnt: (0, k)),         # a_src (sources)
                pl.BlockSpec((n_edges, tk), lambda i, k, cnt: (0, k)),   # edge targets
                pl.BlockSpec((1, DP), lambda i, k, cnt: (0, 0)),         # bias
            ],
            out_specs=pl.BlockSpec((tm, DP), lambda i, k, cnt: (i, 0)),
            scratch_shapes=[pltpu.VMEM((tm, 1), jnp.float32),            # m
                            pltpu.VMEM((tm, 1), jnp.float32),            # l
                            pltpu.VMEM((tm, DP), jnp.float32)],          # acc
        ),
        compiler_params=pltpu.CompilerParams(
            dimension_semantics=("parallel", "arbitrary"),
            vmem_limit_bytes=32 * 1024 * 1024),
    )(block_cnt, xw, a_dst, a_src, edges_T, bias_pad)
    return gcn_pad[:n_nodes, :d]


# ---------------------------------------------------------------------------
# Kernel C: BPR + regularization loss (single lane-padded output)
# ---------------------------------------------------------------------------
def loss_kernel(u_ref, p_ref, n_ref, o_ref, *, regs):
    u = u_ref[...]
    p = p_ref[...]
    n = n_ref[...]
    d = (jnp.sum(u * p, axis=1, keepdims=True)
         - jnp.sum(u * n, axis=1, keepdims=True))                  # (B, 1)
    # -log(sigmoid(d)) = softplus(-d): numerically safe for large |d|
    sp = jnp.maximum(-d, 0.0) + jnp.log(1.0 + jnp.exp(-jnp.abs(d)))
    bpr = jnp.mean(sp)
    reg = regs * 0.5 * (jnp.sum(u * u) + jnp.sum(p * p) + jnp.sum(n * n))
    loss = bpr + reg
    lane = lax.broadcasted_iota(jnp.int32, (1, DP), 1)
    o_ref[...] = (jnp.where(lane == 0, loss, 0.0)
                  + jnp.where(lane == 1, bpr, 0.0)
                  + jnp.where(lane == 2, reg, 0.0))


def kgat_loss(u_e, pos_e, neg_e, regs):
    vmem = pl.BlockSpec(memory_space=pltpu.MemorySpace.VMEM)
    out = pl.pallas_call(
        partial(loss_kernel, regs=float(regs)),
        out_shape=jax.ShapeDtypeStruct((1, DP), jnp.float32),
        in_specs=[vmem, vmem, vmem],
        out_specs=vmem,
    )(u_e, pos_e, neg_e)
    return out[0, 0], out[0, 1], out[0, 2]


# ---------------------------------------------------------------------------
# Full forward (glue in plain JAX: gathers, concat)
# ---------------------------------------------------------------------------
@partial(jax.jit, static_argnames=("regs", "n_pad", "tm", "tk"))
def kgat_forward(all_embed, gat_params, user, pos_item, neg_item,
                 edges_T, block_cnt, regs, n_pad, tm, tk):
    gcn = gat_conv_forward(all_embed, gat_params, edges_T, block_cnt,
                           n_pad, tm, tk)
    u_e = jnp.concatenate([all_embed[user], gcn[user]], axis=1)
    pos_e = jnp.concatenate([all_embed[pos_item], gcn[pos_item]], axis=1)
    neg_e = jnp.concatenate([all_embed[neg_item], gcn[neg_item]], axis=1)
    return kgat_loss(u_e, pos_e, neg_e, regs)


# ---------------------------------------------------------------------------
# Main
# ---------------------------------------------------------------------------
if __name__ == "__main__":
    key = jax.random.PRNGKey(0)

    # Small config consistent with the module
    n_users, n_items, n_entities = 16, 32, 16
    n_nodes = n_users + n_items + n_entities            # 64
    emb_size = 64                                       # GATConv in/out channel
    edge_threshold = 4
    batch = 8
    regs = 1e-5

    k_emb, k_w, k_as, k_ad, k_adj, k_u, k_p, k_n = jax.random.split(key, 8)

    # all_embed: xavier_uniform_([n_nodes, emb_size])
    lim_e = math.sqrt(6.0 / (n_nodes + emb_size))
    all_embed = jax.random.uniform(k_emb, (n_nodes, emb_size), jnp.float32,
                                   -lim_e, lim_e)

    # GATConv(64, 64) params (heads=1): lin weight, att_src, att_dst, bias
    lim_w = math.sqrt(6.0 / (emb_size + emb_size))
    w = jax.random.uniform(k_w, (emb_size, emb_size), jnp.float32, -lim_w, lim_w)
    lim_a = math.sqrt(6.0 / (1 + emb_size))
    att_src = jax.random.uniform(k_as, (1, emb_size), jnp.float32, -lim_a, lim_a)
    att_dst = jax.random.uniform(k_ad, (1, emb_size), jnp.float32, -lim_a, lim_a)
    bias = jnp.zeros((1, emb_size), jnp.float32)
    gat_params = (w, att_src, att_dst, bias)

    # adjacency / edges_matrix: [n_nodes, edge_threshold] neighbor indices
    edges_matrix = jax.random.randint(k_adj, (n_nodes, edge_threshold),
                                      0, n_nodes, jnp.int32)

    # batch of (user, pos_item, neg_item) node indices
    user = jax.random.randint(k_u, (batch,), 0, n_users, jnp.int32)
    pos_item = jax.random.randint(k_p, (batch,), n_users, n_users + n_items, jnp.int32)
    neg_item = jax.random.randint(k_n, (batch,), n_users, n_users + n_items, jnp.int32)

    # static (per-graph) preprocessing — cached across training steps
    n_pad, tm, tk = pick_tiles(n_nodes)
    edges_T, block_cnt = preprocess_edges(edges_matrix, n_nodes, n_pad, tm, tk)

    loss, bpr_loss, reg_loss = kgat_forward(
        all_embed, gat_params, user, pos_item, neg_item,
        edges_T, block_cnt, regs, n_pad, tm, tk)
    jax.block_until_ready((loss, bpr_loss, reg_loss))

    assert jnp.isfinite(loss) and jnp.isfinite(bpr_loss) and jnp.isfinite(reg_loss)
    print("KERNEL_OK")
</pallas_src>

<mosaic_0001>
module attributes {stable_mosaic.version = 11 : i64} {
  func.func @xw_kernel(%arg0: i32, %arg1: memref<128x128xf32, #tpu.memory_space<vmem>>, %arg2: memref<128x128xf32, #tpu.memory_space<vmem>>, %arg3: memref<1x128xf32, #tpu.memory_space<vmem>>, %arg4: memref<1x128xf32, #tpu.memory_space<vmem>>, %arg5: memref<128x128xbf16, #tpu.memory_space<vmem>>, %arg6: memref<128x1xf32, #tpu.memory_space<vmem>>, %arg7: memref<1x128xf32, #tpu.memory_space<vmem>>) attributes {dimension_semantics = [#tpu.dimension_semantics<parallel>], iteration_bounds = array<i64: 1>, scalar_prefetch = 0 : i64, scratch_operands = 0 : i64, tpu.core_type = #tpu.core_type<tc>, window_params = [{transform_indices = @transform_0, window_bounds = array<i64: 128, 128>}, {pipeline_mode = #tpu.pipeline_mode<synchronous>, transform_indices = @transform_1, window_bounds = array<i64: 128, 128>}, {pipeline_mode = #tpu.pipeline_mode<synchronous>, transform_indices = @transform_2, window_bounds = array<i64: 1, 128>}, {pipeline_mode = #tpu.pipeline_mode<synchronous>, transform_indices = @transform_3, window_bounds = array<i64: 1, 128>}, {transform_indices = @transform_4, window_bounds = array<i64: 128, 128>}, {transform_indices = @transform_5, window_bounds = array<i64: 128, 1>}, {transform_indices = @transform_6, window_bounds = array<i64: 1, 128>}]} {
    %c0 = arith.constant 0 : index
    %c0_0 = arith.constant 0 : index
    %0 = vector.load %arg1[%c0, %c0_0] : memref<128x128xf32, #tpu.memory_space<vmem>>, vector<128x128xf32>
    %c0_1 = arith.constant 0 : index
    %c0_2 = arith.constant 0 : index
    %1 = vector.load %arg2[%c0_1, %c0_2] : memref<128x128xf32, #tpu.memory_space<vmem>>, vector<128x128xf32>
    %cst = arith.constant dense<0.000000e+00> : vector<128x128xf32>
    %2 = tpu.matmul %0, %1, %cst {dimension_numbers = #tpu.dot_dimension_numbers<[1], [0], [0], [1], [0, 0, 1, 1], [], []>} : vector<128x128xf32>, vector<128x128xf32>, vector<128x128xf32> -> vector<128x128xf32>
    %3 = arith.truncf %2 : vector<128x128xf32> to vector<128x128xbf16>
    %c0_3 = arith.constant 0 : index
    %c0_4 = arith.constant 0 : index
    %4 = vector.load %arg5[%c0_3, %c0_4] : memref<128x128xbf16, #tpu.memory_space<vmem>>, vector<128x128xbf16>
    tpu.vector_store %arg5[%c0_3, %c0_4], %3 {strides = array<i32>} : memref<128x128xbf16, #tpu.memory_space<vmem>>, vector<128x128xbf16>,
    %c0_5 = arith.constant 0 : index
    %c0_6 = arith.constant 0 : index
    %5 = vector.load %arg4[%c0_5, %c0_6] : memref<1x128xf32, #tpu.memory_space<vmem>>, vector<1x128xf32>
    %6 = vector.broadcast %5 : vector<1x128xf32> to vector<128x128xf32>
    %7 = arith.mulf %2, %6 : vector<128x128xf32>
    %cst_7 = arith.constant dense<0.000000e+00> : vector<128xf32>
    %8 = vector.multi_reduction <add>, %7, %cst_7 [1] : vector<128x128xf32> to vector<128xf32>
    %9 = vector.shape_cast %8 : vector<128xf32> to vector<128x1xf32>
    %c0_8 = arith.constant 0 : index
    %c0_9 = arith.constant 0 : index
    %10 = vector.load %arg6[%c0_8, %c0_9] : memref<128x1xf32, #tpu.memory_space<vmem>>, vector<128x1xf32>
    tpu.vector_store %arg6[%c0_8, %c0_9], %9 {strides = array<i32>} : memref<128x1xf32, #tpu.memory_space<vmem>>, vector<128x1xf32>,
    %c0_10 = arith.constant 0 : index
    %c0_11 = arith.constant 0 : index
    %11 = vector.load %arg3[%c0_10, %c0_11] : memref<1x128xf32, #tpu.memory_space<vmem>>, vector<1x128xf32>
    %cst_12 = arith.constant dense<0.000000e+00> : vector<1x128xf32>
    %12 = tpu.matmul %11, %2, %cst_12 {dimension_numbers = #tpu.dot_dimension_numbers<[1], [1], [0], [0], [0, 0, 1, 0], [], []>} : vector<1x128xf32>, vector<128x128xf32>, vector<1x128xf32> -> vector<1x128xf32>
    %c0_13 = arith.constant 0 : index
    %c0_14 = arith.constant 0 : index
    %13 = vector.load %arg7[%c0_13, %c0_14] : memref<1x128xf32, #tpu.memory_space<vmem>>, vector<1x128xf32>
    tpu.vector_store %arg7[%c0_13, %c0_14], %12 {strides = array<i32>} : memref<1x128xf32, #tpu.memory_space<vmem>>, vector<1x128xf32>,
    return
  }
  func.func @transform_0(%arg0: i32) -> (i32, i32) {
    %c0_i32 = arith.constant 0 : i32
    %c0_i32_0 = arith.constant 0 : i32
    return %arg0, %c0_i32 : i32, i32
  }
  func.func @transform_1(%arg0: i32) -> (i32, i32) {
    %c0_i32 = arith.constant 0 : i32
    %c0_i32_0 = arith.constant 0 : i32
    %c0_i32_1 = arith.constant 0 : i32
    return %c0_i32, %c0_i32_0 : i32, i32
  }
  func.func @transform_2(%arg0: i32) -> (i32, i32) {
    %c0_i32 = arith.constant 0 : i32
    %c0_i32_0 = arith.constant 0 : i32
    %c0_i32_1 = arith.constant 0 : i32
    return %c0_i32, %c0_i32_0 : i32, i32
  }
  func.func @transform_3(%arg0: i32) -> (i32, i32) {
    %c0_i32 = arith.constant 0 : i32
    %c0_i32_0 = arith.constant 0 : i32
    %c0_i32_1 = arith.constant 0 : i32
    return %c0_i32, %c0_i32_0 : i32, i32
  }
  func.func @transform_4(%arg0: i32) -> (i32, i32) {
    %c0_i32 = arith.constant 0 : i32
    %c0_i32_0 = arith.constant 0 : i32
    return %arg0, %c0_i32 : i32, i32
  }
  func.func @transform_5(%arg0: i32) -> (i32, i32) {
    %c0_i32 = arith.constant 0 : i32
    %c0_i32_0 = arith.constant 0 : i32
    return %arg0, %c0_i32 : i32, i32
  }
  func.func @transform_6(%arg0: i32) -> (i32, i32) {
    %c0_i32 = arith.constant 0 : i32
    %c0_i32_0 = arith.constant 0 : i32
    return %c0_i32, %arg0 : i32, i32
  }
}

module attributes {stable_mosaic.version = 11 : i64} {
  func.func @attn_kernel(%arg0: i32, %arg1: i32, %arg2: memref<1xi32, #tpu.memory_space<smem>>, %arg3: memref<128x128xbf16, #tpu.memory_space<vmem>>, %arg4: memref<128x1xf32, #tpu.memory_space<vmem>>, %arg5: memref<1x128xf32, #tpu.memory_space<vmem>>, %arg6: memref<4x128xi32, #tpu.memory_space<vmem>>, %arg7: memref<1x128xf32, #tpu.memory_space<vmem>>, %arg8: memref<128x128xf32, #tpu.memory_space<vmem>>, %arg9: memref<128x1xf32, #tpu.memory_space<vmem>>, %arg10: memref<128x1xf32, #tpu.memory_space<vmem>>, %arg11: memref<128x128xf32, #tpu.memory_space<vmem>>) attributes {dimension_semantics = [#tpu.dimension_semantics<parallel>, #tpu.dimension_semantics<arbitrary>], iteration_bounds = array<i64: 1, 1>, scalar_prefetch = 1 : i64, scratch_operands = 3 : i64, tpu.core_type = #tpu.core_type<tc>, window_params = [{transform_indices = @transform_0, window_bounds = array<i64: 128, 128>}, {transform_indices = @transform_1, window_bounds = array<i64: 128, 1>}, {transform_indices = @transform_2, window_bounds = array<i64: 1, 128>}, {transform_indices = @transform_3, window_bounds = array<i64: 4, 128>}, {pipeline_mode = #tpu.pipeline_mode<synchronous>, transform_indices = @transform_4, window_bounds = array<i64: 1, 128>}, {transform_indices = @transform_5, window_bounds = array<i64: 128, 128>}]} {
    %c0_i32 = arith.constant 0 : i32
    %0 = arith.cmpi eq, %arg1, %c0_i32 : i32
    %1 = arith.extui %0 : i1 to i32
    %c0_i32_0 = arith.constant 0 : i32
    %2 = arith.cmpi ne, %1, %c0_i32_0 : i32
    scf.if %2 {
      %cst = arith.constant -1.000000e+30 : f32
      %13 = vector.broadcast %cst : f32 to vector<128x1xf32>
      %c0 = arith.constant 0 : index
      %c0_5 = arith.constant 0 : index
      %14 = vector.load %arg9[%c0, %c0_5] : memref<128x1xf32, #tpu.memory_space<vmem>>, vector<128x1xf32>
      tpu.vector_store %arg9[%c0, %c0_5], %13 {strides = array<i32>} : memref<128x1xf32, #tpu.memory_space<vmem>>, vector<128x1xf32>,
      %cst_6 = arith.constant 0.000000e+00 : f32
      %15 = vector.broadcast %cst_6 : f32 to vector<128x1xf32>
      %c0_7 = arith.constant 0 : index
      %c0_8 = arith.constant 0 : index
      %16 = vector.load %arg10[%c0_7, %c0_8] : memref<128x1xf32, #tpu.memory_space<vmem>>, vector<128x1xf32>
      tpu.vector_store %arg10[%c0_7, %c0_8], %15 {strides = array<i32>} : memref<128x1xf32, #tpu.memory_space<vmem>>, vector<128x1xf32>,
      %cst_9 = arith.constant 0.000000e+00 : f32
      %17 = vector.broadcast %cst_9 : f32 to vector<128x128xf32>
      %c0_10 = arith.constant 0 : index
      %c0_11 = arith.constant 0 : index
      %18 = vector.load %arg11[%c0_10, %c0_11] : memref<128x128xf32, #tpu.memory_space<vmem>>, vector<128x128xf32>
      tpu.vector_store %arg11[%c0_10, %c0_11], %17 {strides = array<i32>} : memref<128x128xf32, #tpu.memory_space<vmem>>, vector<128x128xf32>,
    } else {
    }
    %c1_i32 = arith.constant 1 : i32
    %3 = arith.muli %arg0, %c1_i32 : i32
    %4 = arith.addi %3, %arg1 : i32
    %5 = arith.index_cast %4 : i32 to index
    %6 = memref.load %arg2[%5] : memref<1xi32, #tpu.memory_space<smem>>
    %c0_i32_1 = arith.constant 0 : i32
    %7 = arith.cmpi sgt, %6, %c0_i32_1 : i32
    %8 = arith.extui %7 : i1 to i32
    %c0_i32_2 = arith.constant 0 : i32
    %9 = arith.cmpi ne, %8, %c0_i32_2 : i32
    scf.if %9 {
      %c0 = arith.constant 0 : index
      %c0_5 = arith.constant 0 : index
      %13 = vector.load %arg4[%c0, %c0_5] : memref<128x1xf32, #tpu.memory_space<vmem>>, vector<128x1xf32>
      %c0_6 = arith.constant 0 : index
      %c0_7 = arith.constant 0 : index
      %14 = vector.load %arg5[%c0_6, %c0_7] : memref<1x128xf32, #tpu.memory_space<vmem>>, vector<1x128xf32>
      %15 = vector.broadcast %13 : vector<128x1xf32> to vector<128x128xf32>
      %16 = vector.broadcast %14 : vector<1x128xf32> to vector<128x128xf32>
      %17 = arith.addf %15, %16 : vector<128x128xf32>
      %cst = arith.constant 0.000000e+00 : f32
      %18 = vector.broadcast %cst : f32 to vector<128x128xf32>
      %19 = arith.cmpf ogt, %17, %18 : vector<128x128xf32>
      %cst_8 = arith.constant 2.000000e-01 : f32
      %20 = vector.broadcast %cst_8 : f32 to vector<128x128xf32>
      %21 = arith.mulf %20, %17 : vector<128x128xf32>
      %22 = arith.select %19, %17, %21 : vector<128x128xi1>, vector<128x128xf32>
      %c128_i32 = arith.constant 128 : i32
      %23 = arith.muli %arg0, %c128_i32 : i32
      %24 = tpu.iota {dimensions = array<i32: 0>} : vector<128x128xi32>
      %25 = vector.broadcast %23 : i32 to vector<128x128xi32>
      %26 = arith.addi %25, %24 : vector<128x128xi32>
      %c128_i32_9 = arith.constant 128 : i32
      %27 = arith.muli %arg1, %c128_i32_9 : i32
      %28 = tpu.iota {dimensions = array<i32: 1>} : vector<128x128xi32>
      %29 = vector.broadcast %27 : i32 to vector<128x128xi32>
      %30 = arith.addi %29, %28 : vector<128x128xi32>
      %c0_i32_10 = arith.constant 0 : i32
      %31 = vector.broadcast %c0_i32_10 : i32 to vector<128x128xi32>
      %c0_11 = arith.constant 0 : index
      %c0_12 = arith.constant 0 : index
      %32 = vector.load %arg6[%c0_11, %c0_12] : memref<4x128xi32, #tpu.memory_space<vmem>>, vector<1x128xi32>
      %33 = vector.broadcast %32 : vector<1x128xi32> to vector<128x128xi32>
      %34 = arith.cmpi eq, %26, %33 : vector<128x128xi32>
      %35 = arith.extui %34 : vector<128x128xi1> to vector<128x128xi32>
      %36 = arith.addi %31, %35 : vector<128x128xi32>
      %c1 = arith.constant 1 : index
      %c0_13 = arith.constant 0 : index
      %37 = vector.load %arg6[%c1, %c0_13] : memref<4x128xi32, #tpu.memory_space<vmem>>, vector<1x128xi32>
      %38 = vector.broadcast %37 : vector<1x128xi32> to vector<128x128xi32>
      %39 = arith.cmpi eq, %26, %38 : vector<128x128xi32>
      %40 = arith.extui %39 : vector<128x128xi1> to vector<128x128xi32>
      %41 = arith.addi %36, %40 : vector<128x128xi32>
      %c2 = arith.constant 2 : index
      %c0_14 = arith.constant 0 : index
      %42 = vector.load %arg6[%c2, %c0_14] : memref<4x128xi32, #tpu.memory_space<vmem>>, vector<1x128xi32>
      %43 = vector.broadcast %42 : vector<1x128xi32> to vector<128x128xi32>
      %44 = arith.cmpi eq, %26, %43 : vector<128x128xi32>
      %45 = arith.extui %44 : vector<128x128xi1> to vector<128x128xi32>
      %46 = arith.addi %41, %45 : vector<128x128xi32>
      %c3 = arith.constant 3 : index
      %c0_15 = arith.constant 0 : index
      %47 = vector.load %arg6[%c3, %c0_15] : memref<4x128xi32, #tpu.memory_space<vmem>>, vector<1x128xi32>
      %48 = vector.broadcast %47 : vector<1x128xi32> to vector<128x128xi32>
      %49 = arith.cmpi eq, %26, %48 : vector<128x128xi32>
      %50 = arith.extui %49 : vector<128x128xi1> to vector<128x128xi32>
      %51 = arith.addi %46, %50 : vector<128x128xi32>
      %52 = arith.cmpi eq, %26, %30 : vector<128x128xi32>
      %c1_i32_16 = arith.constant 1 : i32
      %53 = vector.broadcast %c1_i32_16 : i32 to vector<128x128xi32>
      %54 = arith.select %52, %53, %51 : vector<128x128xi1>, vector<128x128xi32>
      %55 = arith.sitofp %54 : vector<128x128xi32> to vector<128x128xf32>
      %cst_17 = arith.constant 0.000000e+00 : f32
      %56 = vector.broadcast %cst_17 : f32 to vector<128x128xf32>
      %57 = arith.cmpf ogt, %55, %56 : vector<128x128xf32>
      %cst_18 = arith.constant -1.000000e+30 : f32
      %58 = vector.broadcast %cst_18 : f32 to vector<128x128xf32>
      %59 = arith.select %57, %22, %58 : vector<128x128xi1>, vector<128x128xf32>
      %c0_19 = arith.constant 0 : index
      %c0_20 = arith.constant 0 : index
      %60 = vector.load %arg9[%c0_19, %c0_20] : memref<128x1xf32, #tpu.memory_space<vmem>>, vector<128x1xf32>
      %cst_21 = arith.constant dense<0xFF800000> : vector<128xf32>
      %61 = vector.multi_reduction <maximumf>, %59, %cst_21 [1] : vector<128x128xf32> to vector<128xf32>
      %62 = vector.shape_cast %61 : vector<128xf32> to vector<128x1xf32>
      %63 = arith.maximumf %60, %62 : vector<128x1xf32>
      %c0_22 = arith.constant 0 : index
      %c0_23 = arith.constant 0 : index
      %64 = vector.load %arg9[%c0_22, %c0_23] : memref<128x1xf32, #tpu.memory_space<vmem>>, vector<128x1xf32>
      %65 = arith.subf %64, %63 : vector<128x1xf32>
      %66 = math.exp %65 : vector<128x1xf32>
      %67 = vector.broadcast %63 : vector<128x1xf32> to vector<128x128xf32>
      %68 = arith.subf %59, %67 : vector<128x128xf32>
      %69 = math.exp %68 : vector<128x128xf32>
      %70 = arith.mulf %55, %69 : vector<128x128xf32>
      %c0_24 = arith.constant 0 : index
      %c0_25 = arith.constant 0 : index
      %71 = vector.load %arg10[%c0_24, %c0_25] : memref<128x1xf32, #tpu.memory_space<vmem>>, vector<128x1xf32>
      %72 = arith.mulf %66, %71 : vector<128x1xf32>
      %cst_26 = arith.constant dense<0.000000e+00> : vector<128xf32>
      %73 = vector.multi_reduction <add>, %70, %cst_26 [1] : vector<128x128xf32> to vector<128xf32>
      %74 = vector.shape_cast %73 : vector<128xf32> to vector<128x1xf32>
      %75 = arith.addf %72, %74 : vector<128x1xf32>
      %c0_27 = arith.constant 0 : index
      %c0_28 = arith.constant 0 : index
      %76 = vector.load %arg10[%c0_27, %c0_28] : memref<128x1xf32, #tpu.memory_space<vmem>>, vector<128x1xf32>
      tpu.vector_store %arg10[%c0_27, %c0_28], %75 {strides = array<i32>} : memref<128x1xf32, #tpu.memory_space<vmem>>, vector<128x1xf32>,
      %c0_29 = arith.constant 0 : index
      %c0_30 = arith.constant 0 : index
      %77 = vector.load %arg11[%c0_29, %c0_30] : memref<128x128xf32, #tpu.memory_space<vmem>>, vector<128x128xf32>
      %78 = vector.broadcast %66 : vector<128x1xf32> to vector<128x128xf32>
      %79 = arith.mulf %78, %77 : vector<128x128xf32>
      %80 = arith.truncf %70 : vector<128x128xf32> to vector<128x128xbf16>
      %c0_31 = arith.constant 0 : index
      %c0_32 = arith.constant 0 : index
      %81 = vector.load %arg3[%c0_31, %c0_32] : memref<128x128xbf16, #tpu.memory_space<vmem>>, vector<128x128xbf16>
      %cst_33 = arith.constant dense<0.000000e+00> : vector<128x128xf32>
      %82 = tpu.matmul %80, %81, %cst_33 {dimension_numbers = #tpu.dot_dimension_numbers<[1], [0], [0], [1], [0, 0, 1, 1], [], []>} : vector<128x128xbf16>, vector<128x128xbf16>, vector<128x128xf32> -> vector<128x128xf32>
      %83 = arith.addf %79, %82 : vector<128x128xf32>
      %c0_34 = arith.constant 0 : index
      %c0_35 = arith.constant 0 : index
      %84 = vector.load %arg11[%c0_34, %c0_35] : memref<128x128xf32, #tpu.memory_space<vmem>>, vector<128x128xf32>
      tpu.vector_store %arg11[%c0_34, %c0_35], %83 {strides = array<i32>} : memref<128x128xf32, #tpu.memory_space<vmem>>, vector<128x128xf32>,
      %c0_36 = arith.constant 0 : index
      %c0_37 = arith.constant 0 : index
      %85 = vector.load %arg9[%c0_36, %c0_37] : memref<128x1xf32, #tpu.memory_space<vmem>>, vector<128x1xf32>
      tpu.vector_store %arg9[%c0_36, %c0_37], %63 {strides = array<i32>} : memref<128x1xf32, #tpu.memory_space<vmem>>, vector<128x1xf32>,
    } else {
    }
    %c0_i32_3 = arith.constant 0 : i32
    %10 = arith.cmpi eq, %arg1, %c0_i32_3 : i32
    %11 = arith.extui %10 : i1 to i32
    %c0_i32_4 = arith.constant 0 : i32
    %12 = arith.cmpi ne, %11, %c0_i32_4 : i32
    scf.if %12 {
      %c0 = arith.constant 0 : index
      %c0_5 = arith.constant 0 : index
      %13 = vector.load %arg11[%c0, %c0_5] : memref<128x128xf32, #tpu.memory_space<vmem>>, vector<128x128xf32>
      %c0_6 = arith.constant 0 : index
      %c0_7 = arith.constant 0 : index
      %14 = vector.load %arg10[%c0_6, %c0_7] : memref<128x1xf32, #tpu.memory_space<vmem>>, vector<128x1xf32>
      %15 = tpu.reciprocal %14 {approx = true} : vector<128x1xf32> -> vector<128x1xf32>
      %16 = vector.broadcast %15 : vector<128x1xf32> to vector<128x128xf32>
      %17 = arith.mulf %13, %16 : vector<128x128xf32>
      %c0_8 = arith.constant 0 : index
      %c0_9 = arith.constant 0 : index
      %18 = vector.load %arg7[%c0_8, %c0_9] : memref<1x128xf32, #tpu.memory_space<vmem>>, vector<1x128xf32>
      %19 = vector.broadcast %18 : vector<1x128xf32> to vector<128x128xf32>
      %20 = arith.addf %17, %19 : vector<128x128xf32>
      %21 = arith.mulf %20, %20 : vector<128x128xf32>
      %cst = arith.constant dense<0.000000e+00> : vector<128xf32>
      %22 = vector.multi_reduction <add>, %21, %cst [1] : vector<128x128xf32> to vector<128xf32>
      %23 = vector.shape_cast %22 : vector<128xf32> to vector<128x1xf32>
      %24 = math.sqrt %23 : vector<128x1xf32>
      %cst_10 = arith.constant 9.99999996E-13 : f32
      %25 = vector.broadcast %cst_10 : f32 to vector<128x1xf32>
      %26 = arith.maximumf %24, %25 : vector<128x1xf32>
      %27 = vector.broadcast %26 : vector<128x1xf32> to vector<128x128xf32>
      %28 = arith.divf %20, %27 : vector<128x128xf32>
      %c0_11 = arith.constant 0 : index
      %c0_12 = arith.constant 0 : index
      %29 = vector.load %arg8[%c0_11, %c0_12] : memref<128x128xf32, #tpu.memory_space<vmem>>, vector<128x128xf32>
      tpu.vector_store %arg8[%c0_11, %c0_12], %28 {strides = array<i32>} : memref<128x128xf32, #tpu.memory_space<vmem>>, vector<128x128xf32>,
    } else {
    }
    return
  }
  func.func @transform_0(%arg0: i32, %arg1: i32, %arg2: memref<1xi32, #tpu.memory_space<smem>>) -> (i32, i32) {
    %c0_i32 = arith.constant 0 : i32
    %c0_i32_0 = arith.constant 0 : i32
    return %arg1, %c0_i32 : i32, i32
  }
  func.func @transform_1(%arg0: i32, %arg1: i32, %arg2: memref<1xi32, #tpu.memory_space<smem>>) -> (i32, i32) {
    %c0_i32 = arith.constant 0 : i32
    %c0_i32_0 = arith.constant 0 : i32
    return %arg0, %c0_i32 : i32, i32
  }
  func.func @transform_2(%arg0: i32, %arg1: i32, %arg2: memref<1xi32, #tpu.memory_space<smem>>) -> (i32, i32) {
    %c0_i32 = arith.constant 0 : i32
    %c0_i32_0 = arith.constant 0 : i32
    return %c0_i32, %arg1 : i32, i32
  }
  func.func @transform_3(%arg0: i32, %arg1: i32, %arg2: memref<1xi32, #tpu.memory_space<smem>>) -> (i32, i32) {
    %c0_i32 = arith.constant 0 : i32
    %c0_i32_0 = arith.constant 0 : i32
    return %c0_i32, %arg1 : i32, i32
  }
  func.func @transform_4(%arg0: i32, %arg1: i32, %arg2: memref<1xi32, #tpu.memory_space<smem>>) -> (i32, i32) {
    %c0_i32 = arith.constant 0 : i32
    %c0_i32_0 = arith.constant 0 : i32
    %c0_i32_1 = arith.constant 0 : i32
    return %c0_i32, %c0_i32_0 : i32, i32
  }
  func.func @transform_5(%arg0: i32, %arg1: i32, %arg2: memref<1xi32, #tpu.memory_space<smem>>) -> (i32, i32) {
    %c0_i32 = arith.constant 0 : i32
    %c0_i32_0 = arith.constant 0 : i32
    return %arg0, %c0_i32 : i32, i32
  }
}

module attributes {stable_mosaic.version = 11 : i64} {
  func.func @loss_kernel(%arg0: memref<8x128xf32, #tpu.memory_space<vmem>>, %arg1: memref<8x128xf32, #tpu.memory_space<vmem>>, %arg2: memref<8x128xf32, #tpu.memory_space<vmem>>, %arg3: memref<1x128xf32, #tpu.memory_space<vmem>>) attributes {dimension_semantics = [], scalar_prefetch = 0 : i64, scratch_operands = 0 : i64, tpu.core_type = #tpu.core_type<tc>} {
    %c0 = arith.constant 0 : index
    %c0_0 = arith.constant 0 : index
    %0 = vector.load %arg0[%c0, %c0_0] : memref<8x128xf32, #tpu.memory_space<vmem>>, vector<8x128xf32>
    %c0_1 = arith.constant 0 : index
    %c0_2 = arith.constant 0 : index
    %1 = vector.load %arg1[%c0_1, %c0_2] : memref<8x128xf32, #tpu.memory_space<vmem>>, vector<8x128xf32>
    %c0_3 = arith.constant 0 : index
    %c0_4 = arith.constant 0 : index
    %2 = vector.load %arg2[%c0_3, %c0_4] : memref<8x128xf32, #tpu.memory_space<vmem>>, vector<8x128xf32>
    %3 = arith.mulf %0, %1 : vector<8x128xf32>
    %cst = arith.constant dense<0.000000e+00> : vector<8xf32>
    %4 = vector.multi_reduction <add>, %3, %cst [1] : vector<8x128xf32> to vector<8xf32>
    %5 = vector.shape_cast %4 : vector<8xf32> to vector<8x1xf32>
    %6 = arith.mulf %0, %2 : vector<8x128xf32>
    %cst_5 = arith.constant dense<0.000000e+00> : vector<8xf32>
    %7 = vector.multi_reduction <add>, %6, %cst_5 [1] : vector<8x128xf32> to vector<8xf32>
    %8 = vector.shape_cast %7 : vector<8xf32> to vector<8x1xf32>
    %9 = arith.subf %5, %8 : vector<8x1xf32>
    %cst_6 = arith.constant 0.000000e+00 : f32
    %10 = vector.broadcast %cst_6 : f32 to vector<8x1xf32>
    %11 = arith.subf %10, %9 : vector<8x1xf32>
    %cst_7 = arith.constant 0.000000e+00 : f32
    %12 = vector.broadcast %cst_7 : f32 to vector<8x1xf32>
    %13 = arith.maximumf %11, %12 : vector<8x1xf32>
    %14 = math.absf %9 : vector<8x1xf32>
    %cst_8 = arith.constant 0.000000e+00 : f32
    %15 = vector.broadcast %cst_8 : f32 to vector<8x1xf32>
    %16 = arith.subf %15, %14 : vector<8x1xf32>
    %17 = math.exp %16 : vector<8x1xf32>
    %cst_9 = arith.constant 1.000000e+00 : f32
    %18 = vector.broadcast %cst_9 : f32 to vector<8x1xf32>
    %19 = arith.addf %18, %17 : vector<8x1xf32>
    %20 = math.log %19 : vector<8x1xf32>
    %21 = arith.addf %13, %20 : vector<8x1xf32>
    %22 = vector.shape_cast %21 : vector<8x1xf32> to vector<1x8x1xf32>
    %cst_10 = arith.constant dense<0.000000e+00> : vector<1xf32>
    %23 = vector.multi_reduction <add>, %22, %cst_10 [1, 2] : vector<1x8x1xf32> to vector<1xf32>
    %24 = vector.shape_cast %23 : vector<1xf32> to vector<1x1x1xf32>
    %25 = vector.extract %24[0, 0, 0] : f32 from vector<1x1x1xf32>
    %cst_11 = arith.constant 8.000000e+00 : f32
    %26 = arith.divf %25, %cst_11 : f32
    %27 = arith.mulf %0, %0 : vector<8x128xf32>
    %28 = vector.shape_cast %27 : vector<8x128xf32> to vector<1x8x128xf32>
    %cst_12 = arith.constant dense<0.000000e+00> : vector<1xf32>
    %29 = vector.multi_reduction <add>, %28, %cst_12 [1, 2] : vector<1x8x128xf32> to vector<1xf32>
    %30 = vector.shape_cast %29 : vector<1xf32> to vector<1x1x1xf32>
    %31 = vector.extract %30[0, 0, 0] : f32 from vector<1x1x1xf32>
    %32 = arith.mulf %1, %1 : vector<8x128xf32>
    %33 = vector.shape_cast %32 : vector<8x128xf32> to vector<1x8x128xf32>
    %cst_13 = arith.constant dense<0.000000e+00> : vector<1xf32>
    %34 = vector.multi_reduction <add>, %33, %cst_13 [1, 2] : vector<1x8x128xf32> to vector<1xf32>
    %35 = vector.shape_cast %34 : vector<1xf32> to vector<1x1x1xf32>
    %36 = vector.extract %35[0, 0, 0] : f32 from vector<1x1x1xf32>
    %37 = arith.addf %31, %36 : f32
    %38 = arith.mulf %2, %2 : vector<8x128xf32>
    %39 = vector.shape_cast %38 : vector<8x128xf32> to vector<1x8x128xf32>
    %cst_14 = arith.constant dense<0.000000e+00> : vector<1xf32>
    %40 = vector.multi_reduction <add>, %39, %cst_14 [1, 2] : vector<1x8x128xf32> to vector<1xf32>
    %41 = vector.shape_cast %40 : vector<1xf32> to vector<1x1x1xf32>
    %42 = vector.extract %41[0, 0, 0] : f32 from vector<1x1x1xf32>
    %43 = arith.addf %37, %42 : f32
    %cst_15 = arith.constant 5.000000e-06 : f32
    %44 = arith.mulf %cst_15, %43 : f32
    %45 = arith.addf %26, %44 : f32
    %46 = tpu.iota {dimensions = array<i32: 1>} : vector<1x128xi32>
    %c0_i32 = arith.constant 0 : i32
    %47 = vector.broadcast %c0_i32 : i32 to vector<1x128xi32>
    %48 = arith.cmpi eq, %46, %47 : vector<1x128xi32>
    %cst_16 = arith.constant 0.000000e+00 : f32
    %49 = vector.broadcast %45 : f32 to vector<1x128xf32>
    %50 = vector.broadcast %cst_16 : f32 to vector<1x128xf32>
    %51 = arith.select %48, %49, %50 : vector<1x128xi1>, vector<1x128xf32>
    %c1_i32 = arith.constant 1 : i32
    %52 = vector.broadcast %c1_i32 : i32 to vector<1x128xi32>
    %53 = arith.cmpi eq, %46, %52 : vector<1x128xi32>
    %cst_17 = arith.constant 0.000000e+00 : f32
    %54 = vector.broadcast %26 : f32 to vector<1x128xf32>
    %55 = vector.broadcast %cst_17 : f32 to vector<1x128xf32>
    %56 = arith.select %53, %54, %55 : vector<1x128xi1>, vector<1x128xf32>
    %57 = arith.addf %51, %56 : vector<1x128xf32>
    %c2_i32 = arith.constant 2 : i32
    %58 = vector.broadcast %c2_i32 : i32 to vector<1x128xi32>
    %59 = arith.cmpi eq, %46, %58 : vector<1x128xi32>
    %cst_18 = arith.constant 0.000000e+00 : f32
    %60 = vector.broadcast %44 : f32 to vector<1x128xf32>
    %61 = vector.broadcast %cst_18 : f32 to vector<1x128xf32>
    %62 = arith.select %59, %60, %61 : vector<1x128xi1>, vector<1x128xf32>
    %63 = arith.addf %57, %62 : vector<1x128xf32>
    %c0_19 = arith.constant 0 : index
    %c0_20 = arith.constant 0 : index
    %64 = vector.load %arg3[%c0_19, %c0_20] : memref<1x128xf32, #tpu.memory_space<vmem>>, vector<1x128xf32>
    tpu.vector_store %arg3[%c0_19, %c0_20], %63 {strides = array<i32>} : memref<1x128xf32, #tpu.memory_space<vmem>>, vector<1x128xf32>,
    return
  }
}

</mosaic_0001>

<bundles_post_ra>
// kernel: kgat_forward.5
= control target key start
LH: loop header
LB: loop body
LE: loop exit
PB: predicated region body
PF: predicated region fallthrough
CT: control target
= control target key end

     0   :  { %vm34_vm0 = vcmask 7168   ;;  %v82_v50 = vlaneseq  ;;  %s144_s0 = inlined_call_operand.vmem [shape: f32[8,128], index: 0, kind: input, shape index: {}]   ;;  %s145_s1 = inlined_call_operand.vmem [shape: f32[8,128], index: 1, kind: input, shape index: {}]   ;;  %s146_s2 = inlined_call_operand.vmem [shape: f32[8,128], index: 2, kind: input, shape index: {}]   ;;  %s147_s3 = inlined_call_operand.vmem [shape: f32[1,128], index: 3, kind: output, shape index: {}]  }
   0x1   :  { %v14_v0 = vld [vmem:[%s144_s0] sm:$0xff] }
   0x2   :  { %v15_v1 = vld [vmem:[%s145_s1] sm:$0xff]  ;;  %v48_v5 = vmul.f32 %v14_v0, %v14_v0  ;;  %v83_v51 = vand.u32 127, %v82_v50 }
   0x3   :  { %v16_v2 = vld [vmem:[%s146_s2] sm:$0xff]  ;;  %v17_v3 = vmul.f32 %v15_v1, %v14_v0  ;;  %v58_v6 = vmul.f32 %v15_v1, %v15_v1 }
   0x4   :  { %v20_v4 = vmul.f32 %v16_v2, %v14_v0  ;;  %49 = vadd.xlane.f32.xlu1 %v48_v5  ;;  %v69_v21 = vmul.f32 %v16_v2, %v16_v2  ;;  %vm87_vm1 = vcmp.eq.s32.totalorder %v83_v51, 1  ;;  %vm84_vm2 = vcmp.eq.s32.totalorder %v83_v51, 0 }
   0x5   :  { %18 = vadd.xlane.f32.xlu0 %v17_v3  ;;  %vm91_vm3 = vcmp.eq.s32.totalorder %v83_v51, 2 }
   0x9   :  { %21 = vadd.xlane.f32.xlu0 %v20_v4 }
   0xd   :  { %59 = vadd.xlane.f32.xlu0 %v58_v6 }
  0x91   :  { %v50_v22 = vpop.xlane.xlu1 %49 }
  0x92   :  { %v19_v7 = vpop.xlane.xlu0 %18  ;;  %v51_v24 = vrot.slane %v50_v22, 4 }
  0x94   :  { %v52_v26 = vadd.f32 %v51_v24, %v50_v22 }
  0x96   :  { %v22_v8 = vpop.xlane.xlu0 %21  ;;  %v53_v28 = vrot.slane %v52_v26, 2 }
  0x97   :  { %v23_v9 = vsub.f32 %v19_v7, %v22_v8 }
  0x98   :  { %v54_v34 = vadd.f32 %v53_v28, %v52_v26 }
  0x99   :  { %v26_v10 = vand.u32 2147483647, %v23_v9  ;;  %v24_v15 = vsub.f32 0.0, %v23_v9 }
  0x9a   :  { %v60_v23 = vpop.xlane.xlu0 %59  ;;  %v55_v40 = vrot.slane %v54_v34, 1 }
  0x9b   :  { %v27_v11 = vsub.f32 0.0, %v26_v10  ;;  %v25_v17 = vmax.f32 %v24_v15, 0.0  ;;  %v61_v25 = vrot.slane %v60_v23, 4 }
  0x9c   :  { %v56_v46 = vadd.f32 %v55_v40, %v54_v34 }
  0x9d   :  { %v28_v12 = vmul.f32 1.442695, %v27_v11  ;;  %v62_v27 = vadd.f32 %v61_v25, %v60_v23 }
  0x9f   :  { %108 = vpow2.f32 %v28_v12  ;;  %v63_v30 = vrot.slane %v62_v27, 2 }
  0xa1   :  { %v64_v35 = vadd.f32 %v63_v30, %v62_v27 }
  0xa3   :  { %v65_v43 = vrot.slane %v64_v35, 1 }
  0xa5   :  { %v66_v47 = vadd.f32 %v65_v43, %v64_v35 }
  0xa9   :  { %v109_v13 = vpop.eup %108 }
  0xaa   :  { %v30_v14 = vadd.f32 1.0, %v109_v13 }
  0xac   :  { %110 = vlog2.f32 %v30_v14 }
  0xb6   :  { %v111_v16 = vpop.eup %110 }
  0xb7   :  { %v32_v18 = vmul.f32 0.6931472, %v111_v16 }
  0xb9   :  { %v33_v19 = vadd.f32 %v32_v18, %v25_v17 }
  0xbb   :  { %v35_v20 = vsel %vm34_vm0, %v33_v19, 0.0 }
  0xbc   :  { %36 = vadd.xlane.f32.xlu1 %v35_v20 }
  0xc0   :  { %70 = vadd.xlane.f32.xlu1 %v69_v21 }
 0x149   :  { %v37_v29 = vpop.xlane.xlu1 %36 }
 0x14a   :  { %v38_v31 = vrot.slane %v37_v29, 4 }
 0x14c   :  { %v39_v32 = vadd.f32 %v38_v31, %v37_v29 }
 0x14d   :  { %v71_v33 = vpop.xlane.xlu1 %70 }
 0x14e   :  { %v40_v36 = vrot.slane %v39_v32, 2  ;;  %v72_v37 = vrot.slane %v71_v33, 4 }
 0x150   :  { %v73_v38 = vadd.f32 %v72_v37, %v71_v33  ;;  %v41_v39 = vadd.f32 %v40_v36, %v39_v32 }
 0x152   :  { %v74_v41 = vrot.slane %v73_v38, 2  ;;  %v42_v42 = vrot.slane %v41_v39, 1 }
 0x154   :  { %v75_v44 = vadd.f32 %v74_v41, %v73_v38  ;;  %v43_v45 = vadd.f32 %v42_v42, %v41_v39 }
 0x156   :  { %100 = vpush %v43_v45  ;;  %v76_v48 = vrot.slane %v75_v44, 1 }
 0x157   :  { %102 = vpush %v56_v46 }
 0x158   :  { %104 = vpush %v66_v47  ;;  %v77_v49 = vadd.f32 %v76_v48, %v75_v44 }
 0x15a   :  { %106 = vpush %v77_v49 }
 0x187   :  { %s101_s0 = spop %100 }
 0x188   :  { %s103_s1 = spop %102  ;;  %s47_s20 = smul.f32 0.125, %s101_s0 }
 0x189   :  { %s105_s2 = spop %104 }
 0x18a   :  { %s68_s18 = sadd.f32 %s105_s2, %s103_s1  ;;  %v88_v52 = vstv %s47_s20 }
 0x18b   :  { %s107_s19 = spop %106  ;;  %v89_v55 = vsel %vm87_vm1, %v88_v52, 0.0 }
 0x18c   :  { %s79_s21 = sadd.f32 %s107_s19, %s68_s18 }
 0x18e   :  { %s80_s22 = smul.f32 5e-06, %s79_s21 }
 0x190   :  { %s81_s23 = sadd.f32 %s80_s22, %s47_s20  ;;  %v92_v54 = vstv %s80_s22 }
 0x191   :  { %v93_v58 = vsel %vm91_vm3, %v92_v54, 0.0 }
 0x192   :  { %v85_v53 = vstv %s81_s23 }
 0x193   :  { %v86_v56 = vsel %vm84_vm2, %v85_v53, 0.0 }
 0x194   :  { %v90_v57 = vadd.f32 %v89_v55, %v86_v56 }
 0x196   :  { %v94_v59 = vadd.f32 %v93_v58, %v90_v57 }
 0x198   :  { %95 = vst [vmem:[%s147_s3] sm:$0x1] %v94_v59 }

// kernel: kgat_forward.3
= control target key start
LH: loop header
LB: loop body
LE: loop exit
PB: predicated region body
PF: predicated region fallthrough
CT: control target
= control target key end

     0   :  { %v712_v40 = vmov 0.0|0.0   ;;  %vm713_vm0 = vmmov 0   ;;  %v714_v41 = vmov 0.0   ;;  %vm332_vm1 = vcmask 7168   ;;  %s969_s1 = inlined_call_operand.vmem [shape: f32[128,128], index: 1, kind: input, shape index: {}]   ;;  %s970_s0 = inlined_call_operand.vmem [shape: f32[128,128], index: 0, kind: input, shape index: {}]   ;;  %s971_s3 = inlined_call_operand.vmem [shape: f32[1,128], index: 3, kind: input, shape index: {}]   ;;  %s972_s4 = inlined_call_operand.vmem [shape: bf16[128,128], index: 4, kind: output, shape index: {0}]   ;;  %s973_s2 = inlined_call_operand.vmem [shape: f32[1,128], index: 2, kind: input, shape index: {}]   ;;  %s974_s5 = inlined_call_operand.vmem [shape: f32[128,1], index: 5, kind: output, shape index: {1}]   ;;  %s975_s6 = inlined_call_operand.vmem [shape: f32[1,128], index: 6, kind: output, shape index: {2}]  }
   0x1   :  { %v36_v0 = vld [vmem:[%s969_s1] sm:$0xff]  ;;  %v37_v1 = vld [vmem:[%s969_s1 + $0x8] sm:$0xff]  ;;  %v38_v2 = vld [vmem:[%s969_s1 + $0x10] sm:$0xff]  ;;  %685 = vmatprep.subr.bf16.mxu1 %v712_v40  ;;  %650 = vmatprep.mubr.msk.f32.mxu1 %vm713_vm0, %v714_v41 }
   0x2   :  { %v653_v3 = vpack.c.bf16 %v37_v1, %v36_v0  ;;  %v39_v4 = vld [vmem:[%s969_s1 + $0x18] sm:$0xff]  ;;  %v40_v6 = vld [vmem:[%s969_s1 + $0x20] sm:$0xff]  ;;  %v41_v7 = vld [vmem:[%s969_s1 + $0x28] sm:$0xff] }
   0x3   :  { %v657_v5 = vpack.c.bf16 %v39_v4, %v38_v2  ;;  %v661_v8 = vpack.c.bf16 %v41_v7, %v40_v6  ;;  %v20_v9 = vld [vmem:[%s970_s0] sm:$0xff]  ;;  %v42_v10 = vld [vmem:[%s969_s1 + $0x30] sm:$0xff]  ;;  %v43_v11 = vld [vmem:[%s969_s1 + $0x38] sm:$0xff] }
   0x4   :  { %654 = vmatprep.subr.bf16.mxu0 %v653_v3  ;;  %594 = vmatprep.mubr.f32.mxu0 %v20_v9  ;;  %v665_v12 = vpack.c.bf16 %v43_v11, %v42_v10  ;;  %v44_v13 = vld [vmem:[%s969_s1 + $0x40] sm:$0xff]  ;;  %v45_v14 = vld [vmem:[%s969_s1 + $0x48] sm:$0xff]  ;;  %v46_v16 = vld [vmem:[%s969_s1 + $0x50] sm:$0xff] }
   0x5   :  { %656 = vmatpush3.bf16.msra.mxu0 %v653_v3  ;;  %v669_v15 = vpack.c.bf16 %v45_v14, %v44_v13  ;;  %v47_v17 = vld [vmem:[%s969_s1 + $0x58] sm:$0xff]  ;;  %v48_v19 = vld [vmem:[%s969_s1 + $0x60] sm:$0xff]  ;;  %v49_v20 = vld [vmem:[%s969_s1 + $0x68] sm:$0xff] }
   0x6   :  { %658 = vmatprep.subr.bf16.mxu0 %v657_v5  ;;  %v673_v18 = vpack.c.bf16 %v47_v17, %v46_v16  ;;  %v677_v21 = vpack.c.bf16 %v49_v20, %v48_v19  ;;  %v50_v22 = vld [vmem:[%s969_s1 + $0x70] sm:$0xff]  ;;  %v51_v23 = vld [vmem:[%s969_s1 + $0x78] sm:$0xff]  ;;  %v21_v25 = vld [vmem:[%s970_s0 + $0x8] sm:$0xff] }
   0x7   :  { %v681_v24 = vpack.c.bf16 %v51_v23, %v50_v22  ;;  %v22_v26 = vld [vmem:[%s970_s0 + $0x10] sm:$0xff]  ;;  %v23_v27 = vld [vmem:[%s970_s0 + $0x18] sm:$0xff]  ;;  %v24_v28 = vld [vmem:[%s970_s0 + $0x20] sm:$0xff] }
   0x8   :  { %v25_v29 = vld [vmem:[%s970_s0 + $0x28] sm:$0xff]  ;;  %v26_v30 = vld [vmem:[%s970_s0 + $0x30] sm:$0xff]  ;;  %v27_v31 = vld [vmem:[%s970_s0 + $0x38] sm:$0xff] }
   0x9   :  { %660 = vmatpush3.bf16.msra.mxu0 %v657_v5  ;;  %v28_v32 = vld [vmem:[%s970_s0 + $0x40] sm:$0xff]  ;;  %v29_v33 = vld [vmem:[%s970_s0 + $0x48] sm:$0xff]  ;;  %v30_v34 = vld [vmem:[%s970_s0 + $0x50] sm:$0xff] }
   0xa   :  { %662 = vmatprep.subr.bf16.mxu0 %v661_v8  ;;  %v31_v35 = vld [vmem:[%s970_s0 + $0x58] sm:$0xff]  ;;  %v32_v36 = vld [vmem:[%s970_s0 + $0x60] sm:$0xff]  ;;  %v33_v37 = vld [vmem:[%s970_s0 + $0x68] sm:$0xff] }
   0xb   :  { %v34_v38 = vld [vmem:[%s970_s0 + $0x70] sm:$0xff]  ;;  %v35_v39 = vld [vmem:[%s970_s0 + $0x78] sm:$0xff]  ;;  %v850_v42 = vld [vmem:[%s971_s3] ss:$0 sm:$0xff] }
   0xc   :  { %v349_v19 = vld [vmem:[%s973_s2] sm:$0x1] }
   0xd   :  { %664 = vmatpush3.bf16.msra.mxu0 %v661_v8 }
   0xe   :  { %666 = vmatprep.subr.bf16.mxu0 %v665_v12 }
  0x11   :  { %668 = vmatpush3.bf16.msra.mxu0 %v665_v12 }
  0x12   :  { %670 = vmatprep.subr.bf16.mxu0 %v669_v15 }
  0x15   :  { %672 = vmatpush3.bf16.msra.mxu0 %v669_v15 }
  0x16   :  { %674 = vmatprep.subr.bf16.mxu0 %v673_v18 }
  0x19   :  { %676 = vmatpush3.bf16.msra.mxu0 %v673_v18 }
  0x1a   :  { %678 = vmatprep.subr.bf16.mxu0 %v677_v21 }
  0x1d   :  { %680 = vmatpush3.bf16.msra.mxu0 %v677_v21 }
  0x1e   :  { %682 = vmatprep.subr.bf16.mxu0 %v681_v24 }
  0x21   :  { %684 = vmatpush3.bf16.msra.mxu0 %v681_v24 }
  0x24   :  { %595 = vmatmul.mubr.f32.vlgmr.msra.gmra.mrb[0].mxu0 %v21_v25 }
  0x25   :  { %597 = vmatprep.mubr.f32.mxu0 %v22_v26 }
  0x28   :  { %598 = vmatmul.mubr.f32.gmra.mrb[2].mxu0 %v23_v27 }
  0x29   :  { %600 = vmatprep.mubr.f32.mxu0 %v24_v28 }
  0x2c   :  { %601 = vmatmul.mubr.f32.gmra.mrb[4].mxu0 %v25_v29 }
  0x2d   :  { %603 = vmatprep.mubr.f32.mxu0 %v26_v30 }
  0x30   :  { %604 = vmatmul.mubr.f32.gmra.mrb[6].mxu0 %v27_v31 }
  0x31   :  { %606 = vmatprep.mubr.f32.mxu0 %v28_v32 }
  0x34   :  { %607 = vmatmul.mubr.f32.gmra.mrb[8].mxu0 %v29_v33 }
  0x35   :  { %609 = vmatprep.mubr.f32.mxu0 %v30_v34 }
  0x38   :  { %610 = vmatmul.mubr.f32.gmra.mrb[10].mxu0 %v31_v35 }
  0x39   :  { %612 = vmatprep.mubr.f32.mxu0 %v32_v36 }
  0x3c   :  { %613 = vmatmul.mubr.f32.gmra.mrb[12].mxu0 %v33_v37 }
  0x3d   :  { %615 = vmatprep.mubr.f32.mxu0 %v34_v38 }
  0x40   :  { %616 = vmatmul.mubr.f32.gmra.mrb[14].mxu0 %v35_v39 }
  0xf7   :  { %v596_v43 = vpop.f32.mrb[0].mxu0 }
  0xf8   :  { %v118_v44 = vpop.f32.mrb[1].mxu0  ;;  %v285_v45 = vmul.f32 %v596_v43, %v850_v42 }
  0xf9   :  { %v469_v46 = vpack.c.bf16 %v596_v43, %v118_v44  ;;  %v284_v48 = vmul.f32 %v850_v42, %v118_v44 }
  0xfa   :  { %302 = vadd.xlane.f32.xlu0 %v285_v45 }
  0xfb   :  { %v599_v47 = vpop.f32.mrb[2].mxu0  ;;  %470 = vst [vmem:[%s972_s4] sm:$0xff] %v469_v46   ;;  %687 = vmatpush3.bf16.xpose.msra.mxu1 %v469_v46 }
  0xfc   :  { %v287_v49 = vmul.f32 %v599_v47, %v850_v42  ;;  %v128_v50 = vpop.f32.mrb[3].mxu0  ;;  %688 = vmatprep.subr.bf16.mxu1 %v712_v40 }
  0xfd   :  { %v474_v51 = vpack.c.bf16 %v599_v47, %v128_v50  ;;  %v286_v52 = vmul.f32 %v850_v42, %v128_v50 }
  0xfe   :  { %300 = vadd.xlane.f32.xlu0 %v284_v48  ;;  %306 = vadd.xlane.f32.xlu1 %v287_v49 }
  0xff   :  { %506 = vst [vmem:[%s972_s4 + $0x8] sm:$0xff] %v474_v51   ;;  %v602_v53 = vpop.f32.mrb[4].mxu0 }
 0x100   :  { %v138_v54 = vpop.f32.mrb[5].mxu0  ;;  %v289_v57 = vmul.f32 %v602_v53, %v850_v42 }
 0x101   :  { %v479_v55 = vpack.c.bf16 %v602_v53, %v138_v54  ;;  %v288_v56 = vmul.f32 %v850_v42, %v138_v54 }
 0x102   :  { %304 = vadd.xlane.f32.xlu1 %v286_v52 }
 0x103   :  { %690 = vmatpush3.bf16.xpose.msra.mxu1 %v474_v51  ;;  %507 = vst [vmem:[%s972_s4 + $0x10] sm:$0xff] %v479_v55   ;;  %308 = vadd.xlane.f32.xlu0 %v288_v56  ;;  %v605_v58 = vpop.f32.mrb[6].mxu0 }
 0x104   :  { %691 = vmatprep.subr.bf16.mxu1 %v712_v40  ;;  %v148_v59 = vpop.f32.mrb[7].mxu0  ;;  %v291_v62 = vmul.f32 %v605_v58, %v850_v42 }
 0x105   :  { %v484_v60 = vpack.c.bf16 %v605_v58, %v148_v59  ;;  %v290_v61 = vmul.f32 %v850_v42, %v148_v59 }
 0x106   :  { %310 = vadd.xlane.f32.xlu1 %v289_v57 }
 0x107   :  { %508 = vst [vmem:[%s972_s4 + $0x18] sm:$0xff] %v484_v60   ;;  %312 = vadd.xlane.f32.xlu0 %v290_v61  ;;  %v608_v63 = vpop.f32.mrb[8].mxu0 }
 0x108   :  { %v158_v0 = vpop.f32.mrb[9].mxu0  ;;  %v293_v3 = vmul.f32 %v608_v63, %v850_v42 }
 0x109   :  { %v489_v1 = vpack.c.bf16 %v608_v63, %v158_v0  ;;  %v292_v2 = vmul.f32 %v850_v42, %v158_v0 }
 0x10a   :  { %314 = vadd.xlane.f32.xlu1 %v291_v62 }
 0x10b   :  { %693 = vmatpush3.bf16.xpose.msra.mxu1 %v479_v55  ;;  %509 = vst [vmem:[%s972_s4 + $0x20] sm:$0xff] %v489_v1   ;;  %316 = vadd.xlane.f32.xlu0 %v292_v2  ;;  %v611_v4 = vpop.f32.mrb[10].mxu0 }
 0x10c   :  { %694 = vmatprep.subr.bf16.mxu1 %v712_v40  ;;  %v168_v5 = vpop.f32.mrb[11].mxu0  ;;  %v295_v8 = vmul.f32 %v611_v4, %v850_v42 }
 0x10d   :  { %v494_v6 = vpack.c.bf16 %v611_v4, %v168_v5  ;;  %v294_v7 = vmul.f32 %v850_v42, %v168_v5 }
 0x10e   :  { %318 = vadd.xlane.f32.xlu1 %v293_v3 }
 0x10f   :  { %510 = vst [vmem:[%s972_s4 + $0x28] sm:$0xff] %v494_v6   ;;  %320 = vadd.xlane.f32.xlu0 %v294_v7  ;;  %v614_v9 = vpop.f32.mrb[12].mxu0 }
 0x110   :  { %v178_v10 = vpop.f32.mrb[13].mxu0  ;;  %v297_v13 = vmul.f32 %v614_v9, %v850_v42 }
 0x111   :  { %v499_v11 = vpack.c.bf16 %v614_v9, %v178_v10  ;;  %v296_v12 = vmul.f32 %v850_v42, %v178_v10 }
 0x112   :  { %322 = vadd.xlane.f32.xlu1 %v295_v8 }
 0x113   :  { %696 = vmatpush3.bf16.xpose.msra.mxu1 %v484_v60  ;;  %511 = vst [vmem:[%s972_s4 + $0x30] sm:$0xff] %v499_v11   ;;  %324 = vadd.xlane.f32.xlu0 %v296_v12  ;;  %v617_v14 = vpop.f32.mrb[14].mxu0 }
 0x114   :  { %697 = vmatprep.subr.bf16.mxu1 %v712_v40  ;;  %v188_v15 = vpop.f32.mrb[15].mxu0  ;;  %v299_v18 = vmul.f32 %v617_v14, %v850_v42 }
 0x115   :  { %v504_v16 = vpack.c.bf16 %v617_v14, %v188_v15  ;;  %v298_v17 = vmul.f32 %v850_v42, %v188_v15 }
 0x116   :  { %326 = vadd.xlane.f32.xlu1 %v297_v13 }
 0x117   :  { %512 = vst [vmem:[%s972_s4 + $0x38] sm:$0xff] %v504_v16   ;;  %328 = vadd.xlane.f32.xlu0 %v298_v17 }
 0x11a   :  { %330 = vadd.xlane.f32.xlu1 %v299_v18 }
 0x11b   :  { %699 = vmatpush3.bf16.xpose.msra.mxu1 %v489_v1 }
 0x11c   :  { %700 = vmatprep.subr.bf16.mxu1 %v712_v40 }
 0x123   :  { %702 = vmatpush3.bf16.xpose.msra.mxu1 %v494_v6 }
 0x124   :  { %703 = vmatprep.subr.bf16.mxu1 %v712_v40 }
 0x12b   :  { %705 = vmatpush3.bf16.xpose.msra.mxu1 %v499_v11 }
 0x12c   :  { %706 = vmatprep.subr.bf16.mxu1 %v712_v40 }
 0x133   :  { %708 = vmatpush3.bf16.xpose.msra.mxu1 %v504_v16 }
 0x13a   :  { %651 = vmatmul.mubr.f32.vlgmr.msra.gmra.mrb[0].mxu1 %v349_v19 }
 0x187   :  { %v303_v20 = vpop.xlane.xlu0 %302 }
 0x188   :  { %334 = vst.msk [vmem:[%s974_s5 + $0x8] sm:$0xff] %vm332_vm1, %v303_v20 }
 0x18b   :  { %v301_v21 = vpop.xlane.xlu0 %300  ;;  %v307_v22 = vpop.xlane.xlu1 %306 }
 0x18c   :  { %333 = vst.msk [vmem:[%s974_s5] sm:$0xff] %vm332_vm1, %v301_v21  ;;  %336 = vst.msk [vmem:[%s974_s5 + $0x18] sm:$0xff] %vm332_vm1, %v307_v22 }
 0x18f   :  { %v305_v23 = vpop.xlane.xlu1 %304 }
 0x190   :  { %335 = vst.msk [vmem:[%s974_s5 + $0x10] sm:$0xff] %vm332_vm1, %v305_v23  ;;  %v309_v24 = vpop.xlane.xlu0 %308 }
 0x191   :  { %337 = vst.msk [vmem:[%s974_s5 + $0x20] sm:$0xff] %vm332_vm1, %v309_v24 }
 0x193   :  { %v311_v25 = vpop.xlane.xlu1 %310 }
 0x194   :  { %338 = vst.msk [vmem:[%s974_s5 + $0x28] sm:$0xff] %vm332_vm1, %v311_v25  ;;  %v313_v26 = vpop.xlane.xlu0 %312 }
 0x195   :  { %339 = vst.msk [vmem:[%s974_s5 + $0x30] sm:$0xff] %vm332_vm1, %v313_v26 }
 0x197   :  { %v315_v27 = vpop.xlane.xlu1 %314 }
 0x198   :  { %340 = vst.msk [vmem:[%s974_s5 + $0x38] sm:$0xff] %vm332_vm1, %v315_v27  ;;  %v317_v28 = vpop.xlane.xlu0 %316 }
 0x199   :  { %341 = vst.msk [vmem:[%s974_s5 + $0x40] sm:$0xff] %vm332_vm1, %v317_v28 }
 0x19b   :  { %v319_v29 = vpop.xlane.xlu1 %318 }
 0x19c   :  { %342 = vst.msk [vmem:[%s974_s5 + $0x48] sm:$0xff] %vm332_vm1, %v319_v29  ;;  %v321_v30 = vpop.xlane.xlu0 %320 }
 0x19d   :  { %343 = vst.msk [vmem:[%s974_s5 + $0x50] sm:$0xff] %vm332_vm1, %v321_v30 }
 0x19f   :  { %v323_v31 = vpop.xlane.xlu1 %322 }
 0x1a0   :  { %344 = vst.msk [vmem:[%s974_s5 + $0x58] sm:$0xff] %vm332_vm1, %v323_v31  ;;  %v325_v32 = vpop.xlane.xlu0 %324 }
 0x1a1   :  { %345 = vst.msk [vmem:[%s974_s5 + $0x60] sm:$0xff] %vm332_vm1, %v325_v32 }
 0x1a3   :  { %v327_v33 = vpop.xlane.xlu1 %326 }
 0x1a4   :  { %346 = vst.msk [vmem:[%s974_s5 + $0x68] sm:$0xff] %vm332_vm1, %v327_v33  ;;  %v329_v34 = vpop.xlane.xlu0 %328 }
 0x1a5   :  { %347 = vst.msk [vmem:[%s974_s5 + $0x70] sm:$0xff] %vm332_vm1, %v329_v34 }
 0x1a7   :  { %v331_v35 = vpop.xlane.xlu1 %330 }
 0x1a8   :  { %348 = vst.msk [vmem:[%s974_s5 + $0x78] sm:$0xff] %vm332_vm1, %v331_v35 }
 0x20d   :  { %v416_v36 = vpop.f32.mrb[0].mxu1 }
 0x20e   :  { %420 = vst [vmem:[%s975_s6] sm:$0x1] %v416_v36  ;;  %v652_v37 = vpop.f32.mrb[1].mxu1 }

// kernel: kgat_forward.4
= control target key start
LH: loop header
LB: loop body
LE: loop exit
PB: predicated region body
PF: predicated region fallthrough
CT: control target
= control target key end

     0   :  { %vm27_vm0 = vcmask 7168   ;;  %v1900_v0 = vmov -1e+30   ;;  %v1901_v1 = vmov 0.0   ;;  %s3211_s0 = inlined_call_operand.<no memory space> [shape: s32[1], index: 0, kind: input, shape index: {}]   ;;  %s3212_s1 = inlined_call_operand.vmem [shape: bf16[128,128], index: 1, kind: input, shape index: {}]   ;;  %s3213_s2 = inlined_call_operand.vmem [shape: f32[128,1], index: 2, kind: input, shape index: {}]   ;;  %s3214_s3 = inlined_call_operand.vmem [shape: f32[1,128], index: 3, kind: input, shape index: {}]   ;;  %s3215_s4 = inlined_call_operand.vmem [shape: s32[4,128], index: 4, kind: input, shape index: {}]   ;;  %s3216_s5 = inlined_call_operand.vmem [shape: f32[1,128], index: 5, kind: input, shape index: {}]   ;;  %s3217_s6 = inlined_call_operand.vmem [shape: f32[128,128], index: 6, kind: output, shape index: {}]  }
   0x1   :  { %28 = vst.msk [vmem:[#allocation2] sm:$0xff] %vm27_vm0, %v1900_v0  ;;  %29 = vst.msk [vmem:[#allocation2 + $0x8] sm:$0xff] %vm27_vm0, %v1900_v0  ;;  %p1645_p0 = scmp.le.s32.totalorder %s3211_s0, 0 }
   0x2   :  { %30 = vst.msk [vmem:[#allocation2 + $0x10] sm:$0xff] %vm27_vm0, %v1900_v0  ;;  %31 = vst.msk [vmem:[#allocation2 + $0x18] sm:$0xff] %vm27_vm0, %v1900_v0  ;;  %v90_v2 = vld [vmem:[%s3213_s2 + $0x40] sm:$0xff] (!%p1645_p0)  ;;  %v1902_v4 = vmov (!%p1645_p0), 0   ;;  %v91_v5 = vld [vmem:[%s3213_s2 + $0x48] sm:$0xff] (!%p1645_p0)  ;;  %v250_v19 = vlaneseq (!%p1645_p0) }
   0x3   :  { %32 = vst.msk [vmem:[#allocation2 + $0x20] sm:$0xff] %vm27_vm0, %v1900_v0  ;;  %33 = vst.msk [vmem:[#allocation2 + $0x28] sm:$0xff] %vm27_vm0, %v1900_v0  ;;  %v82_v3 = vld [vmem:[%s3213_s2] sm:$0xff] (!%p1645_p0)  ;;  %1729 = vset.pattern.permute.xlu1 (!%p1645_p0), %v1902_v4  ;;  %1728 = vset.pattern.permute.xlu0 (!%p1645_p0), %v1902_v4  ;;  %v83_v6 = vld [vmem:[%s3213_s2 + $0x8] sm:$0xff] (!%p1645_p0) }
   0x4   :  { %34 = vst.msk [vmem:[#allocation2 + $0x30] sm:$0xff] %vm27_vm0, %v1900_v0  ;;  %35 = vst.msk [vmem:[#allocation2 + $0x38] sm:$0xff] %vm27_vm0, %v1900_v0  ;;  %141 = vperm.xlu1 (!%p1645_p0), %1729, %v90_v2   ;;  %101 = vperm.xlu0 (!%p1645_p0), %1728, %v82_v3   ;;  %v85_v7 = vld [vmem:[%s3213_s2 + $0x18] sm:$0xff] (!%p1645_p0)  ;;  %v84_v8 = vld [vmem:[%s3213_s2 + $0x10] sm:$0xff] (!%p1645_p0)  ;;  %v2024_v20 = vshrl.u32 (!%p1645_p0), %v250_v19, 7  ;;  %v2069_v30 = vand.u32 (!%p1645_p0), 127, %v250_v19 }
   0x5   :  { %36 = vst.msk [vmem:[#allocation2 + $0x40] sm:$0xff] %vm27_vm0, %v1900_v0  ;;  %37 = vst.msk [vmem:[#allocation2 + $0x48] sm:$0xff] %vm27_vm0, %v1900_v0  ;;  %v93_v9 = vld [vmem:[%s3213_s2 + $0x58] sm:$0xff] (!%p1645_p0)  ;;  %v92_v10 = vld [vmem:[%s3213_s2 + $0x50] sm:$0xff] (!%p1645_p0) }
   0x6   :  { %38 = vst.msk [vmem:[#allocation2 + $0x50] sm:$0xff] %vm27_vm0, %v1900_v0  ;;  %39 = vst.msk [vmem:[#allocation2 + $0x58] sm:$0xff] %vm27_vm0, %v1900_v0  ;;  %v87_v11 = vld [vmem:[%s3213_s2 + $0x28] sm:$0xff] (!%p1645_p0)  ;;  %v86_v12 = vld [vmem:[%s3213_s2 + $0x20] sm:$0xff] (!%p1645_p0)  ;;  %v2037_v23 = vadd.s32 (!%p1645_p0), 64, %v2024_v20  ;;  %v2040_v24 = vadd.s32 (!%p1645_p0), 8, %v2024_v20 }
   0x7   :  { %40 = vst.msk [vmem:[#allocation2 + $0x60] sm:$0xff] %vm27_vm0, %v1900_v0  ;;  %41 = vst.msk [vmem:[#allocation2 + $0x68] sm:$0xff] %vm27_vm0, %v1900_v0  ;;  %v95_v13 = vld [vmem:[%s3213_s2 + $0x68] sm:$0xff] (!%p1645_p0)  ;;  %v94_v14 = vld [vmem:[%s3213_s2 + $0x60] sm:$0xff] (!%p1645_p0)  ;;  %v2056_v26 = vadd.s32 (!%p1645_p0), 72, %v2024_v20  ;;  %v2067_v29 = vadd.s32 (!%p1645_p0), 16, %v2024_v20 }
   0x8   :  { %42 = vst.msk [vmem:[#allocation2 + $0x70] sm:$0xff] %vm27_vm0, %v1900_v0  ;;  %43 = vst.msk [vmem:[#allocation2 + $0x78] sm:$0xff] %vm27_vm0, %v1900_v0  ;;  %146 = vperm.xlu1 (!%p1645_p0), %1729, %v91_v5   ;;  %106 = vperm.xlu0 (!%p1645_p0), %1728, %v83_v6   ;;  %v89_v15 = vld [vmem:[%s3213_s2 + $0x38] sm:$0xff] (!%p1645_p0)  ;;  %v88_v16 = vld [vmem:[%s3213_s2 + $0x30] sm:$0xff] (!%p1645_p0)  ;;  %v2094_v39 = vadd.s32 (!%p1645_p0), 24, %v2024_v20  ;;  %v2129_v59 = vadd.s32 (!%p1645_p0), 80, %v2024_v20 }
   0x9   :  { %44 = vst.msk [vmem:[#allocation3] sm:$0xff] %vm27_vm0, %v1901_v1  ;;  %45 = vst.msk [vmem:[#allocation3 + $0x8] sm:$0xff] %vm27_vm0, %v1901_v1  ;;  %v97_v17 = vld [vmem:[%s3213_s2 + $0x78] sm:$0xff] (!%p1645_p0)  ;;  %v96_v18 = vld [vmem:[%s3213_s2 + $0x70] sm:$0xff] (!%p1645_p0)  ;;  %v2174_v19 = vadd.s32 (!%p1645_p0), 40, %v2024_v20 }
   0xa   :  { %46 = vst.msk [vmem:[#allocation3 + $0x10] sm:$0xff] %vm27_vm0, %v1901_v1  ;;  %47 = vst.msk [vmem:[#allocation3 + $0x18] sm:$0xff] %vm27_vm0, %v1901_v1  ;;  %v2029_v21 = vld [vmem:[%s3215_s4] ss:$0 sm:$0xff] (!%p1645_p0)  ;;  %v2034_v22 = vld [vmem:[%s3215_s4 + $0x1] ss:$0 sm:$0xff] (!%p1645_p0) }
   0xb   :  { %48 = vst.msk [vmem:[#allocation3 + $0x20] sm:$0xff] %vm27_vm0, %v1901_v1  ;;  %49 = vst.msk [vmem:[#allocation3 + $0x28] sm:$0xff] %vm27_vm0, %v1901_v1  ;;  %vm294_vm1 = vcmp.eq.s32.totalorder (!%p1645_p0), %v2024_v20, %v2029_v21  ;;  %vm331_vm2 = vcmp.eq.s32.totalorder (!%p1645_p0), %v2024_v20, %v2034_v22  ;;  %v2049_v25 = vld [vmem:[%s3215_s4 + $0x2] ss:$0 sm:$0xff] (!%p1645_p0)  ;;  %vm302_vm3 = vcmp.eq.s32.totalorder (!%p1645_p0), %v2037_v23, %v2029_v21  ;;  %v2076_v34 = vld [vmem:[%s3215_s4 + $0x3] ss:$0 sm:$0xff] (!%p1645_p0) }
   0xc   :  { %50 = vst.msk [vmem:[#allocation3 + $0x30] sm:$0xff] %vm27_vm0, %v1901_v1  ;;  %51 = vst.msk [vmem:[#allocation3 + $0x38] sm:$0xff] %vm27_vm0, %v1901_v1  ;;  %116 = vperm.xlu1 (!%p1645_p0), %1729, %v85_v7   ;;  %111 = vperm.xlu0 (!%p1645_p0), %1728, %v84_v8   ;;  %vm339_vm4 = vcmp.eq.s32.totalorder (!%p1645_p0), %v2037_v23, %v2034_v22  ;;  %v310_v27 = vsel (!%p1645_p0), %vm294_vm1, 1, %v1902_v4  ;;  %v347_v28 = vsel (!%p1645_p0), %vm331_vm2, 1, %v1902_v4  ;;  %v318_v31 = vsel (!%p1645_p0), %vm302_vm3, 1, %v1902_v4 }
   0xd   :  { %52 = vst.msk [vmem:[#allocation3 + $0x40] sm:$0xff] %vm27_vm0, %v1901_v1  ;;  %53 = vst.msk [vmem:[#allocation3 + $0x48] sm:$0xff] %vm27_vm0, %v1901_v1  ;;  %vm295_vm5 = vcmp.eq.s32.totalorder (!%p1645_p0), %v2040_v24, %v2029_v21  ;;  %vm332_vm6 = vcmp.eq.s32.totalorder (!%p1645_p0), %v2040_v24, %v2034_v22  ;;  %vm384_vm7 = vcmp.eq.s32.totalorder (!%p1645_p0), %v2024_v20, %v2049_v25  ;;  %v355_v32 = vsel (!%p1645_p0), %vm339_vm4, 1, %v1902_v4 }
   0xe   :  { %54 = vst.msk [vmem:[#allocation3 + $0x50] sm:$0xff] %vm27_vm0, %v1901_v1  ;;  %55 = vst.msk [vmem:[#allocation3 + $0x58] sm:$0xff] %vm27_vm0, %v1901_v1  ;;  %v363_v33 = vadd.s32 (!%p1645_p0), %v347_v28, %v310_v27  ;;  %vm392_vm8 = vcmp.eq.s32.totalorder (!%p1645_p0), %v2037_v23, %v2049_v25  ;;  %v311_v35 = vsel (!%p1645_p0), %vm295_vm5, 1, %v1902_v4  ;;  %v348_v36 = vsel (!%p1645_p0), %vm332_vm6, 1, %v1902_v4 }
   0xf   :  { %56 = vst.msk [vmem:[#allocation3 + $0x60] sm:$0xff] %vm27_vm0, %v1901_v1  ;;  %57 = vst.msk [vmem:[#allocation3 + $0x68] sm:$0xff] %vm27_vm0, %v1901_v1  ;;  %v400_v37 = vsel (!%p1645_p0), %vm384_vm7, 1, %v1902_v4  ;;  %vm385_vm9 = vcmp.eq.s32.totalorder (!%p1645_p0), %v2040_v24, %v2049_v25  ;;  %vm303_vm10 = vcmp.eq.s32.totalorder (!%p1645_p0), %v2056_v26, %v2029_v21  ;;  %vm340_vm11 = vcmp.eq.s32.totalorder (!%p1645_p0), %v2056_v26, %v2034_v22 }
  0x10   :  { %58 = vst.msk [vmem:[#allocation3 + $0x70] sm:$0xff] %vm27_vm0, %v1901_v1  ;;  %59 = vst.msk [vmem:[#allocation3 + $0x78] sm:$0xff] %vm27_vm0, %v1901_v1  ;;  %156 = vperm.xlu1 (!%p1645_p0), %1729, %v93_v9   ;;  %151 = vperm.xlu0 (!%p1645_p0), %1728, %v92_v10   ;;  %v371_v38 = vadd.s32 (!%p1645_p0), %v355_v32, %v318_v31  ;;  %vm296_vm12 = vcmp.eq.s32.totalorder (!%p1645_p0), %v2067_v29, %v2029_v21  ;;  %v408_v40 = vsel (!%p1645_p0), %vm392_vm8, 1, %v1902_v4 }
  0x11   :  { %60 = vst [vmem:[#allocation4] sm:$0xff] %v1901_v1  ;;  %61 = vst [vmem:[#allocation4 + $0x8] sm:$0xff] %v1901_v1  ;;  %vm333_vm13 = vcmp.eq.s32.totalorder (!%p1645_p0), %v2067_v29, %v2034_v22  ;;  %vm437_vm14 = vcmp.eq.s32.totalorder (!%p1645_p0), %v2024_v20, %v2076_v34  ;;  %vm445_vm15 = vcmp.eq.s32.totalorder (!%p1645_p0), %v2037_v23, %v2076_v34  ;;  %v401_v43 = vsel (!%p1645_p0), %vm385_vm9, 1, %v1902_v4 }
  0x12   :  { %62 = vst [vmem:[#allocation4 + $0x10] sm:$0xff] %v1901_v1  ;;  %63 = vst [vmem:[#allocation4 + $0x18] sm:$0xff] %v1901_v1  ;;  %81 = sbr.rel (%p1645_p0) target bundleno = 679 (0x2a7), region = 29  ;;  %v364_v41 = vadd.s32 (!%p1645_p0), %v348_v36, %v311_v35  ;;  %v416_v42 = vadd.s32 (!%p1645_p0), %v400_v37, %v363_v33  ;;  %v319_v44 = vsel (!%p1645_p0), %vm303_vm10, 1, %v1902_v4  ;;  %v356_v45 = vsel (!%p1645_p0), %vm340_vm11, 1, %v1902_v4 }
  0x13   :  { %64 = vst [vmem:[#allocation4 + $0x20] sm:$0xff] %v1901_v1  ;;  %65 = vst [vmem:[#allocation4 + $0x28] sm:$0xff] %v1901_v1  ;;  %vm438_vm1 = vcmp.eq.s32.totalorder (!%p1645_p0), %v2040_v24, %v2076_v34  ;;  %vm393_vm2 = vcmp.eq.s32.totalorder (!%p1645_p0), %v2056_v26, %v2049_v25  ;;  %v312_v46 = vsel (!%p1645_p0), %vm296_vm12, 1, %v1902_v4  ;;  %v349_v47 = vsel (!%p1645_p0), %vm333_vm13, 1, %v1902_v4 }
  0x14   :  { %66 = vst [vmem:[#allocation4 + $0x30] sm:$0xff] %v1901_v1  ;;  %67 = vst [vmem:[#allocation4 + $0x38] sm:$0xff] %v1901_v1  ;;  %126 = vperm.xlu1 (!%p1645_p0), %1729, %v87_v11   ;;  %121 = vperm.xlu0 (!%p1645_p0), %1728, %v86_v12   ;;  %v424_v48 = vadd.s32 (!%p1645_p0), %v408_v40, %v371_v38  ;;  %vm386_vm3 = vcmp.eq.s32.totalorder (!%p1645_p0), %v2067_v29, %v2049_v25  ;;  %v453_v49 = vsel (!%p1645_p0), %vm437_vm14, 1, %v1902_v4 }
  0x15   :  { %68 = vst [vmem:[#allocation4 + $0x40] sm:$0xff] %v1901_v1  ;;  %69 = vst [vmem:[#allocation4 + $0x48] sm:$0xff] %v1901_v1  ;;  %vm297_vm4 = vcmp.eq.s32.totalorder (!%p1645_p0), %v2094_v39, %v2029_v21  ;;  %vm334_vm5 = vcmp.eq.s32.totalorder (!%p1645_p0), %v2094_v39, %v2034_v22  ;;  %v461_v50 = vsel (!%p1645_p0), %vm445_vm15, 1, %v1902_v4  ;;  %v417_v51 = vadd.s32 (!%p1645_p0), %v401_v43, %v364_v41 }
  0x16   :  { %70 = vst [vmem:[#allocation4 + $0x50] sm:$0xff] %v1901_v1  ;;  %71 = vst [vmem:[#allocation4 + $0x58] sm:$0xff] %v1901_v1  ;;  %v372_v52 = vadd.s32 (!%p1645_p0), %v356_v45, %v319_v44  ;;  %v454_v53 = vsel (!%p1645_p0), %vm438_vm1, 1, %v1902_v4  ;;  %v409_v54 = vsel (!%p1645_p0), %vm393_vm2, 1, %v1902_v4  ;;  %vm446_vm6 = vcmp.eq.s32.totalorder (!%p1645_p0), %v2056_v26, %v2076_v34 }
  0x17   :  { %72 = vst [vmem:[#allocation4 + $0x60] sm:$0xff] %v1901_v1  ;;  %73 = vst [vmem:[#allocation4 + $0x68] sm:$0xff] %v1901_v1  ;;  %v365_v55 = vadd.s32 (!%p1645_p0), %v349_v47, %v312_v46  ;;  %v402_v56 = vsel (!%p1645_p0), %vm386_vm3, 1, %v1902_v4  ;;  %v313_v57 = vsel (!%p1645_p0), %vm297_vm4, 1, %v1902_v4  ;;  %v350_v58 = vsel (!%p1645_p0), %vm334_vm5, 1, %v1902_v4 }
  0x18   :  { %74 = vst [vmem:[#allocation4 + $0x70] sm:$0xff] %v1901_v1  ;;  %75 = vst [vmem:[#allocation4 + $0x78] sm:$0xff] %v1901_v1  ;;  %166 = vperm.xlu1 (!%p1645_p0), %1729, %v95_v13   ;;  %161 = vperm.xlu0 (!%p1645_p0), %1728, %v94_v14   ;;  %v469_v60 = vadd.s32 (!%p1645_p0), %v453_v49, %v416_v42  ;;  %v477_v61 = vadd.s32 (!%p1645_p0), %v461_v50, %v424_v48  ;;  %v462_v0 = vsel (!%p1645_p0), %vm446_vm6, 1, %v1902_v4 }
  0x19   :  { %vm439_vm7 = vcmp.eq.s32.totalorder %v2067_v29, %v2076_v34  ;;  %vm387_vm8 = vcmp.eq.s32.totalorder %v2094_v39, %v2049_v25  ;;  %vm485_vm9 = vcmp.eq.s32.totalorder %v2024_v20, %v2069_v30  ;;  %vm493_vm10 = vcmp.eq.s32.totalorder %v2037_v23, %v2069_v30 }
  0x1a   :  { %v470_v62 = vadd.s32 %v454_v53, %v417_v51  ;;  %v425_v63 = vadd.s32 %v409_v54, %v372_v52  ;;  %vm486_vm11 = vcmp.eq.s32.totalorder %v2040_v24, %v2069_v30  ;;  %v418_v1 = vadd.s32 %v402_v56, %v365_v55 }
  0x1b   :  { %v366_v2 = vadd.s32 %v350_v58, %v313_v57  ;;  %v455_v3 = vsel %vm439_vm7, 1, %v1902_v4  ;;  %v403_v5 = vsel %vm387_vm8, 1, %v1902_v4  ;;  %vm304_vm12 = vcmp.eq.s32.totalorder %v2129_v59, %v2029_v21 }
  0x1c   :  { %136 = vperm.xlu1 %1729, %v89_v15   ;;  %131 = vperm.xlu0 %1728, %v88_v16   ;;  %vm341_vm13 = vcmp.eq.s32.totalorder %v2129_v59, %v2034_v22  ;;  %v2148_v6 = vsel %vm485_vm9, 1, %v469_v60  ;;  %v2150_v7 = vsel %vm493_vm10, 1, %v477_v61  ;;  %vm440_vm14 = vcmp.eq.s32.totalorder %v2094_v39, %v2076_v34 }
  0x1d   :  { %v2154_v8 = vsel %vm486_vm11, 1, %v470_v62  ;;  %v478_v9 = vadd.s32 %v462_v0, %v425_v63  ;;  %vm494_vm15 = vcmp.eq.s32.totalorder %v2056_v26, %v2069_v30  ;;  %vm487_vm1 = vcmp.eq.s32.totalorder %v2067_v29, %v2069_v30 }
  0x1e   :  { %v471_v10 = vadd.s32 %v455_v3, %v418_v1  ;;  %v419_v11 = vadd.s32 %v403_v5, %v366_v2  ;;  %v320_v12 = vsel %vm304_vm12, 1, %v1902_v4  ;;  %v357_v13 = vsel %vm341_vm13, 1, %v1902_v4 }
  0x1f   :  { %v456_v14 = vsel %vm440_vm14, 1, %v1902_v4  ;;  %vm394_vm2 = vcmp.eq.s32.totalorder %v2129_v59, %v2049_v25  ;;  %v2166_v15 = vadd.s32 88, %v2024_v20  ;;  %v2169_v16 = vadd.s32 32, %v2024_v20 }
  0x20   :  { %176 = vperm.xlu1 %1729, %v97_v17   ;;  %171 = vperm.xlu0 %1728, %v96_v18   ;;  %v3233_v17 = vcvt.s32.f32 %v2148_v6  ;;  %v3231_v18 = vcvt.s32.f32 %v2150_v7  ;;  %v3232_v23 = vcvt.s32.f32 %v2154_v8  ;;  %v373_v24 = vadd.s32 %v357_v13, %v320_v12 }
  0x21   :  { %vm447_vm3 = vcmp.eq.s32.totalorder %v2129_v59, %v2076_v34  ;;  %v2180_v27 = vadd.s32 96, %v2024_v20  ;;  %v2185_v28 = vsel %vm494_vm15, 1, %v478_v9  ;;  %v2190_v31 = vsel %vm487_vm1, 1, %v471_v10 }
  0x22   :  { %v2192_v32 = vadd.s32 %v456_v14, %v419_v11  ;;  %v410_v33 = vsel %vm394_vm2, 1, %v1902_v4  ;;  %vm305_vm4 = vcmp.eq.s32.totalorder %v2166_v15, %v2029_v21  ;;  %vm342_vm5 = vcmp.eq.s32.totalorder %v2166_v15, %v2034_v22 }
  0x23   :  { %vm298_vm6 = vcmp.eq.s32.totalorder %v2169_v16, %v2029_v21  ;;  %vm335_vm7 = vcmp.eq.s32.totalorder %v2169_v16, %v2034_v22  ;;  %v463_v26 = vsel %vm447_vm3, 1, %v1902_v4  ;;  %vm299_vm8 = vcmp.eq.s32.totalorder %v2174_v19, %v2029_v21 }
  0x24   :  { %vm336_vm9 = vcmp.eq.s32.totalorder %v2174_v19, %v2034_v22  ;;  %v2209_v29 = vadd.s32 104, %v2024_v20  ;;  %v426_v35 = vadd.s32 %v410_v33, %v373_v24  ;;  %vm395_vm10 = vcmp.eq.s32.totalorder %v2166_v15, %v2049_v25 }
  0x25   :  { %vm306_vm11 = vcmp.eq.s32.totalorder %v2180_v27, %v2029_v21  ;;  %vm343_vm12 = vcmp.eq.s32.totalorder %v2180_v27, %v2034_v22  ;;  %v321_v36 = vsel %vm305_vm4, 1, %v1902_v4  ;;  %v358_v37 = vsel %vm342_vm5, 1, %v1902_v4 }
  0x26   :  { %v314_v38 = vsel %vm298_vm6, 1, %v1902_v4  ;;  %v351_v40 = vsel %vm335_vm7, 1, %v1902_v4  ;;  %vm388_vm13 = vcmp.eq.s32.totalorder %v2169_v16, %v2049_v25  ;;  %v315_v41 = vsel %vm299_vm8, 1, %v1902_v4 }
  0x27   :  { %v352_v42 = vsel %vm336_vm9, 1, %v1902_v4  ;;  %vm389_vm14 = vcmp.eq.s32.totalorder %v2174_v19, %v2049_v25  ;;  %v322_v43 = vsel %vm306_vm11, 1, %v1902_v4  ;;  %v359_v44 = vsel %vm343_vm12, 1, %v1902_v4 }
  0x28   :  { %vm307_vm15 = vcmp.eq.s32.totalorder %v2209_v29, %v2029_v21  ;;  %vm344_vm1 = vcmp.eq.s32.totalorder %v2209_v29, %v2034_v22  ;;  %v374_v45 = vadd.s32 %v358_v37, %v321_v36  ;;  %v411_v46 = vsel %vm395_vm10, 1, %v1902_v4 }
  0x29   :  { %v367_v47 = vadd.s32 %v351_v40, %v314_v38  ;;  %vm396_vm2 = vcmp.eq.s32.totalorder %v2180_v27, %v2049_v25  ;;  %vm488_vm3 = vcmp.eq.s32.totalorder %v2094_v39, %v2069_v30  ;;  %vm495_vm4 = vcmp.eq.s32.totalorder %v2129_v59, %v2069_v30 }
  0x2a   :  { %vm448_vm5 = vcmp.eq.s32.totalorder %v2166_v15, %v2076_v34  ;;  %v404_v48 = vsel %vm388_vm13, 1, %v1902_v4  ;;  %v368_v49 = vadd.s32 %v352_v42, %v315_v41  ;;  %v2247_v50 = vadd.s32 48, %v2024_v20 }
  0x2b   :  { %v405_v51 = vsel %vm389_vm14, 1, %v1902_v4  ;;  %v375_v52 = vadd.s32 %v359_v44, %v322_v43  ;;  %v323_v53 = vsel %vm307_vm15, 1, %v1902_v4  ;;  %v360_v54 = vsel %vm344_vm1, 1, %v1902_v4 }
  0x2c   :  { %vm441_vm6 = vcmp.eq.s32.totalorder %v2169_v16, %v2076_v34  ;;  %vm442_vm7 = vcmp.eq.s32.totalorder %v2174_v19, %v2076_v34  ;;  %v412_v55 = vsel %vm396_vm2, 1, %v1902_v4  ;;  %vm397_vm8 = vcmp.eq.s32.totalorder %v2209_v29, %v2049_v25 }
  0x2d   :  { %v427_v56 = vadd.s32 %v411_v46, %v374_v45  ;;  %v464_v57 = vsel %vm448_vm5, 1, %v1902_v4  ;;  %v420_v58 = vadd.s32 %v404_v48, %v367_v47  ;;  %vm449_vm9 = vcmp.eq.s32.totalorder %v2180_v27, %v2076_v34 }
  0x2e   :  { %v421_v60 = vadd.s32 %v405_v51, %v368_v49  ;;  %v376_v61 = vadd.s32 %v360_v54, %v323_v53  ;;  %vm300_vm10 = vcmp.eq.s32.totalorder %v2247_v50, %v2029_v21  ;;  %vm337_vm11 = vcmp.eq.s32.totalorder %v2247_v50, %v2034_v22 }
  0x2f   :  { %v457_v62 = vsel %vm441_vm6, 1, %v1902_v4  ;;  %v458_v63 = vsel %vm442_vm7, 1, %v1902_v4  ;;  %v428_v0 = vadd.s32 %v412_v55, %v375_v52  ;;  %v413_v1 = vsel %vm397_vm8, 1, %v1902_v4 }
  0x30   :  { %v479_v2 = vadd.s32 %v463_v26, %v426_v35  ;;  %vm496_vm12 = vcmp.eq.s32.totalorder %v2166_v15, %v2069_v30  ;;  %v465_v3 = vsel %vm449_vm9, 1, %v1902_v4  ;;  %vm450_vm13 = vcmp.eq.s32.totalorder %v2209_v29, %v2076_v34 }
  0x31   :  { %v480_v5 = vadd.s32 %v464_v57, %v427_v56  ;;  %vm489_vm14 = vcmp.eq.s32.totalorder %v2169_v16, %v2069_v30  ;;  %v316_v9 = vsel %vm300_vm10, 1, %v1902_v4  ;;  %v353_v10 = vsel %vm337_vm11, 1, %v1902_v4  ;;  %v2334_v16 = vld [vmem:[%s3214_s3] ss:$0 sm:$0xff] }
  0x32   :  { %v473_v11 = vadd.s32 %v457_v62, %v420_v58  ;;  %v474_v12 = vadd.s32 %v458_v63, %v421_v60  ;;  %v429_v13 = vadd.s32 %v413_v1, %v376_v61  ;;  %vm390_vm15 = vcmp.eq.s32.totalorder %v2247_v50, %v2049_v25 }
  0x33   :  { %vm490_vm1 = vcmp.eq.s32.totalorder %v2174_v19, %v2069_v30  ;;  %v481_v14 = vadd.s32 %v465_v3, %v428_v0  ;;  %v466_v24 = vsel %vm450_vm13, 1, %v1902_v4  ;;  %v2284_v33 = vadd.s32 56, %v2024_v20 }
  0x34   :  { %v3230_v26 = vcvt.s32.f32 %v2185_v28  ;;  %v3229_v35 = vcvt.s32.f32 %v2190_v31  ;;  %vm497_vm2 = vcmp.eq.s32.totalorder %v2180_v27, %v2069_v30  ;;  %v369_v36 = vadd.s32 %v353_v10, %v316_v9 }
  0x35   :  { %vm2292_vm5 = vcmp.gt.f32.partialorder %v3233_v17, 0.0  ;;  %v2300_v19 = vsel %vm488_vm3, 1, %v2192_v32  ;;  %v2305_v38 = vsel %vm495_vm4, 1, %v479_v2  ;;  %v2310_v27 = vsel %vm496_vm12, 1, %v480_v5 }
  0x36   :  { %v406_v40 = vsel %vm390_vm15, 1, %v1902_v4  ;;  %v2316_v41 = vsel %vm489_vm14, 1, %v473_v11  ;;  %v2318_v39 = vsel %vm490_vm1, 1, %v474_v12  ;;  %v482_v32 = vadd.s32 %v466_v24, %v429_v13 }
  0x37   :  { %vm443_vm3 = vcmp.eq.s32.totalorder %v2247_v50, %v2076_v34  ;;  %v2322_v59 = vsel %vm497_vm2, 1, %v481_v14  ;;  %vm498_vm4 = vcmp.eq.s32.totalorder %v2209_v29, %v2069_v30  ;;  %vm301_vm6 = vcmp.eq.s32.totalorder %v2284_v33, %v2029_v21 }
  0x38   :  { %v2329_v15 = vadd.s32 112, %v2024_v20  ;;  %v3228_v42 = vcvt.s32.f32 %v2300_v19  ;;  %v3227_v43 = vcvt.s32.f32 %v2305_v38  ;;  %v422_v44 = vadd.s32 %v406_v40, %v369_v36 }
  0x39   :  { %vm338_vm7 = vcmp.eq.s32.totalorder %v2284_v33, %v2034_v22  ;;  %vm2342_vm8 = vcmp.gt.f32.partialorder %v3231_v18, 0.0  ;;  %vm2348_vm9 = vcmp.gt.f32.partialorder %v3232_v23, 0.0  ;;  %v3226_v47 = vcvt.s32.f32 %v2310_v27  ;;  %v2722_v18 = vld [vmem:[#allocation2 + $0x70] sm:$0xff] }
  0x3a   :  { %v3218_v48 = vcvt.s32.f32 %v2316_v41  ;;  %v459_v49 = vsel %vm443_vm3, 1, %v1902_v4  ;;  %vm391_vm10 = vcmp.eq.s32.totalorder %v2284_v33, %v2049_v25  ;;  %v3225_v53 = vcvt.s32.f32 %v2318_v39 }
  0x3b   :  { %v3224_v54 = vcvt.s32.f32 %v2322_v59  ;;  %v2362_v55 = vsel %vm498_vm4, 1, %v482_v32  ;;  %v317_v56 = vsel %vm301_vm6, 1, %v1902_v4  ;;  %v354_v60 = vsel %vm338_vm7, 1, %v1902_v4 }
  0x3c   :  { %vm308_vm11 = vcmp.eq.s32.totalorder %v2329_v15, %v2029_v21  ;;  %v2373_v61 = vadd.s32 %v459_v49, %v422_v44  ;;  %v407_v29 = vsel %vm391_vm10, 1, %v1902_v4  ;;  %vm345_vm12 = vcmp.eq.s32.totalorder %v2329_v15, %v2034_v22 }
  0x3d   :  { %v2379_v62 = vadd.s32 120, %v2024_v20  ;;  %vm2383_vm14 = vcmp.gt.f32.partialorder %v3230_v26, 0.0  ;;  %vm2389_vm15 = vcmp.gt.f32.partialorder %v3229_v35, 0.0  ;;  %vm444_vm1 = vcmp.eq.s32.totalorder %v2284_v33, %v2076_v34  ;;  %v2706_v35 = vld [vmem:[#allocation2 + $0x68] sm:$0xff]  ;;  %v1736_v26 = vld [vmem:[%s3212_s1 + $0x30] sm:$0xff]  }
  0x3e   :  { %v370_v5 = vadd.s32 %v354_v60, %v317_v56  ;;  %v324_v9 = vsel %vm308_vm11, 1, %v1902_v4  ;;  %vm398_vm3 = vcmp.eq.s32.totalorder %v2329_v15, %v2049_v25  ;;  %vm491_vm4 = vcmp.eq.s32.totalorder %v2247_v50, %v2069_v30 }
  0x3f   :  { %v361_v13 = vsel %vm345_vm12, 1, %v1902_v4  ;;  %v460_v24 = vsel %vm444_vm1, 1, %v1902_v4  ;;  %vm309_vm6 = vcmp.eq.s32.totalorder %v2379_v62, %v2029_v21  ;;  %vm346_vm7 = vcmp.eq.s32.totalorder %v2379_v62, %v2034_v22 }
  0x40   :  { %vm2419_vm11 = vcmp.gt.f32.partialorder %v3228_v42, 0.0  ;;  %v414_v56 = vsel %vm398_vm3, 1, %v1902_v4  ;;  %vm492_vm1 = vcmp.eq.s32.totalorder %v2284_v33, %v2069_v30  ;;  %vm2468_vm3 = vcmp.gt.f32.partialorder %v3218_v48, 0.0 }
  0x41   :  { %v3223_v44 = vcvt.s32.f32 %v2362_v55 }
  0x83   :  { %v142_v51 = vpop.permute.xlu1 %141  ;;  %v102_v52 = vpop.permute.xlu0 %101 }
  0x84   :  { %v193_v57 = vadd.f32 %v2334_v16, %v142_v51  ;;  %v185_v58 = vadd.f32 %v2334_v16, %v102_v52  ;;  %v377_v52 = vadd.s32 %v361_v13, %v324_v9  ;;  %v423_v13 = vadd.s32 %v407_v29, %v370_v5 }
  0x86   :  { %v225_v63 = vmul.f32 0.2, %v193_v57  ;;  %v217_v0 = vmul.f32 0.2, %v185_v58  ;;  %vm201_vm13 = vcmp.gt.f32.partialorder %v185_v58, 0.0  ;;  %vm209_vm2 = vcmp.gt.f32.partialorder %v193_v57, 0.0 }
  0x87   :  { %v147_v20 = vpop.permute.xlu1 %146  ;;  %v107_v3 = vpop.permute.xlu0 %106 }
  0x88   :  { %v194_v10 = vadd.f32 %v2334_v16, %v147_v20  ;;  %v186_v11 = vadd.f32 %v2334_v16, %v107_v3  ;;  %v233_v12 = vsel %vm201_vm13, %v185_v58, %v217_v0  ;;  %v241_v32 = vsel %vm209_vm2, %v193_v57, %v225_v63 }
  0x89   :  { %v2408_v14 = vsel %vm2292_vm5, %v233_v12, -1e+30  ;;  %vm2425_vm5 = vcmp.gt.f32.partialorder %v3227_v43, 0.0  ;;  %vm451_vm13 = vcmp.eq.s32.totalorder %v2329_v15, %v2076_v34  ;;  %v325_v63 = vsel %vm309_vm6, 1, %v1902_v4 }
  0x8a   :  { %v226_v36 = vmul.f32 0.2, %v194_v10  ;;  %v218_v40 = vmul.f32 0.2, %v186_v11  ;;  %581 = vmax.xlane.f32.xlu0 %v2408_v14  ;;  %vm202_vm10 = vcmp.gt.f32.partialorder %v186_v11, 0.0  ;;  %vm210_vm12 = vcmp.gt.f32.partialorder %v194_v10, 0.0 }
  0x8b   :  { %v117_v49 = vpop.permute.xlu1 %116  ;;  %v112_v51 = vpop.permute.xlu0 %111  ;;  %v2445_v0 = vsel %vm2342_vm8, %v241_v32, -1e+30  ;;  %v362_v3 = vsel %vm346_vm7, 1, %v1902_v4  ;;  %vm399_vm2 = vcmp.eq.s32.totalorder %v2379_v62, %v2049_v25  ;;  %vm452_vm7 = vcmp.eq.s32.totalorder %v2379_v62, %v2076_v34 }
  0x8c   :  { %v188_v57 = vadd.f32 %v2334_v16, %v117_v49  ;;  %v187_v58 = vadd.f32 %v2334_v16, %v112_v51  ;;  %v234_v60 = vsel %vm202_vm10, %v186_v11, %v218_v40  ;;  %v242_v21 = vsel %vm210_vm12, %v194_v10, %v226_v36 }
  0x8d   :  { %v2449_v20 = vsel %vm2348_vm9, %v234_v60, -1e+30  ;;  %vm2462_vm9 = vcmp.gt.f32.partialorder %v3226_v47, 0.0  ;;  %v430_v40 = vadd.s32 %v414_v56, %v377_v52  ;;  %v467_v10 = vsel %vm451_vm13, 1, %v1902_v4  ;;  %v2689_v47 = vld [vmem:[#allocation2 + $0x28] sm:$0xff] }
  0x8e   :  { %v220_v9 = vmul.f32 0.2, %v188_v57  ;;  %v219_v11 = vmul.f32 0.2, %v187_v58  ;;  %597 = vmax.xlane.f32.xlu0 %v2445_v0  ;;  %583 = vmax.xlane.f32.xlu1 %v2449_v20  ;;  %vm203_vm8 = vcmp.gt.f32.partialorder %v187_v58, 0.0  ;;  %vm204_vm6 = vcmp.gt.f32.partialorder %v188_v57, 0.0 }
  0x8f   :  { %v157_v46 = vpop.permute.xlu1 %156  ;;  %v152_v12 = vpop.permute.xlu0 %151  ;;  %v378_v51 = vadd.s32 %v362_v3, %v325_v63  ;;  %v2480_v60 = vsel %vm2383_vm14, %v242_v21, -1e+30  ;;  %v415_v29 = vsel %vm399_vm2, 1, %v1902_v4  ;;  %vm2503_vm10 = vcmp.gt.f32.partialorder %v3224_v54, 0.0  ;;  %v1734_v54 = vld [vmem:[%s3212_s1 + $0x20] sm:$0xff]  }
  0x90   :  { %v196_v36 = vadd.f32 %v2334_v16, %v157_v46  ;;  %v195_v32 = vadd.f32 %v2334_v16, %v152_v12  ;;  %v235_v49 = vsel %vm203_vm8, %v187_v58, %v219_v11  ;;  %v236_v1 = vsel %vm204_vm6, %v188_v57, %v220_v9 }
  0x91   :  { %v2484_v48 = vsel %vm2389_vm15, %v235_v49, -1e+30  ;;  %vm2497_vm15 = vcmp.gt.f32.partialorder %v3225_v53, 0.0  ;;  %v2511_v57 = vsel %vm491_vm4, 1, %v2373_v61  ;;  %v476_v63 = vadd.s32 %v460_v24, %v423_v13  ;;  %v2687_v53 = vld [vmem:[#allocation2 + $0x60] sm:$0xff] }
  0x92   :  { %v228_v5 = vmul.f32 0.2, %v196_v36  ;;  %v227_v52 = vmul.f32 0.2, %v195_v32  ;;  %599 = vmax.xlane.f32.xlu0 %v2480_v60  ;;  %585 = vmax.xlane.f32.xlu1 %v2484_v48  ;;  %vm211_vm14 = vcmp.gt.f32.partialorder %v195_v32, 0.0  ;;  %vm212_vm12 = vcmp.gt.f32.partialorder %v196_v36, 0.0 }
  0x93   :  { %v127_v56 = vpop.permute.xlu1 %126  ;;  %v122_v58 = vpop.permute.xlu0 %121  ;;  %vm499_vm13 = vcmp.eq.s32.totalorder %v2329_v15, %v2069_v30  ;;  %v483_v21 = vadd.s32 %v467_v10, %v430_v40  ;;  %v2519_v46 = vsel %vm2419_vm11, %v236_v1, -1e+30  ;;  %v431_v50 = vadd.s32 %v415_v29, %v378_v51  ;;  %v1730_v15 = vld [vmem:[%s3212_s1] sm:$0xff]  }
  0x94   :  { %v190_v3 = vadd.f32 %v2334_v16, %v127_v56  ;;  %v189_v9 = vadd.f32 %v2334_v16, %v122_v58  ;;  %v243_v11 = vsel %vm211_vm14, %v195_v32, %v227_v52  ;;  %v468_v61 = vsel %vm452_vm7, 1, %v1902_v4  ;;  %1676 = vmatprep.subr.bf16.mxu0 %v1730_v15  ;;  %1708 = vmatprep.subr.bf16.mxu1 %v1730_v15 }
  0x95   :  { %v2523_v12 = vsel %vm2425_vm5, %v243_v11, -1e+30  ;;  %v244_v37 = vsel %vm212_vm12, %v196_v36, %v228_v5  ;;  %v3222_v32 = vcvt.s32.f32 %v2511_v57  ;;  %v2537_v4 = vsel %vm492_vm1, 1, %v476_v63  ;;  %1677 = vmatpush3.bf16.msra.mxu0 %v1730_v15  ;;  %1716 = vmatpush3.bf16.msra.mxu1 %v1730_v15  ;;  %v1732_v15 = vld [vmem:[%s3212_s1 + $0x10] sm:$0xff]  }
  0x96   :  { %v222_v24 = vmul.f32 0.2, %v190_v3  ;;  %v221_v13 = vmul.f32 0.2, %v189_v9  ;;  %587 = vmax.xlane.f32.xlu0 %v2519_v46  ;;  %601 = vmax.xlane.f32.xlu1 %v2523_v12  ;;  %vm205_vm4 = vcmp.gt.f32.partialorder %v189_v9, 0.0  ;;  %vm206_vm11 = vcmp.gt.f32.partialorder %v190_v3, 0.0 }
  0x97   :  { %v167_v40 = vpop.permute.xlu1 %166  ;;  %v162_v10 = vpop.permute.xlu0 %161  ;;  %vm500_vm5 = vcmp.eq.s32.totalorder %v2379_v62, %v2069_v30  ;;  %v2545_v36 = vsel %vm2462_vm9, %v244_v37, -1e+30  ;;  %v2554_v33 = vsel %vm499_vm13, 1, %v483_v21  ;;  %v484_v5 = vadd.s32 %v468_v61, %v431_v50 }
  0x98   :  { %v198_v34 = vadd.f32 %v2334_v16, %v167_v40  ;;  %v197_v49 = vadd.f32 %v2334_v16, %v162_v10  ;;  %v237_v51 = vsel %vm205_vm4, %v189_v9, %v221_v13  ;;  %v238_v45 = vsel %vm206_vm11, %v190_v3, %v222_v24 }
  0x99   :  { %v2549_v29 = vsel %vm2468_vm3, %v237_v51, -1e+30  ;;  %vm2561_vm8 = vcmp.gt.f32.partialorder %v3223_v44, 0.0  ;;  %vm2567_vm9 = vcmp.gt.f32.partialorder %v3222_v32, 0.0  ;;  %v3221_v11 = vcvt.s32.f32 %v2537_v4 }
  0x9a   :  { %v230_v52 = vmul.f32 0.2, %v198_v34  ;;  %v229_v1 = vmul.f32 0.2, %v197_v49  ;;  %603 = vmax.xlane.f32.xlu0 %v2545_v36  ;;  %589 = vmax.xlane.f32.xlu1 %v2549_v29  ;;  %vm213_vm1 = vcmp.gt.f32.partialorder %v197_v49, 0.0  ;;  %vm214_vm2 = vcmp.gt.f32.partialorder %v198_v34, 0.0 }
  0x9b   :  { %v137_v56 = vpop.permute.xlu1 %136  ;;  %v132_v58 = vpop.permute.xlu0 %131  ;;  %v2576_v21 = vsel %vm2497_vm15, %v238_v45, -1e+30  ;;  %v3220_v61 = vcvt.s32.f32 %v2554_v33  ;;  %v2586_v24 = vsel %vm500_vm5, 1, %v484_v5  ;;  %vm540_vm7 = vcmp.gt.f32.partialorder %v3221_v11, 0.0  ;;  %v2673_v11 = vld [vmem:[#allocation2 + $0x58] sm:$0xff] }
  0x9c   :  { %v192_v63 = vadd.f32 %v2334_v16, %v137_v56  ;;  %v191_v3 = vadd.f32 %v2334_v16, %v132_v58  ;;  %v245_v9 = vsel %vm213_vm1, %v197_v49, %v229_v1  ;;  %v246_v2 = vsel %vm214_vm2, %v198_v34, %v230_v52 }
  0x9d   :  { %v2580_v50 = vsel %vm2503_vm10, %v245_v9, -1e+30  ;;  %v2596_v30 = vsel %vm2561_vm8, %v246_v2, -1e+30  ;;  %vm547_vm14 = vcmp.gt.f32.partialorder %v3220_v61, 0.0  ;;  %v3219_v34 = vcvt.s32.f32 %v2586_v24  ;;  %v569_v61 = vld [vmem:[#allocation2 + $0x20] sm:$0xff] }
  0x9e   :  { %v224_v13 = vmul.f32 0.2, %v192_v63  ;;  %v223_v37 = vmul.f32 0.2, %v191_v3  ;;  %591 = vmax.xlane.f32.xlu0 %v2576_v21  ;;  %605 = vmax.xlane.f32.xlu1 %v2580_v50  ;;  %vm207_vm3 = vcmp.gt.f32.partialorder %v191_v3, 0.0  ;;  %vm208_vm6 = vcmp.gt.f32.partialorder %v192_v63, 0.0 }
  0x9f   :  { %v177_v40 = vpop.permute.xlu1 %176  ;;  %v172_v10 = vpop.permute.xlu0 %171  ;;  %vm548_vm12 = vcmp.gt.f32.partialorder %v3219_v34, 0.0  ;;  %v1733_v34 = vld [vmem:[%s3212_s1 + $0x18] sm:$0xff]  }
  0xa0   :  { %v200_v25 = vadd.f32 %v2334_v16, %v177_v40  ;;  %v199_v49 = vadd.f32 %v2334_v16, %v172_v10  ;;  %v239_v51 = vsel %vm207_vm3, %v191_v3, %v223_v37  ;;  %v240_v16 = vsel %vm208_vm6, %v192_v63, %v224_v13  ;;  %v2621_v63 = vld [vmem:[#allocation2] sm:$0xff]  ;;  %v566_v13 = vld [vmem:[#allocation2 + $0x8] sm:$0xff] }
  0xa1   :  { %v2600_v62 = vsel %vm2567_vm9, %v239_v51, -1e+30  ;;  %v2607_v45 = vsel %vm540_vm7, %v240_v16, -1e+30  ;;  %v2626_v37 = vld [vmem:[#allocation2 + $0x40] sm:$0xff]  ;;  %v2637_v51 = vld [vmem:[#allocation2 + $0x10] sm:$0xff] }
  0xa2   :  { %v232_v5 = vmul.f32 0.2, %v200_v25  ;;  %v231_v52 = vmul.f32 0.2, %v199_v49  ;;  %607 = vmax.xlane.f32.xlu0 %v2596_v30  ;;  %593 = vmax.xlane.f32.xlu1 %v2600_v62  ;;  %vm215_vm15 = vcmp.gt.f32.partialorder %v199_v49, 0.0  ;;  %vm216_vm10 = vcmp.gt.f32.partialorder %v200_v25, 0.0 }
  0xa4   :  { %v247_v1 = vsel %vm215_vm15, %v199_v49, %v231_v52  ;;  %v248_v58 = vsel %vm216_vm10, %v200_v25, %v232_v5  ;;  %v1731_v49 = vld [vmem:[%s3212_s1 + $0x8] sm:$0xff]  }
  0xa5   :  { %v2609_v56 = vsel %vm547_vm14, %v247_v1, -1e+30  ;;  %v2615_v22 = vsel %vm548_vm12, %v248_v58, -1e+30  ;;  %v2639_v5 = vld [vmem:[#allocation2 + $0x48] sm:$0xff]  ;;  %1678 = vmatprep.subr.bf16.mxu0 %v1731_v49  ;;  %1709 = vmatprep.subr.bf16.mxu1 %v1731_v49 }
  0xa6   :  { %595 = vmax.xlane.f32.xlu0 %v2607_v45  ;;  %609 = vmax.xlane.f32.xlu1 %v2609_v56 }
  0xa7   :  { %1679 = vmatpush3.bf16.msra.mxu0 %v1731_v49  ;;  %1717 = vmatpush3.bf16.msra.mxu1 %v1731_v49 }
  0xa8   :  { %1680 = vmatprep.subr.bf16.mxu0 %v1732_v15  ;;  %1710 = vmatprep.subr.bf16.mxu1 %v1732_v15 }
  0xaa   :  { %611 = vmax.xlane.f32.xlu0 %v2615_v22 }
  0xab   :  { %1681 = vmatpush3.bf16.msra.mxu0 %v1732_v15  ;;  %1718 = vmatpush3.bf16.msra.mxu1 %v1732_v15 }
  0xac   :  { %1682 = vmatprep.subr.bf16.mxu0 %v1733_v34  ;;  %1711 = vmatprep.subr.bf16.mxu1 %v1733_v34 }
  0xaf   :  { %1683 = vmatpush3.bf16.msra.mxu0 %v1733_v34  ;;  %1719 = vmatpush3.bf16.msra.mxu1 %v1733_v34 }
  0xb0   :  { %1684 = vmatprep.subr.bf16.mxu0 %v1734_v54  ;;  %1712 = vmatprep.subr.bf16.mxu1 %v1734_v54 }
  0xb3   :  { %1685 = vmatpush3.bf16.msra.mxu0 %v1734_v54  ;;  %1720 = vmatpush3.bf16.msra.mxu1 %v1734_v54 }
 0x117   :  { %v582_v3 = vpop.xlane.xlu0 %581 }
 0x118   :  { %v2624_v9 = vmax.f32 %v2621_v63, %v582_v3  ;;  %v2654_v3 = vld [vmem:[#allocation2 + $0x50] sm:$0xff] }
 0x11a   :  { %1231 = vst.msk [vmem:[#allocation2] sm:$0xff] %vm27_vm0, %v2624_v9  ;;  %679 = vperm.xlu1 %1729, %v2624_v9  }
 0x11b   :  { %v584_v2 = vpop.xlane.xlu1 %583  ;;  %v598_v40 = vpop.xlane.xlu0 %597 }
 0x11c   :  { %v614_v10 = vmax.f32 %v566_v13, %v584_v2  ;;  %v2632_v25 = vmax.f32 %v2626_v37, %v598_v40  ;;  %v2656_v2 = vld [vmem:[#allocation2 + $0x18] sm:$0xff] }
 0x11e   :  { %1232 = vst.msk [vmem:[#allocation2 + $0x8] sm:$0xff] %vm27_vm0, %v614_v10  ;;  %1239 = vst.msk [vmem:[#allocation2 + $0x40] sm:$0xff] %vm27_vm0, %v2632_v25  ;;  %684 = vperm.xlu0 %1728, %v614_v10   ;;  %719 = vperm.xlu1 %1729, %v2632_v25  }
 0x11f   :  { %v586_v52 = vpop.xlane.xlu1 %585  ;;  %v600_v16 = vpop.xlane.xlu0 %599 }
 0x120   :  { %v2646_v1 = vmax.f32 %v2637_v51, %v586_v52  ;;  %v2649_v58 = vmax.f32 %v2639_v5, %v600_v16 }
 0x122   :  { %1233 = vst.msk [vmem:[#allocation2 + $0x10] sm:$0xff] %vm27_vm0, %v2646_v1  ;;  %1240 = vst.msk [vmem:[#allocation2 + $0x48] sm:$0xff] %vm27_vm0, %v2649_v58  ;;  %689 = vperm.xlu0 %1728, %v2646_v1   ;;  %724 = vperm.xlu1 %1729, %v2649_v58  }
 0x123   :  { %v602_v40 = vpop.xlane.xlu1 %601  ;;  %v588_v52 = vpop.xlane.xlu0 %587 }
 0x124   :  { %v2665_v49 = vmax.f32 %v2654_v3, %v602_v40  ;;  %v2668_v16 = vmax.f32 %v2656_v2, %v588_v52  ;;  %v630_v40 = vsub.f32 %v566_v13, %v614_v10  ;;  %v629_v13 = vsub.f32 %v2621_v63, %v2624_v9  ;;  %v1735_v63 = vld [vmem:[%s3212_s1 + $0x28] sm:$0xff]   ;;  %v571_v9 = vld [vmem:[#allocation2 + $0x30] sm:$0xff] }
 0x125   :  { %1686 = vmatprep.subr.bf16.mxu0 %v1735_v63  ;;  %1713 = vmatprep.subr.bf16.mxu1 %v1735_v63 }
 0x126   :  { %1241 = vst.msk [vmem:[#allocation2 + $0x50] sm:$0xff] %vm27_vm0, %v2665_v49  ;;  %1234 = vst.msk [vmem:[#allocation2 + $0x18] sm:$0xff] %vm27_vm0, %v2668_v16  ;;  %729 = vperm.xlu0 %1728, %v2665_v49   ;;  %694 = vperm.xlu1 %1729, %v2668_v16  }
 0x127   :  { %v590_v52 = vpop.xlane.xlu1 %589  ;;  %v604_v32 = vpop.xlane.xlu0 %603  ;;  %1687 = vmatpush3.bf16.msra.mxu0 %v1735_v63  ;;  %1721 = vmatpush3.bf16.msra.mxu1 %v1735_v63  ;;  %v632_v63 = vsub.f32 %v2656_v2, %v2668_v16  ;;  %v639_v2 = vsub.f32 %v2654_v3, %v2665_v49 }
 0x128   :  { %v617_v44 = vmax.f32 %v569_v61, %v590_v52  ;;  %v2682_v15 = vmax.f32 %v2673_v11, %v604_v32  ;;  %v647_v32 = vmul.f32 1.442695, %v630_v40  ;;  %1688 = vmatprep.subr.bf16.mxu0 %v1736_v26  ;;  %1714 = vmatprep.subr.bf16.mxu1 %v1736_v26 }
 0x12a   :  { %1235 = vst.msk [vmem:[#allocation2 + $0x20] sm:$0xff] %vm27_vm0, %v617_v44  ;;  %1242 = vst.msk [vmem:[#allocation2 + $0x58] sm:$0xff] %vm27_vm0, %v2682_v15  ;;  %699 = vperm.xlu0 %1728, %v617_v44   ;;  %734 = vperm.xlu1 %1729, %v2682_v15   ;;  %v633_v10 = vsub.f32 %v569_v61, %v617_v44  ;;  %v645_v44 = vmul.f32 1.442695, %v629_v13  ;;  %1738 = vpow2.f32 %v647_v32  ;;  %v572_v32 = vld [vmem:[#allocation2 + $0x38] sm:$0xff] }
 0x12b   :  { %v606_v52 = vpop.xlane.xlu1 %605  ;;  %v592_v43 = vpop.xlane.xlu0 %591  ;;  %1689 = vmatpush3.bf16.msra.mxu0 %v1736_v26  ;;  %1722 = vmatpush3.bf16.msra.mxu1 %v1736_v26  ;;  %v651_v26 = vmul.f32 1.442695, %v632_v63 }
 0x12c   :  { %v2698_v34 = vmax.f32 %v2687_v53, %v606_v52  ;;  %v2701_v42 = vmax.f32 %v2689_v47, %v592_v43  ;;  %v631_v43 = vsub.f32 %v2637_v51, %v2646_v1  ;;  %v653_v61 = vmul.f32 1.442695, %v633_v10 }
 0x12d   :  { %1740 = vpow2.f32 %v645_v44  ;;  %v637_v51 = vsub.f32 %v2626_v37, %v2632_v25 }
 0x12e   :  { %1243 = vst.msk [vmem:[#allocation2 + $0x60] sm:$0xff] %vm27_vm0, %v2698_v34  ;;  %1236 = vst.msk [vmem:[#allocation2 + $0x28] sm:$0xff] %vm27_vm0, %v2701_v42  ;;  %739 = vperm.xlu0 %1728, %v2698_v34   ;;  %704 = vperm.xlu1 %1729, %v2701_v42   ;;  %v649_v10 = vmul.f32 1.442695, %v631_v43  ;;  %1742 = vpow2.f32 %v653_v61  ;;  %v2738_v43 = vld [vmem:[#allocation2 + $0x78] sm:$0xff]  ;;  %v634_v61 = vsub.f32 %v2689_v47, %v2701_v42 }
 0x12f   :  { %v594_v54 = vpop.xlane.xlu1 %593  ;;  %v608_v40 = vpop.xlane.xlu0 %607 }
 0x130   :  { %v619_v13 = vmax.f32 %v571_v9, %v594_v54  ;;  %v2717_v52 = vmax.f32 %v2706_v35, %v608_v40  ;;  %v655_v42 = vmul.f32 1.442695, %v634_v61 }
 0x132   :  { %v635_v1 = vsub.f32 %v571_v9, %v619_v13  ;;  %1237 = vst.msk [vmem:[#allocation2 + $0x30] sm:$0xff] %vm27_vm0, %v619_v13  ;;  %1244 = vst.msk [vmem:[#allocation2 + $0x68] sm:$0xff] %vm27_vm0, %v2717_v52  ;;  %709 = vperm.xlu0 %1728, %v619_v13   ;;  %744 = vperm.xlu1 %1729, %v2717_v52   ;;  %v1737_v9 = vld [vmem:[%s3212_s1 + $0x38] sm:$0xff]   ;;  %v661_v13 = vmul.f32 1.442695, %v637_v51 }
 0x133   :  { %v610_v54 = vpop.xlane.xlu1 %609  ;;  %v596_v40 = vpop.xlane.xlu0 %595  ;;  %1690 = vmatprep.subr.bf16.mxu0 %v1737_v9  ;;  %1715 = vmatprep.subr.bf16.mxu1 %v1737_v9 }
 0x134   :  { %v657_v44 = vmul.f32 1.442695, %v635_v1  ;;  %v2733_v37 = vmax.f32 %v2722_v18, %v610_v54  ;;  %v620_v25 = vmax.f32 %v572_v32, %v596_v40  ;;  %1691 = vmatpush3.bf16.msra.mxu0 %v1737_v9  ;;  %1723 = vmatpush3.bf16.msra.mxu1 %v1737_v9  ;;  %v2753_v49 = vpop.eup %1738  ;;  %v665_v1 = vmul.f32 1.442695, %v639_v2 }
 0x135   :  { %v641_v54 = vsub.f32 %v2687_v53, %v2698_v34  ;;  %v638_v53 = vsub.f32 %v2639_v5, %v2649_v58  ;;  %v642_v58 = vsub.f32 %v2706_v35, %v2717_v52 }
 0x136   :  { %1744 = vpow2.f32 %v657_v44  ;;  %1245 = vst.msk [vmem:[#allocation2 + $0x70] sm:$0xff] %vm27_vm0, %v2733_v37  ;;  %1238 = vst.msk [vmem:[#allocation2 + $0x38] sm:$0xff] %vm27_vm0, %v620_v25  ;;  %749 = vperm.xlu0 %1728, %v2733_v37   ;;  %714 = vperm.xlu1 %1729, %v620_v25   ;;  %v636_v47 = vsub.f32 %v572_v32, %v620_v25  ;;  %v640_v25 = vsub.f32 %v2673_v11, %v2682_v15 }
 0x137   :  { %1746 = vpow2.f32 %v649_v10  ;;  %v612_v51 = vpop.xlane.xlu0 %611  ;;  %v2763_v63 = vpop.eup %1740  ;;  %v669_v44 = vmul.f32 1.442695, %v641_v54  ;;  %v663_v32 = vmul.f32 1.442695, %v638_v53  ;;  %v671_v11 = vmul.f32 1.442695, %v642_v58 }
 0x138   :  { %v2751_v3 = vmax.f32 %v2738_v43, %v612_v51  ;;  %1748 = vpow2.f32 %v661_v13  ;;  %v2765_v40 = vpop.eup %1742  ;;  %v659_v34 = vmul.f32 1.442695, %v636_v47  ;;  %v667_v5 = vmul.f32 1.442695, %v640_v25 }
 0x139   :  { %1750 = vpow2.f32 %v651_v26 }
 0x13a   :  { %1246 = vst.msk [vmem:[#allocation2 + $0x78] sm:$0xff] %vm27_vm0, %v2751_v3  ;;  %941 = vperm.xlu0 %1728, %v2753_v49   ;;  %754 = vperm.xlu1 %1729, %v2751_v3   ;;  %1752 = vpow2.f32 %v665_v1 }
 0x13b   :  { %1754 = vpow2.f32 %v655_v42 }
 0x13c   :  { %1756 = vpow2.f32 %v669_v44 }
 0x13d   :  { %1758 = vpow2.f32 %v659_v34 }
 0x13e   :  { %956 = vperm.xlu0 %1728, %v2765_v40   ;;  %936 = vperm.xlu1 %1729, %v2763_v63   ;;  %1760 = vpow2.f32 %v663_v32 }
 0x13f   :  { %1762 = vpow2.f32 %v667_v5 }
 0x140   :  { %v2771_v9 = vpop.eup %1744  ;;  %1764 = vpow2.f32 %v671_v11 }
 0x141   :  { %v2773_v13 = vpop.eup %1746 }
 0x142   :  { %966 = vperm.xlu0 %1728, %v2771_v9   ;;  %946 = vperm.xlu1 %1729, %v2773_v13   ;;  %v2779_v2 = vpop.eup %1748 }
 0x143   :  { %v2781_v26 = vpop.eup %1750 }
 0x144   :  { %v2787_v61 = vpop.eup %1752 }
 0x145   :  { %v2789_v51 = vpop.eup %1754 }
 0x146   :  { %976 = vperm.xlu0 %1728, %v2779_v2   ;;  %951 = vperm.xlu1 %1729, %v2781_v26   ;;  %v2793_v15 = vpop.eup %1756 }
 0x147   :  { %v2795_v1 = vpop.eup %1758 }
 0x148   :  { %v2799_v35 = vpop.eup %1760 }
 0x149   :  { %v2802_v52 = vpop.eup %1762 }
 0x14a   :  { %986 = vperm.xlu0 %1728, %v2787_v61   ;;  %961 = vperm.xlu1 %1729, %v2789_v51   ;;  %v2805_v54 = vpop.eup %1764 }
 0x14e   :  { %996 = vperm.xlu0 %1728, %v2793_v15   ;;  %971 = vperm.xlu1 %1729, %v2795_v1  }
 0x152   :  { %981 = vperm.xlu1 %1729, %v2799_v35  }
 0x156   :  { %991 = vperm.xlu1 %1729, %v2802_v52  }
 0x15a   :  { %1001 = vperm.xlu1 %1729, %v2805_v54  }
 0x199   :  { %v680_v42 = vpop.permute.xlu1 %679 }
 0x19a   :  { %v757_v47 = vsub.f32 %v2408_v14, %v680_v42 }
 0x19c   :  { %v773_v44 = vmul.f32 1.442695, %v757_v47 }
 0x19d   :  { %v720_v53 = vpop.permute.xlu1 %719  ;;  %v685_v34 = vpop.permute.xlu0 %684 }
 0x19e   :  { %1766 = vpow2.f32 %v773_v44  ;;  %v765_v32 = vsub.f32 %v2445_v0, %v720_v53  ;;  %v758_v25 = vsub.f32 %v2449_v20, %v685_v34 }
 0x1a0   :  { %v789_v5 = vmul.f32 1.442695, %v765_v32  ;;  %v775_v58 = vmul.f32 1.442695, %v758_v25 }
 0x1a1   :  { %v725_v11 = vpop.permute.xlu1 %724  ;;  %v690_v16 = vpop.permute.xlu0 %689 }
 0x1a2   :  { %v766_v10 = vsub.f32 %v2480_v60, %v725_v11  ;;  %v759_v23 = vsub.f32 %v2484_v48, %v690_v16  ;;  %1768 = vpow2.f32 %v775_v58  ;;  %v3260_v60 = vcvt.s32.f32 %v2148_v6 }
 0x1a3   :  { %1770 = vpow2.f32 %v789_v5  ;;  %v3261_v6 = vcvt.s32.f32 %v2154_v8 }
 0x1a4   :  { %v791_v17 = vmul.f32 1.442695, %v766_v10  ;;  %v777_v14 = vmul.f32 1.442695, %v759_v23 }
 0x1a5   :  { %v695_v42 = vpop.permute.xlu1 %694  ;;  %v730_v47 = vpop.permute.xlu0 %729 }
 0x1a6   :  { %1772 = vpow2.f32 %v791_v17  ;;  %v760_v44 = vsub.f32 %v2519_v46, %v695_v42  ;;  %v767_v0 = vsub.f32 %v2523_v12, %v730_v47 }
 0x1a7   :  { %1774 = vpow2.f32 %v777_v14 }
 0x1a8   :  { %v1767_v20 = vpop.eup %1766  ;;  %v779_v53 = vmul.f32 1.442695, %v760_v44  ;;  %v793_v34 = vmul.f32 1.442695, %v767_v0 }
 0x1a9   :  { %v735_v32 = vpop.permute.xlu1 %734  ;;  %v700_v25 = vpop.permute.xlu0 %699  ;;  %v805_v48 = vmul.f32 %v1767_v20, %v3260_v60  ;;  %v3264_v60 = vcvt.s32.f32 %v2190_v31 }
 0x1aa   :  { %1776 = vpow2.f32 %v779_v53  ;;  %v768_v16 = vsub.f32 %v2545_v36, %v735_v32  ;;  %v761_v23 = vsub.f32 %v2549_v29, %v700_v25  ;;  %v3263_v25 = vcvt.s32.f32 %v2185_v28 }
 0x1ab   :  { %853 = vadd.xlane.f32.xlu0 %v805_v48  ;;  %1778 = vpow2.f32 %v793_v34  ;;  %v3262_v34 = vcvt.s32.f32 %v2150_v7 }
 0x1ac   :  { %v795_v17 = vmul.f32 1.442695, %v768_v16  ;;  %v781_v46 = vmul.f32 1.442695, %v761_v23  ;;  %v1769_v10 = vpop.eup %1768 }
 0x1ad   :  { %v705_v12 = vpop.permute.xlu1 %704  ;;  %v740_v5 = vpop.permute.xlu0 %739  ;;  %v806_v42 = vmul.f32 %v1769_v10, %v3261_v6  ;;  %v3265_v10 = vcvt.s32.f32 %v2300_v19  ;;  %v3267_v19 = vcvt.s32.f32 %v2310_v27 }
 0x1ae   :  { %v1771_v58 = vpop.eup %1770  ;;  %1780 = vpow2.f32 %v795_v17  ;;  %v762_v11 = vsub.f32 %v2576_v21, %v705_v12  ;;  %v769_v14 = vsub.f32 %v2580_v50, %v740_v5 }
 0x1af   :  { %1782 = vpow2.f32 %v781_v46  ;;  %855 = vadd.xlane.f32.xlu1 %v806_v42  ;;  %v1030_v44 = vpack.c.bf16 %v806_v42, %v805_v48  ;;  %v813_v32 = vmul.f32 %v1771_v58, %v3262_v34  ;;  %v3269_v34 = vcvt.s32.f32 %v2318_v39 }
 0x1b0   :  { %v1773_v36 = vpop.eup %1772  ;;  %v783_v47 = vmul.f32 1.442695, %v762_v11  ;;  %v797_v29 = vmul.f32 1.442695, %v769_v14  ;;  %v3273_v39 = vcvt.s32.f32 %v2537_v4  ;;  %v3276_v4 = vsub.f32 %v2738_v43, %v2751_v3 }
 0x1b1   :  { %v1775_v0 = vpop.eup %1774  ;;  %v745_v20 = vpop.permute.xlu1 %744  ;;  %v2827_v21 = vmul.f32 %v1773_v36, %v3263_v25  ;;  %1692 = vmatprep.mubr.bf16.mxu0 %v1030_v44  ;;  %v3266_v36 = vcvt.s32.f32 %v2305_v38 }
 0x1b2   :  { %v710_v53 = vpop.permute.xlu0 %709  ;;  %1784 = vpow2.f32 %v783_v47  ;;  %v770_v8 = vsub.f32 %v2596_v30, %v745_v20  ;;  %v807_v16 = vmul.f32 %v1775_v0, %v3264_v60  ;;  %v3271_v60 = vcvt.s32.f32 %v2362_v55 }
 0x1b3   :  { %v763_v50 = vsub.f32 %v2600_v62, %v710_v53  ;;  %v1034_v48 = vpack.c.bf16 %v2827_v21, %v813_v32  ;;  %1786 = vpow2.f32 %v797_v29 }
 0x1b4   :  { %v1777_v23 = vpop.eup %1776  ;;  %v799_v17 = vmul.f32 1.442695, %v770_v8  ;;  %857 = vadd.xlane.f32.xlu0 %v807_v16 }
 0x1b5   :  { %v785_v7 = vmul.f32 1.442695, %v763_v50  ;;  %1700 = vmatprep.mubr.bf16.mxu1 %v1034_v48  ;;  %v715_v28 = vpop.permute.xlu1 %714  ;;  %v808_v12 = vmul.f32 %v1777_v23, %v3265_v10  ;;  %v1779_v30 = vpop.eup %1778  ;;  %v3272_v48 = vcvt.s32.f32 %v2511_v57 }
 0x1b6   :  { %v750_v46 = vpop.permute.xlu0 %749  ;;  %1788 = vpow2.f32 %v799_v17  ;;  %v764_v62 = vsub.f32 %v2607_v45, %v715_v28  ;;  %v815_v47 = vmul.f32 %v1779_v30, %v3266_v36  ;;  %v3275_v30 = vcvt.s32.f32 %v2586_v24 }
 0x1b7   :  { %v771_v31 = vsub.f32 %v2609_v56, %v750_v46  ;;  %1790 = vpow2.f32 %v785_v7  ;;  %v1031_v5 = vpack.c.bf16 %v808_v12, %v807_v16  ;;  %v3268_v56 = vcvt.s32.f32 %v2316_v41 }
 0x1b8   :  { %v1781_v58 = vpop.eup %1780  ;;  %v787_v11 = vmul.f32 1.442695, %v764_v62  ;;  %859 = vadd.xlane.f32.xlu0 %v808_v12 }
 0x1b9   :  { %v801_v14 = vmul.f32 1.442695, %v771_v31  ;;  %v1783_v6 = vpop.eup %1782  ;;  %v755_v42 = vpop.permute.xlu1 %754  ;;  %1693 = vmatmul.mubr.bf16.vlgmr.msra.gmra.mrb[0].mxu0 %v1031_v5  ;;  %v816_v29 = vmul.f32 %v1781_v58, %v3267_v19 }
 0x1ba   :  { %1792 = vpow2.f32 %v787_v11  ;;  %v772_v45 = vsub.f32 %v2615_v22, %v755_v42  ;;  %v809_v44 = vmul.f32 %v1783_v6, %v3268_v56  ;;  %v3270_v22 = vcvt.s32.f32 %v2322_v59  ;;  %v2876_v43 = vpop.permute.xlu0 %941 }
 0x1bb   :  { %v1035_v0 = vpack.c.bf16 %v816_v29, %v815_v47  ;;  %1794 = vpow2.f32 %v801_v14  ;;  %v3274_v59 = vcvt.s32.f32 %v2554_v33  ;;  %v3277_v33 = vsub.f32 %v2722_v18, %v2733_v37 }
 0x1bc   :  { %v1785_v20 = vpop.eup %1784  ;;  %v803_v53 = vmul.f32 1.442695, %v772_v45  ;;  %861 = vadd.xlane.f32.xlu1 %v809_v44 }
 0x1bd   :  { %1701 = vmatmul.mubr.bf16.vlgmr.msra.gmra.mrb[0].mxu1 %v1035_v0  ;;  %v810_v25 = vmul.f32 %v1785_v20, %v3269_v34  ;;  %v1787_v38 = vpop.eup %1786  ;;  %v673_v24 = vmul.f32 1.442695, %v3277_v33  ;;  %v2872_v5 = vpop.permute.xlu1 %936  ;;  %v822_v20 = vld [vmem:[#allocation3 + $0x8] sm:$0xff] }
 0x1be   :  { %1796 = vpow2.f32 %v803_v53  ;;  %v817_v41 = vmul.f32 %v1787_v38, %v3270_v22  ;;  %v2880_v11 = vpop.permute.xlu0 %956  ;;  %v838_v53 = vmul.f32 %v2753_v49, %v822_v20 }
 0x1bf   :  { %863 = vadd.xlane.f32.xlu0 %v810_v25  ;;  %v1032_v27 = vpack.c.bf16 %v810_v25, %v809_v44  ;;  %v823_v25 = vld [vmem:[#allocation3 + $0x10] sm:$0xff] }
 0x1c0   :  { %v1789_v8 = vpop.eup %1788 }
 0x1c1   :  { %v1791_v50 = vpop.eup %1790  ;;  %1696 = vmatprep.mubr.bf16.mxu0 %v1032_v27  ;;  %v818_v16 = vmul.f32 %v1789_v8, %v3271_v60  ;;  %v2874_v58 = vpop.permute.xlu1 %946  ;;  %v839_v27 = vmul.f32 %v2773_v13, %v823_v25  ;;  %v825_v60 = vld [vmem:[#allocation3 + $0x20] sm:$0xff] }
 0x1c2   :  { %v811_v23 = vmul.f32 %v1791_v50, %v3272_v48  ;;  %v2884_v37 = vpop.permute.xlu0 %966  ;;  %v824_v50 = vld [vmem:[#allocation3 + $0x18] sm:$0xff]  ;;  %v841_v49 = vmul.f32 %v2765_v40, %v825_v60  ;;  %v826_v48 = vld [vmem:[#allocation3 + $0x28] sm:$0xff] }
 0x1c3   :  { %v1036_v17 = vpack.c.bf16 %v818_v16, %v817_v41 }
 0x1c4   :  { %v1793_v7 = vpop.eup %1792  ;;  %865 = vadd.xlane.f32.xlu1 %v811_v23 }
 0x1c5   :  { %1704 = vmatprep.mubr.bf16.mxu1 %v1036_v17  ;;  %v812_v28 = vmul.f32 %v1793_v7, %v3273_v39  ;;  %v1795_v46 = vpop.eup %1794  ;;  %v2878_v3 = vpop.permute.xlu1 %951  ;;  %v842_v7 = vmul.f32 %v2789_v51, %v826_v48  ;;  %v921_v48 = vld [vmem:[#allocation4 + $0x18] sm:$0xff] }
 0x1c6   :  { %v819_v55 = vmul.f32 %v1795_v46, %v3274_v59  ;;  %v2888_v6 = vpop.permute.xlu0 %976  ;;  %v828_v46 = vld [vmem:[#allocation3 + $0x38] sm:$0xff] }
 0x1c7   :  { %867 = vadd.xlane.f32.xlu0 %v812_v28  ;;  %v1033_v10 = vpack.c.bf16 %v812_v28, %v811_v23  ;;  %v827_v28 = vld [vmem:[#allocation3 + $0x30] sm:$0xff]  ;;  %v844_v40 = vmul.f32 %v2795_v1, %v828_v46  ;;  %v832_v1 = vld [vmem:[#allocation3 + $0x58] sm:$0xff] }
 0x1c8   :  { %v1797_v12 = vpop.eup %1796  ;;  %869 = vadd.xlane.f32.xlu1 %v813_v32  ;;  %v675_v32 = vmul.f32 1.442695, %v3276_v4  ;;  %v831_v4 = vld [vmem:[#allocation3 + $0x50] sm:$0xff] }
 0x1c9   :  { %1697 = vmatmul.mubr.bf16.gmra.mrb[4].mxu0 %v1033_v10  ;;  %v820_v57 = vmul.f32 %v1797_v12, %v3275_v30  ;;  %v2882_v18 = vpop.permute.xlu1 %961  ;;  %v829_v12 = vld [vmem:[#allocation3 + $0x40] sm:$0xff]  ;;  %v830_v30 = vld [vmem:[#allocation3 + $0x48] sm:$0xff]  ;;  %v847_v33 = vmul.f32 %v2787_v61, %v831_v4 }
 0x1ca   :  { %1798 = vpow2.f32 %v675_v32  ;;  %v2892_v36 = vpop.permute.xlu0 %986 }
 0x1cb   :  { %871 = vadd.xlane.f32.xlu0 %v2827_v21  ;;  %v1037_v62 = vpack.c.bf16 %v820_v57, %v819_v55  ;;  %1800 = vpow2.f32 %v673_v24 }
 0x1cc   :  { %873 = vadd.xlane.f32.xlu1 %v815_v47 }
 0x1cd   :  { %1705 = vmatmul.mubr.bf16.gmra.mrb[4].mxu1 %v1037_v62  ;;  %v2886_v14 = vpop.permute.xlu1 %971 }
 0x1ce   :  { %v2896_v19 = vpop.permute.xlu0 %996 }
 0x1cf   :  { %875 = vadd.xlane.f32.xlu0 %v816_v29  ;;  %v821_v29 = vld [vmem:[#allocation3] sm:$0xff] }
 0x1d0   :  { %877 = vadd.xlane.f32.xlu1 %v817_v41  ;;  %v837_v45 = vmul.f32 %v2763_v63, %v821_v29  ;;  %v840_v63 = vmul.f32 %v2781_v26, %v824_v50  ;;  %v843_v26 = vmul.f32 %v2771_v9, %v827_v28  ;;  %v846_v9 = vmul.f32 %v2799_v35, %v830_v30  ;;  %v834_v35 = vld [vmem:[#allocation3 + $0x68] sm:$0xff]  ;;  %v926_v28 = vld [vmem:[#allocation4 + $0x40] sm:$0xff] }
 0x1d1   :  { %v2890_v42 = vpop.permute.xlu1 %981 }
 0x1d3   :  { %879 = vadd.xlane.f32.xlu0 %v818_v16 }
 0x1d4   :  { %881 = vadd.xlane.f32.xlu1 %v819_v55  ;;  %v2866_v31 = vpop.eup %1798  ;;  %v845_v55 = vmul.f32 %v2779_v2, %v829_v12 }
 0x1d5   :  { %v2869_v21 = vpop.eup %1800  ;;  %v2894_v47 = vpop.permute.xlu1 %991 }
 0x1d7   :  { %883 = vadd.xlane.f32.xlu0 %v820_v57 }
 0x1d9   :  { %v2899_v44 = vpop.permute.xlu1 %1001 }
 0x1e5   :  { %1011 = vperm.xlu1 %1729, %v2866_v31  }
 0x1ed   :  { %1006 = vperm.xlu0 %1728, %v2869_v21  }
 0x238   :  { %v854_v56 = vpop.xlane.xlu0 %853 }
 0x239   :  { %v885_v0 = vadd.f32 %v854_v56, %v837_v45  ;;  %v833_v56 = vld [vmem:[#allocation3 + $0x60] sm:$0xff] }
 0x23a   :  { %v849_v20 = vmul.f32 %v2793_v15, %v833_v56 }
 0x23b   :  { %902 = vst.msk [vmem:[#allocation3] sm:$0xff] %vm27_vm0, %v885_v0  ;;  %v848_v0 = vmul.f32 %v2802_v52, %v832_v1  ;;  %v836_v52 = vld [vmem:[#allocation3 + $0x78] sm:$0xff]  ;;  %v922_v1 = vld [vmem:[#allocation4 + $0x20] sm:$0xff] }
 0x23c   :  { %v856_v34 = vpop.xlane.xlu1 %855  ;;  %v852_v15 = vmul.f32 %v2866_v31, %v836_v52  ;;  %v1018_v56 = vmul.f32 %v2880_v11, %v922_v1 }
 0x23d   :  { %v886_v38 = vadd.f32 %v856_v34, %v838_v53 }
 0x23f   :  { %903 = vst.msk [vmem:[#allocation3 + $0x8] sm:$0xff] %vm27_vm0, %v886_v38  ;;  %v835_v38 = vld [vmem:[#allocation3 + $0x70] sm:$0xff] }
 0x241   :  { %v858_v8 = vpop.xlane.xlu0 %857 }
 0x242   :  { %v887_v22 = vadd.f32 %v858_v8, %v839_v27  ;;  %v850_v27 = vmul.f32 %v2805_v54, %v834_v35  ;;  %v851_v8 = vmul.f32 %v2869_v21, %v835_v38  ;;  %v920_v54 = vld [vmem:[#allocation4 + $0x10] sm:$0xff]  ;;  %v933_v38 = vld [vmem:[#allocation4 + $0x78] sm:$0xff] }
 0x243   :  { %v1016_v21 = vmul.f32 %v2874_v58, %v920_v54 }
 0x244   :  { %904 = vst.msk [vmem:[#allocation3 + $0x10] sm:$0xff] %vm27_vm0, %v887_v22 }
 0x245   :  { %v860_v41 = vpop.xlane.xlu0 %859 }
 0x246   :  { %v888_v16 = vadd.f32 %v860_v41, %v840_v63 }
 0x248   :  { %905 = vst.msk [vmem:[#allocation3 + $0x18] sm:$0xff] %vm27_vm0, %v888_v16 }
 0x249   :  { %v862_v23 = vpop.xlane.xlu1 %861 }
 0x24a   :  { %v889_v17 = vadd.f32 %v862_v23, %v841_v49  ;;  %v918_v49 = vld [vmem:[#allocation4] sm:$0xff]  ;;  %v919_v23 = vld [vmem:[#allocation4 + $0x8] sm:$0xff] }
 0x24b   :  { %v1015_v46 = vmul.f32 %v2876_v43, %v919_v23 }
 0x24c   :  { %906 = vst.msk [vmem:[#allocation3 + $0x20] sm:$0xff] %vm27_vm0, %v889_v17  ;;  %v864_v13 = vpop.xlane.xlu0 %863  ;;  %v1014_v17 = vmul.f32 %v2872_v5, %v918_v49  ;;  %v1022_v5 = vmul.f32 %v2888_v6, %v926_v28  ;;  %v924_v6 = vld [vmem:[#allocation4 + $0x30] sm:$0xff] }
 0x24d   :  { %v890_v39 = vadd.f32 %v864_v13, %v842_v7  ;;  %v928_v7 = vld [vmem:[#allocation4 + $0x50] sm:$0xff] }
 0x24f   :  { %907 = vst.msk [vmem:[#allocation3 + $0x28] sm:$0xff] %vm27_vm0, %v890_v39  ;;  %v1017_v39 = vmul.f32 %v2878_v3, %v921_v48 }
 0x251   :  { %v866_v10 = vpop.xlane.xlu1 %865 }
 0x252   :  { %v891_v59 = vadd.f32 %v866_v10, %v843_v26  ;;  %v929_v10 = vld [vmem:[#allocation4 + $0x58] sm:$0xff] }
 0x253   :  { %v1025_v3 = vmul.f32 %v2894_v47, %v929_v10  ;;  %v1020_v47 = vmul.f32 %v2884_v37, %v924_v6 }
 0x254   :  { %908 = vst.msk [vmem:[#allocation3 + $0x30] sm:$0xff] %vm27_vm0, %v891_v59  ;;  %v868_v51 = vpop.xlane.xlu0 %867 }
 0x255   :  { %v870_v57 = vpop.xlane.xlu1 %869  ;;  %v892_v62 = vadd.f32 %v868_v51, %v844_v40  ;;  %v1024_v40 = vmul.f32 %v2892_v36, %v928_v7 }
 0x256   :  { %v893_v32 = vadd.f32 %v870_v57, %v845_v55  ;;  %v927_v55 = vld [vmem:[#allocation4 + $0x48] sm:$0xff] }
 0x257   :  { %909 = vst.msk [vmem:[#allocation3 + $0x38] sm:$0xff] %vm27_vm0, %v892_v62  ;;  %v1023_v43 = vmul.f32 %v2890_v42, %v927_v55 }
 0x258   :  { %910 = vst.msk [vmem:[#allocation3 + $0x40] sm:$0xff] %vm27_vm0, %v893_v32  ;;  %v872_v24 = vpop.xlane.xlu0 %871 }
 0x259   :  { %v874_v29 = vpop.xlane.xlu1 %873  ;;  %v894_v45 = vadd.f32 %v872_v24, %v846_v9 }
 0x25a   :  { %v895_v2 = vadd.f32 %v874_v29, %v847_v33  ;;  %v925_v29 = vld [vmem:[#allocation4 + $0x38] sm:$0xff] }
 0x25b   :  { %911 = vst.msk [vmem:[#allocation3 + $0x48] sm:$0xff] %vm27_vm0, %v894_v45  ;;  %v923_v45 = vld [vmem:[#allocation4 + $0x28] sm:$0xff] }
 0x25c   :  { %912 = vst.msk [vmem:[#allocation3 + $0x50] sm:$0xff] %vm27_vm0, %v895_v2  ;;  %v876_v53 = vpop.xlane.xlu0 %875  ;;  %v932_v2 = vld [vmem:[#allocation4 + $0x70] sm:$0xff] }
 0x25d   :  { %v878_v34 = vpop.xlane.xlu1 %877  ;;  %v896_v25 = vadd.f32 %v876_v53, %v848_v0  ;;  %v930_v53 = vld [vmem:[#allocation4 + $0x60] sm:$0xff] }
 0x25e   :  { %v897_v61 = vadd.f32 %v878_v34, %v849_v20  ;;  %v1021_v20 = vmul.f32 %v2886_v14, %v925_v29  ;;  %v1026_v11 = vmul.f32 %v2896_v19, %v930_v53 }
 0x25f   :  { %913 = vst.msk [vmem:[#allocation3 + $0x58] sm:$0xff] %vm27_vm0, %v896_v25  ;;  %v1019_v25 = vmul.f32 %v2882_v18, %v923_v45 }
 0x260   :  { %914 = vst.msk [vmem:[#allocation3 + $0x60] sm:$0xff] %vm27_vm0, %v897_v61  ;;  %v880_v50 = vpop.xlane.xlu0 %879 }
 0x261   :  { %v882_v22 = vpop.xlane.xlu1 %881  ;;  %v898_v63 = vadd.f32 %v880_v50, %v850_v27  ;;  %v931_v50 = vld [vmem:[#allocation4 + $0x68] sm:$0xff] }
 0x262   :  { %v899_v41 = vadd.f32 %v882_v22, %v851_v8  ;;  %v1027_v18 = vmul.f32 %v2899_v44, %v931_v50 }
 0x263   :  { %915 = vst.msk [vmem:[#allocation3 + $0x68] sm:$0xff] %vm27_vm0, %v898_v63 }
 0x264   :  { %916 = vst.msk [vmem:[#allocation3 + $0x70] sm:$0xff] %vm27_vm0, %v899_v41  ;;  %v884_v60 = vpop.xlane.xlu0 %883 }
 0x265   :  { %v900_v16 = vadd.f32 %v884_v60, %v852_v15  ;;  %v1012_v61 = vpop.permute.xlu1 %1011 }
 0x266   :  { %v1029_v14 = vmul.f32 %v1012_v61, %v933_v38 }
 0x267   :  { %917 = vst.msk [vmem:[#allocation3 + $0x78] sm:$0xff] %vm27_vm0, %v900_v16 }
 0x26c   :  { %v1007_v42 = vpop.permute.xlu0 %1006 }
 0x26d   :  { %v1028_v52 = vmul.f32 %v1007_v42, %v932_v2 }
 0x28c   :  { %v1694_v13 = vpop.f32.mrb[0].mxu0 }
 0x28d   :  { %v1201_v31 = vadd.f32 %v1694_v13, %v1016_v21  ;;  %v1136_v26 = vpop.f32.mrb[1].mxu0 }
 0x28e   :  { %v1199_v12 = vadd.f32 %v1136_v26, %v1014_v17  ;;  %v1695_v59 = vpop.f32.mrb[2].mxu0 }
 0x28f   :  { %1217 = vst [vmem:[#allocation4 + $0x10] sm:$0xff] %v1201_v31  ;;  %v1202_v51 = vadd.f32 %v1695_v59, %v1017_v39  ;;  %v1139_v58 = vpop.f32.mrb[3].mxu0 }
 0x290   :  { %1215 = vst [vmem:[#allocation4] sm:$0xff] %v1199_v12  ;;  %v1200_v30 = vadd.f32 %v1139_v58, %v1015_v46  ;;  %v1702_v57 = vpop.f32.mrb[0].mxu1 }
 0x291   :  { %1218 = vst [vmem:[#allocation4 + $0x18] sm:$0xff] %v1202_v51  ;;  %v1209_v62 = vadd.f32 %v1702_v57, %v1024_v40  ;;  %v1168_v4 = vpop.f32.mrb[1].mxu1 }
 0x292   :  { %1216 = vst [vmem:[#allocation4 + $0x8] sm:$0xff] %v1200_v30  ;;  %v1207_v32 = vadd.f32 %v1168_v4, %v1022_v5  ;;  %v1703_v9 = vpop.f32.mrb[2].mxu1 }
 0x293   :  { %1225 = vst [vmem:[#allocation4 + $0x50] sm:$0xff] %v1209_v62  ;;  %v1210_v36 = vadd.f32 %v1703_v9, %v1025_v3  ;;  %v1171_v33 = vpop.f32.mrb[3].mxu1 }
 0x294   :  { %1223 = vst [vmem:[#allocation4 + $0x40] sm:$0xff] %v1207_v32  ;;  %v1208_v24 = vadd.f32 %v1171_v33, %v1023_v43 }
 0x295   :  { %1226 = vst [vmem:[#allocation4 + $0x58] sm:$0xff] %v1210_v36 }
 0x296   :  { %1224 = vst [vmem:[#allocation4 + $0x48] sm:$0xff] %v1208_v24 }
 0x29c   :  { %v1698_v0 = vpop.f32.mrb[4].mxu0 }
 0x29d   :  { %v1205_v35 = vadd.f32 %v1698_v0, %v1020_v47  ;;  %v1152_v34 = vpop.f32.mrb[5].mxu0 }
 0x29e   :  { %v1203_v27 = vadd.f32 %v1152_v34, %v1018_v56  ;;  %v1699_v8 = vpop.f32.mrb[6].mxu0 }
 0x29f   :  { %1221 = vst [vmem:[#allocation4 + $0x30] sm:$0xff] %v1205_v35  ;;  %v1206_v37 = vadd.f32 %v1699_v8, %v1021_v20  ;;  %v1155_v22 = vpop.f32.mrb[7].mxu0 }
 0x2a0   :  { %1219 = vst [vmem:[#allocation4 + $0x20] sm:$0xff] %v1203_v27  ;;  %v1204_v63 = vadd.f32 %v1155_v22, %v1019_v25  ;;  %v1706_v41 = vpop.f32.mrb[4].mxu1 }
 0x2a1   :  { %1222 = vst [vmem:[#allocation4 + $0x38] sm:$0xff] %v1206_v37  ;;  %v1213_v15 = vadd.f32 %v1706_v41, %v1028_v52  ;;  %v1184_v60 = vpop.f32.mrb[5].mxu1 }
 0x2a2   :  { %1220 = vst [vmem:[#allocation4 + $0x28] sm:$0xff] %v1204_v63  ;;  %v1211_v16 = vadd.f32 %v1184_v60, %v1026_v11  ;;  %v1707_v54 = vpop.f32.mrb[6].mxu1 }
 0x2a3   :  { %1229 = vst [vmem:[#allocation4 + $0x70] sm:$0xff] %v1213_v15  ;;  %v1214_v49 = vadd.f32 %v1707_v54, %v1029_v14  ;;  %v1187_v48 = vpop.f32.mrb[7].mxu1 }
 0x2a4   :  { %1227 = vst [vmem:[#allocation4 + $0x60] sm:$0xff] %v1211_v16  ;;  %v1212_v23 = vadd.f32 %v1187_v48, %v1027_v18 }
 0x2a5   :  { %1230 = vst [vmem:[#allocation4 + $0x78] sm:$0xff] %v1214_v49 }
 0x2a6   :  { %1228 = vst [vmem:[#allocation4 + $0x68] sm:$0xff] %v1212_v23 }
 0x2a7 PF:  { %v1268_v19 = vld [vmem:[#allocation3 + $0x10] sm:$0xff]  ;;  %v1266_v21 = vld [vmem:[#allocation3] sm:$0xff]  ;;  %v1269_v17 = vld [vmem:[#allocation3 + $0x18] sm:$0xff]  ;;  %v1903_v7 = vmov 0  }
 0x2a8   :  { %1803 = vset.pattern.permute.xlu1 %v1903_v7  ;;  %1802 = vset.pattern.permute.xlu0 %v1903_v7  ;;  %1804 = vrcp.f32 %v1268_v19  ;;  %v1267_v13 = vld [vmem:[#allocation3 + $0x8] sm:$0xff]  ;;  %v1270_v39 = vld [vmem:[#allocation3 + $0x20] sm:$0xff]  ;;  %v1273_v28 = vld [vmem:[#allocation3 + $0x38] sm:$0xff] }
 0x2a9   :  { %1806 = vrcp.f32 %v1266_v21  ;;  %v1271_v44 = vld [vmem:[#allocation3 + $0x28] sm:$0xff]  ;;  %v1272_v31 = vld [vmem:[#allocation3 + $0x30] sm:$0xff]  ;;  %v1274_v59 = vld [vmem:[#allocation3 + $0x40] sm:$0xff] }
 0x2aa   :  { %1808 = vrcp.f32 %v1269_v17  ;;  %v1275_v10 = vld [vmem:[#allocation3 + $0x48] sm:$0xff]  ;;  %v1277_v55 = vld [vmem:[#allocation3 + $0x58] sm:$0xff]  ;;  %v1276_v58 = vld [vmem:[#allocation3 + $0x50] sm:$0xff] }
 0x2ab   :  { %1810 = vrcp.f32 %v1267_v13  ;;  %v1279_v30 = vld [vmem:[#allocation3 + $0x68] sm:$0xff]  ;;  %v1278_v3 = vld [vmem:[#allocation3 + $0x60] sm:$0xff]  ;;  %v1281_v4 = vld [vmem:[#allocation3 + $0x78] sm:$0xff] }
 0x2ac   :  { %1812 = vrcp.f32 %v1271_v44  ;;  %v1280_v32 = vld [vmem:[#allocation3 + $0x70] sm:$0xff]  ;;  %v1250_v45 = vld [vmem:[#allocation4] sm:$0xff]  ;;  %v1253_v53 = vld [vmem:[#allocation4 + $0x18] sm:$0xff] }
 0x2ad   :  { %1814 = vrcp.f32 %v1270_v39  ;;  %v1252_v47 = vld [vmem:[#allocation4 + $0x10] sm:$0xff]  ;;  %v2949_v2 = vld [vmem:[%s3216_s5] ss:$0 sm:$0xff]  ;;  %v1251_v35 = vld [vmem:[#allocation4 + $0x8] sm:$0xff] }
 0x2ae   :  { %1816 = vrcp.f32 %v1273_v28  ;;  %v1255_v52 = vld [vmem:[#allocation4 + $0x28] sm:$0xff]  ;;  %v1254_v37 = vld [vmem:[#allocation4 + $0x20] sm:$0xff]  ;;  %v1257_v16 = vld [vmem:[#allocation4 + $0x38] sm:$0xff] }
 0x2af   :  { %1818 = vrcp.f32 %v1272_v31  ;;  %v1256_v54 = vld [vmem:[#allocation4 + $0x30] sm:$0xff]  ;;  %v1259_v44 = vld [vmem:[#allocation4 + $0x48] sm:$0xff]  ;;  %v1258_v39 = vld [vmem:[#allocation4 + $0x40] sm:$0xff] }
 0x2b0   :  { %1820 = vrcp.f32 %v1275_v10 }
 0x2b1   :  { %1822 = vrcp.f32 %v1274_v59 }
 0x2b2   :  { %v1805_v26 = vpop.eup %1804  ;;  %1824 = vrcp.f32 %v1277_v55  ;;  %v1261_v55 = vld [vmem:[#allocation4 + $0x58] sm:$0xff] }
 0x2b3   :  { %v1807_v46 = vpop.eup %1806  ;;  %1310 = vperm.xlu1 %1803, %v1805_v26   ;;  %1826 = vrcp.f32 %v1276_v58 }
 0x2b4   :  { %v1809_v12 = vpop.eup %1808  ;;  %1300 = vperm.xlu0 %1802, %v1807_v46   ;;  %1828 = vrcp.f32 %v1279_v30 }
 0x2b5   :  { %v1811_v40 = vpop.eup %1810  ;;  %1830 = vrcp.f32 %v1278_v3 }
 0x2b6   :  { %v1813_v51 = vpop.eup %1812  ;;  %1832 = vrcp.f32 %v1281_v4 }
 0x2b7   :  { %1315 = vperm.xlu1 %1803, %v1809_v12   ;;  %v1815_v5 = vpop.eup %1814  ;;  %1834 = vrcp.f32 %v1280_v32  ;;  %v1263_v32 = vld [vmem:[#allocation4 + $0x68] sm:$0xff] }
 0x2b8   :  { %1305 = vperm.xlu0 %1802, %v1811_v40   ;;  %v1817_v57 = vpop.eup %1816 }
 0x2b9   :  { %v1819_v62 = vpop.eup %1818 }
 0x2ba   :  { %v1821_v43 = vpop.eup %1820 }
 0x2bb   :  { %1325 = vperm.xlu1 %1803, %v1813_v51   ;;  %v1823_v9 = vpop.eup %1822  ;;  %v1260_v51 = vld [vmem:[#allocation4 + $0x50] sm:$0xff] }
 0x2bc   :  { %1320 = vperm.xlu0 %1802, %v1815_v5   ;;  %v1825_v36 = vpop.eup %1824 }
 0x2bd   :  { %v1827_v33 = vpop.eup %1826 }
 0x2be   :  { %v1829_v24 = vpop.eup %1828 }
 0x2bf   :  { %1335 = vperm.xlu1 %1803, %v1817_v57   ;;  %v1831_v6 = vpop.eup %1830 }
 0x2c0   :  { %1330 = vperm.xlu0 %1802, %v1819_v62   ;;  %v1833_v1 = vpop.eup %1832 }
 0x2c1   :  { %v1835_v29 = vpop.eup %1834 }
 0x2c3   :  { %1345 = vperm.xlu1 %1803, %v1821_v43  }
 0x2c4   :  { %1340 = vperm.xlu0 %1802, %v1823_v9   ;;  %v1262_v9 = vld [vmem:[#allocation4 + $0x60] sm:$0xff] }
 0x2c7   :  { %1355 = vperm.xlu1 %1803, %v1825_v36  }
 0x2c8   :  { %1350 = vperm.xlu0 %1802, %v1827_v33  }
 0x2cb   :  { %1365 = vperm.xlu1 %1803, %v1829_v24  }
 0x2cc   :  { %1360 = vperm.xlu0 %1802, %v1831_v6  }
 0x2cf   :  { %1375 = vperm.xlu1 %1803, %v1833_v1  }
 0x2d0   :  { %1370 = vperm.xlu0 %1802, %v1835_v29  }
 0x332   :  { %v1311_v56 = vpop.permute.xlu1 %1310 }
 0x333   :  { %v1380_v42 = vmul.f32 %v1311_v56, %v1252_v47  ;;  %v1301_v0 = vpop.permute.xlu0 %1300  ;;  %v1265_v56 = vld [vmem:[#allocation4 + $0x78] sm:$0xff] }
 0x334   :  { %v1378_v20 = vmul.f32 %v1301_v0, %v1250_v45 }
 0x335   :  { %v2952_v34 = vadd.f32 %v2949_v2, %v1380_v42  ;;  %v1264_v42 = vld [vmem:[#allocation4 + $0x70] sm:$0xff] }
 0x336   :  { %v2955_v25 = vadd.f32 %v2949_v2, %v1378_v20  ;;  %v1316_v38 = vpop.permute.xlu1 %1315 }
 0x337   :  { %v1306_v61 = vpop.permute.xlu0 %1305  ;;  %v1381_v27 = vmul.f32 %v1316_v38, %v1253_v53  ;;  %v1419_v63 = vmul.f32 %v2952_v34, %v2952_v34 }
 0x338   :  { %v1379_v8 = vmul.f32 %v1306_v61, %v1251_v35  ;;  %v1417_v50 = vmul.f32 %v2955_v25, %v2955_v25 }
 0x339   :  { %v2965_v15 = vadd.f32 %v2949_v2, %v1381_v27 }
 0x33a   :  { %v2960_v22 = vadd.f32 %v2949_v2, %v1379_v8  ;;  %1433 = vadd.xlane.f32.xlu0 %v1417_v50  ;;  %v1326_v11 = vpop.permute.xlu1 %1325 }
 0x33b   :  { %v1383_v41 = vmul.f32 %v1326_v11, %v1255_v52  ;;  %v1321_v14 = vpop.permute.xlu0 %1320  ;;  %v1420_v13 = vmul.f32 %v2965_v15, %v2965_v15 }
 0x33c   :  { %v1382_v60 = vmul.f32 %v1321_v14, %v1254_v37  ;;  %v1418_v18 = vmul.f32 %v2960_v22, %v2960_v22 }
 0x33d   :  { %v2973_v23 = vadd.f32 %v2949_v2, %v1383_v41 }
 0x33e   :  { %v2970_v49 = vadd.f32 %v2949_v2, %v1382_v60  ;;  %1435 = vadd.xlane.f32.xlu1 %v1418_v18  ;;  %1437 = vadd.xlane.f32.xlu0 %v1419_v63  ;;  %v1336_v48 = vpop.permute.xlu1 %1335 }
 0x33f   :  { %v1331_v19 = vpop.permute.xlu0 %1330  ;;  %v1385_v21 = vmul.f32 %v1336_v48, %v1257_v16  ;;  %v1422_v46 = vmul.f32 %v2973_v23, %v2973_v23 }
 0x340   :  { %v1384_v17 = vmul.f32 %v1331_v19, %v1256_v54  ;;  %v1421_v7 = vmul.f32 %v2970_v49, %v2970_v49 }
 0x341   :  { %v2985_v10 = vadd.f32 %v2949_v2, %v1385_v21 }
 0x342   :  { %v2980_v28 = vadd.f32 %v2949_v2, %v1384_v17  ;;  %1441 = vadd.xlane.f32.xlu1 %v1421_v7  ;;  %1439 = vadd.xlane.f32.xlu0 %v1420_v13  ;;  %v1346_v31 = vpop.permute.xlu1 %1345 }
 0x343   :  { %v1341_v26 = vpop.permute.xlu0 %1340  ;;  %v1387_v12 = vmul.f32 %v1346_v31, %v1259_v44  ;;  %v1424_v43 = vmul.f32 %v2985_v10, %v2985_v10 }
 0x344   :  { %v1386_v59 = vmul.f32 %v1341_v26, %v1258_v39  ;;  %v1423_v40 = vmul.f32 %v2980_v28, %v2980_v28 }
 0x345   :  { %v2993_v3 = vadd.f32 %v2949_v2, %v1387_v12 }
 0x346   :  { %v2990_v58 = vadd.f32 %v2949_v2, %v1386_v59  ;;  %1445 = vadd.xlane.f32.xlu1 %v1423_v40  ;;  %1443 = vadd.xlane.f32.xlu0 %v1422_v46  ;;  %v1356_v5 = vpop.permute.xlu1 %1355 }
 0x347   :  { %v1389_v30 = vmul.f32 %v1356_v5, %v1261_v55  ;;  %v1351_v57 = vpop.permute.xlu0 %1350  ;;  %v1426_v45 = vmul.f32 %v2993_v3, %v2993_v3 }
 0x348   :  { %v1388_v62 = vmul.f32 %v1351_v57, %v1260_v51  ;;  %v1425_v4 = vmul.f32 %v2990_v58, %v2990_v58 }
 0x349   :  { %v3003_v24 = vadd.f32 %v2949_v2, %v1389_v30 }
 0x34a   :  { %v3000_v36 = vadd.f32 %v2949_v2, %v1388_v62  ;;  %1449 = vadd.xlane.f32.xlu1 %v1425_v4  ;;  %1447 = vadd.xlane.f32.xlu0 %v1424_v43  ;;  %v1366_v33 = vpop.permute.xlu1 %1365 }
 0x34b   :  { %v1361_v6 = vpop.permute.xlu0 %1360  ;;  %v1391_v1 = vmul.f32 %v1366_v33, %v1263_v32  ;;  %v1428_v35 = vmul.f32 %v3003_v24, %v3003_v24 }
 0x34c   :  { %v1390_v29 = vmul.f32 %v1361_v6, %v1262_v9  ;;  %v1427_v47 = vmul.f32 %v3000_v36, %v3000_v36 }
 0x34d   :  { %v3015_v38 = vadd.f32 %v2949_v2, %v1391_v1 }
 0x34e   :  { %v3010_v0 = vadd.f32 %v2949_v2, %v1390_v29  ;;  %1453 = vadd.xlane.f32.xlu1 %v1427_v47  ;;  %1451 = vadd.xlane.f32.xlu0 %v1426_v45  ;;  %v1376_v20 = vpop.permute.xlu1 %1375 }
 0x34f   :  { %v1371_v53 = vpop.permute.xlu0 %1370  ;;  %v1393_v61 = vmul.f32 %v1376_v20, %v1265_v56  ;;  %v1430_v11 = vmul.f32 %v3015_v38, %v3015_v38 }
 0x350   :  { %v1392_v27 = vmul.f32 %v1371_v53, %v1264_v42  ;;  %v1429_v8 = vmul.f32 %v3010_v0, %v3010_v0 }
 0x351   :  { %v3023_v52 = vadd.f32 %v2949_v2, %v1393_v61 }
 0x352   :  { %v3020_v50 = vadd.f32 %v2949_v2, %v1392_v27  ;;  %1457 = vadd.xlane.f32.xlu1 %v1429_v8  ;;  %1455 = vadd.xlane.f32.xlu0 %v1428_v35 }
 0x353   :  { %v1432_v63 = vmul.f32 %v3023_v52, %v3023_v52 }
 0x354   :  { %v1431_v37 = vmul.f32 %v3020_v50, %v3020_v50 }
 0x356   :  { %1461 = vadd.xlane.f32.xlu1 %v1431_v37  ;;  %1459 = vadd.xlane.f32.xlu0 %v1430_v11 }
 0x35a   :  { %1463 = vadd.xlane.f32.xlu0 %v1432_v63 }
 0x3c7   :  { %v1434_v41 = vpop.xlane.xlu0 %1433 }
 0x3c8   :  { %1836 = vrsqrt.f32 %v1434_v41  ;;  %vm1467_vm0 = vcmp.eq.f32.partialorder %v1434_v41, inf  ;;  %v1470_v21 = vand.u32 2147483648, %v1434_v41  ;;  %vm1469_vm13 = vcmp.eq.f32.partialorder %v1434_v41, 0.0 }
 0x3cb   :  { %v1436_v14 = vpop.xlane.xlu1 %1435  ;;  %v1438_v60 = vpop.xlane.xlu0 %1437 }
 0x3cc   :  { %1838 = vrsqrt.f32 %v1436_v14  ;;  %vm1474_vm4 = vcmp.eq.f32.partialorder %v1436_v14, inf  ;;  %vm1476_vm11 = vcmp.eq.f32.partialorder %v1436_v14, 0.0  ;;  %v1477_v44 = vand.u32 2147483648, %v1436_v14 }
 0x3cd   :  { %1840 = vrsqrt.f32 %v1438_v60  ;;  %vm1481_vm5 = vcmp.eq.f32.partialorder %v1438_v60, inf  ;;  %vm1483_vm1 = vcmp.eq.f32.partialorder %v1438_v60, 0.0  ;;  %v1484_v46 = vand.u32 2147483648, %v1438_v60 }
 0x3cf   :  { %v1442_v2 = vpop.xlane.xlu1 %1441  ;;  %v3031_v18 = vpop.xlane.xlu0 %1439 }
 0x3d0   :  { %1842 = vrsqrt.f32 %v1442_v2  ;;  %vm1495_vm2 = vcmp.eq.f32.partialorder %v1442_v2, inf  ;;  %vm1497_vm8 = vcmp.eq.f32.partialorder %v1442_v2, 0.0  ;;  %v1498_v51 = vand.u32 2147483648, %v1442_v2 }
 0x3d1   :  { %1844 = vrsqrt.f32 %v3031_v18  ;;  %vm1488_vm9 = vcmp.eq.f32.partialorder %v3031_v18, inf  ;;  %vm1490_vm3 = vcmp.eq.f32.partialorder %v3031_v18, 0.0  ;;  %v1491_v9 = vand.u32 2147483648, %v3031_v18 }
 0x3d2   :  { %v1837_v16 = vpop.eup %1836 }
 0x3d3   :  { %v1466_v54 = vmul.f32 %v1837_v16, %v1434_v41  ;;  %v3034_v48 = vpop.xlane.xlu1 %1445  ;;  %v3036_v19 = vpop.xlane.xlu0 %1443 }
 0x3d4   :  { %1846 = vrsqrt.f32 %v3034_v48  ;;  %vm1509_vm6 = vcmp.eq.f32.partialorder %v3034_v48, inf  ;;  %vm1511_vm7 = vcmp.eq.f32.partialorder %v3034_v48, 0.0  ;;  %v1512_v45 = vand.u32 2147483648, %v3034_v48 }
 0x3d5   :  { %v1468_v17 = vsel %vm1467_vm0, %v1434_v41, %v1466_v54  ;;  %1848 = vrsqrt.f32 %v3036_v19  ;;  %vm1502_vm14 = vcmp.eq.f32.partialorder %v3036_v19, inf  ;;  %vm1504_vm15 = vcmp.eq.f32.partialorder %v3036_v19, 0.0 }
 0x3d6   :  { %v1839_v7 = vpop.eup %1838  ;;  %v1471_v13 = vsel %vm1469_vm13, %v1470_v21, %v1468_v17  ;;  %v1505_v41 = vand.u32 2147483648, %v3036_v19 }
 0x3d7   :  { %v1841_v39 = vpop.eup %1840  ;;  %v1577_v31 = vmax.f32 %v1471_v13, 1e-12  ;;  %v1473_v26 = vmul.f32 %v1839_v7, %v1436_v14  ;;  %v3040_v12 = vpop.xlane.xlu1 %1449 }
 0x3d8   :  { %v3042_v59 = vpop.xlane.xlu0 %1447  ;;  %v1480_v40 = vmul.f32 %v1841_v39, %v1438_v60  ;;  %1850 = vrsqrt.f32 %v3040_v12  ;;  %vm1523_vm10 = vcmp.eq.f32.partialorder %v3040_v12, inf  ;;  %vm1525_vm12 = vcmp.eq.f32.partialorder %v3040_v12, 0.0 }
 0x3d9   :  { %1852 = vrcp.f32 %v1577_v31  ;;  %v1475_v55 = vsel %vm1474_vm4, %v1436_v14, %v1473_v26  ;;  %v1526_v16 = vand.u32 2147483648, %v3040_v12  ;;  %vm1516_vm0 = vcmp.eq.f32.partialorder %v3042_v59, inf }
 0x3da   :  { %v1843_v5 = vpop.eup %1842  ;;  %v1478_v30 = vsel %vm1476_vm11, %v1477_v44, %v1475_v55  ;;  %v1482_v57 = vsel %vm1481_vm5, %v1438_v60, %v1480_v40  ;;  %1854 = vrsqrt.f32 %v3042_v59  ;;  %vm1518_vm13 = vcmp.eq.f32.partialorder %v3042_v59, 0.0 }
 0x3db   :  { %v1845_v62 = vpop.eup %1844  ;;  %v1578_v4 = vmax.f32 %v1478_v30, 1e-12  ;;  %v1485_v43 = vsel %vm1483_vm1, %v1484_v46, %v1482_v57  ;;  %v1494_v32 = vmul.f32 %v1843_v5, %v1442_v2  ;;  %v3053_v33 = vpop.xlane.xlu1 %1453  ;;  %v1519_v40 = vand.u32 2147483648, %v3042_v59 }
 0x3dc   :  { %v3055_v6 = vpop.xlane.xlu0 %1451  ;;  %v1579_v1 = vmax.f32 %v1485_v43, 1e-12  ;;  %v1487_v29 = vmul.f32 %v1845_v62, %v3031_v18  ;;  %1856 = vrsqrt.f32 %v3053_v33  ;;  %vm1537_vm4 = vcmp.eq.f32.partialorder %v3053_v33, inf }
 0x3dd   :  { %1858 = vrcp.f32 %v1578_v4  ;;  %v1496_v47 = vsel %vm1495_vm2, %v1442_v2, %v1494_v32  ;;  %vm1539_vm11 = vcmp.eq.f32.partialorder %v3053_v33, 0.0  ;;  %vm1530_vm5 = vcmp.eq.f32.partialorder %v3055_v6, inf }
 0x3de   :  { %v1847_v56 = vpop.eup %1846  ;;  %1860 = vrcp.f32 %v1579_v1  ;;  %v1499_v42 = vsel %vm1497_vm8, %v1498_v51, %v1496_v47  ;;  %v1489_v20 = vsel %vm1488_vm9, %v3031_v18, %v1487_v29  ;;  %vm1532_vm1 = vcmp.eq.f32.partialorder %v3055_v6, 0.0 }
 0x3df   :  { %v1849_v53 = vpop.eup %1848  ;;  %v1581_v35 = vmax.f32 %v1499_v42, 1e-12  ;;  %v1492_v61 = vsel %vm1490_vm3, %v1491_v9, %v1489_v20  ;;  %v1508_v27 = vmul.f32 %v1847_v56, %v3034_v48  ;;  %1862 = vrsqrt.f32 %v3055_v6  ;;  %v3072_v8 = vpop.xlane.xlu1 %1457 }
 0x3e0   :  { %v3074_v37 = vpop.xlane.xlu0 %1455  ;;  %v1580_v11 = vmax.f32 %v1492_v61, 1e-12  ;;  %v1501_v63 = vmul.f32 %v1849_v53, %v3036_v19  ;;  %vm1551_vm2 = vcmp.eq.f32.partialorder %v3072_v8, inf  ;;  %vm1553_vm8 = vcmp.eq.f32.partialorder %v3072_v8, 0.0 }
 0x3e1   :  { %1864 = vrcp.f32 %v1581_v35  ;;  %v1510_v14 = vsel %vm1509_vm6, %v3034_v48, %v1508_v27  ;;  %vm1544_vm9 = vcmp.eq.f32.partialorder %v3074_v37, inf  ;;  %vm1546_vm3 = vcmp.eq.f32.partialorder %v3074_v37, 0.0 }
 0x3e2   :  { %v1851_v60 = vpop.eup %1850  ;;  %1866 = vrcp.f32 %v1580_v11  ;;  %v1513_v2 = vsel %vm1511_vm7, %v1512_v45, %v1510_v14  ;;  %v1503_v18 = vsel %vm1502_vm14, %v3036_v19, %v1501_v63 }
 0x3e3   :  { %v1853_v54 = vpop.eup %1852  ;;  %v1583_v21 = vmax.f32 %v1513_v2, 1e-12  ;;  %v1506_v17 = vsel %vm1504_vm15, %v1505_v41, %v1503_v18  ;;  %v1522_v7 = vmul.f32 %v1851_v60, %v3040_v12  ;;  %1868 = vrsqrt.f32 %v3072_v8  ;;  %v3097_v19 = vpop.xlane.xlu1 %1461 }
 0x3e4   :  { %v3092_v13 = vpop.xlane.xlu0 %1459  ;;  %v1855_v44 = vpop.eup %1854  ;;  %v1594_v39 = vmul.f32 %v1853_v54, %v2955_v25  ;;  %v1582_v48 = vmax.f32 %v1506_v17, 1e-12  ;;  %1870 = vrsqrt.f32 %v3074_v37  ;;  %v1547_v60 = vand.u32 2147483648, %v3074_v37 }
 0x3e5   :  { %1872 = vrcp.f32 %v1583_v21  ;;  %v1524_v31 = vsel %vm1523_vm10, %v3040_v12, %v1522_v7  ;;  %v1515_v26 = vmul.f32 %v1855_v44, %v3042_v59  ;;  %v1540_v12 = vand.u32 2147483648, %v3053_v33 }
 0x3e6   :  { %v1857_v46 = vpop.eup %1856  ;;  %1625 = vst [vmem:[%s3217_s6] sm:$0xff] %v1594_v39  ;;  %1874 = vrcp.f32 %v1582_v48  ;;  %v1527_v25 = vsel %vm1525_vm12, %v1526_v16, %v1524_v31  ;;  %vm1565_vm6 = vcmp.eq.f32.partialorder %v3097_v19, inf  ;;  %vm1567_vm7 = vcmp.eq.f32.partialorder %v3097_v19, 0.0 }
 0x3e7   :  { %v1859_v55 = vpop.eup %1858  ;;  %v1585_v51 = vmax.f32 %v1527_v25, 1e-12  ;;  %v1517_v5 = vsel %vm1516_vm0, %v3042_v59, %v1515_v26  ;;  %v1536_v30 = vmul.f32 %v1857_v46, %v3053_v33  ;;  %1876 = vrsqrt.f32 %v3097_v19 }
 0x3e8   :  { %v1861_v57 = vpop.eup %1860  ;;  %v1596_v62 = vmul.f32 %v1859_v55, %v2960_v22  ;;  %v1520_v4 = vsel %vm1518_vm13, %v1519_v40, %v1517_v5  ;;  %v3119_v59 = vpop.xlane.xlu0 %1463  ;;  %vm1558_vm14 = vcmp.eq.f32.partialorder %v3092_v13, inf  ;;  %vm1560_vm15 = vcmp.eq.f32.partialorder %v3092_v13, 0.0 }
 0x3e9   :  { %v1863_v43 = vpop.eup %1862  ;;  %v1598_v32 = vmul.f32 %v1861_v57, %v2952_v34  ;;  %1878 = vrcp.f32 %v1585_v51  ;;  %v1584_v9 = vmax.f32 %v1520_v4, 1e-12  ;;  %v1538_v1 = vsel %vm1537_vm4, %v3053_v33, %v1536_v30 }
 0x3ea   :  { %1626 = vst [vmem:[%s3217_s6 + $0x8] sm:$0xff] %v1596_v62  ;;  %v1541_v29 = vsel %vm1539_vm11, %v1540_v12, %v1538_v1  ;;  %v1529_v22 = vmul.f32 %v1863_v43, %v3055_v6  ;;  %1880 = vrsqrt.f32 %v3092_v13  ;;  %v1533_v33 = vand.u32 2147483648, %v3055_v6 }
 0x3eb   :  { %v1865_v47 = vpop.eup %1864  ;;  %1627 = vst [vmem:[%s3217_s6 + $0x10] sm:$0xff] %v1598_v32  ;;  %1882 = vrcp.f32 %v1584_v9  ;;  %v1587_v34 = vmax.f32 %v1541_v29, 1e-12  ;;  %vm1572_vm10 = vcmp.eq.f32.partialorder %v3119_v59, inf  ;;  %v1575_v30 = vand.u32 2147483648, %v3119_v59 }
 0x3ec   :  { %v1867_v45 = vpop.eup %1866  ;;  %v1602_v56 = vmul.f32 %v1865_v47, %v2970_v49  ;;  %v1531_v42 = vsel %vm1530_vm5, %v3055_v6, %v1529_v22  ;;  %1884 = vrsqrt.f32 %v3119_v59  ;;  %vm1574_vm12 = vcmp.eq.f32.partialorder %v3119_v59, 0.0 }
 0x3ed   :  { %v1869_v20 = vpop.eup %1868  ;;  %v1600_v53 = vmul.f32 %v1867_v45, %v2965_v15  ;;  %1886 = vrcp.f32 %v1587_v34  ;;  %v1534_v35 = vsel %vm1532_vm1, %v1533_v33, %v1531_v42  ;;  %v1554_v15 = vand.u32 2147483648, %v3072_v8 }
 0x3ee   :  { %v1871_v61 = vpop.eup %1870  ;;  %1629 = vst [vmem:[%s3217_s6 + $0x20] sm:$0xff] %v1602_v56  ;;  %v1586_v27 = vmax.f32 %v1534_v35, 1e-12  ;;  %v1550_v11 = vmul.f32 %v1869_v20, %v3072_v8 }
 0x3ef   :  { %v1873_v49 = vpop.eup %1872  ;;  %1628 = vst [vmem:[%s3217_s6 + $0x18] sm:$0xff] %v1600_v53  ;;  %v1543_v6 = vmul.f32 %v1871_v61, %v3074_v37 }
 0x3f0   :  { %v1875_v63 = vpop.eup %1874  ;;  %v1606_v41 = vmul.f32 %v1873_v49, %v2980_v28  ;;  %1888 = vrcp.f32 %v1586_v27  ;;  %v1552_v14 = vsel %vm1551_vm2, %v3072_v8, %v1550_v11 }
 0x3f1   :  { %v1877_v2 = vpop.eup %1876  ;;  %v1604_v18 = vmul.f32 %v1875_v63, %v2973_v23  ;;  %v1555_v16 = vsel %vm1553_vm8, %v1554_v15, %v1552_v14  ;;  %v1545_v54 = vsel %vm1544_vm9, %v3074_v37, %v1543_v6  ;;  %v1568_v23 = vand.u32 2147483648, %v3097_v19 }
 0x3f2   :  { %1631 = vst [vmem:[%s3217_s6 + $0x30] sm:$0xff] %v1606_v41  ;;  %v1589_v21 = vmax.f32 %v1555_v16, 1e-12  ;;  %v1548_v17 = vsel %vm1546_vm3, %v1547_v60, %v1545_v54  ;;  %v1564_v28 = vmul.f32 %v1877_v2, %v3097_v19 }
 0x3f3   :  { %v1879_v7 = vpop.eup %1878  ;;  %1630 = vst [vmem:[%s3217_s6 + $0x28] sm:$0xff] %v1604_v18  ;;  %v1588_v8 = vmax.f32 %v1548_v17, 1e-12 }
 0x3f4   :  { %v1881_v44 = vpop.eup %1880  ;;  %v1610_v37 = vmul.f32 %v1879_v7, %v2990_v58  ;;  %1890 = vrcp.f32 %v1589_v21  ;;  %v1566_v39 = vsel %vm1565_vm6, %v3097_v19, %v1564_v28  ;;  %v1561_v58 = vand.u32 2147483648, %v3092_v13 }
 0x3f5   :  { %v1883_v48 = vpop.eup %1882  ;;  %1892 = vrcp.f32 %v1588_v8  ;;  %v1569_v31 = vsel %vm1567_vm7, %v1568_v23, %v1566_v39  ;;  %v1557_v26 = vmul.f32 %v1881_v44, %v3092_v13 }
 0x3f6   :  { %v1885_v46 = vpop.eup %1884  ;;  %1633 = vst [vmem:[%s3217_s6 + $0x40] sm:$0xff] %v1610_v37  ;;  %v1608_v25 = vmul.f32 %v1883_v48, %v2985_v10  ;;  %v1591_v40 = vmax.f32 %v1569_v31, 1e-12 }
 0x3f7   :  { %v1887_v55 = vpop.eup %1886  ;;  %v1559_v19 = vsel %vm1558_vm14, %v3092_v13, %v1557_v26  ;;  %v1571_v51 = vmul.f32 %v1885_v46, %v3119_v59 }
 0x3f8   :  { %1632 = vst [vmem:[%s3217_s6 + $0x38] sm:$0xff] %v1608_v25  ;;  %v1614_v10 = vmul.f32 %v1887_v55, %v3000_v36  ;;  %1894 = vrcp.f32 %v1591_v40  ;;  %v1562_v5 = vsel %vm1560_vm15, %v1561_v58, %v1559_v19 }
 0x3f9   :  { %v1590_v57 = vmax.f32 %v1562_v5, 1e-12  ;;  %v1573_v62 = vsel %vm1572_vm10, %v3119_v59, %v1571_v51 }
 0x3fa   :  { %v1889_v13 = vpop.eup %1888  ;;  %1635 = vst [vmem:[%s3217_s6 + $0x50] sm:$0xff] %v1614_v10  ;;  %v1576_v4 = vsel %vm1574_vm12, %v1575_v30, %v1573_v62 }
 0x3fb   :  { %v1612_v12 = vmul.f32 %v1889_v13, %v2993_v3  ;;  %1896 = vrcp.f32 %v1590_v57  ;;  %v1592_v43 = vmax.f32 %v1576_v4, 1e-12 }
 0x3fd   :  { %1634 = vst [vmem:[%s3217_s6 + $0x48] sm:$0xff] %v1612_v12  ;;  %1898 = vrcp.f32 %v1592_v43 }
 0x3fe   :  { %v1891_v36 = vpop.eup %1890 }
 0x3ff   :  { %v1893_v32 = vpop.eup %1892  ;;  %v1618_v9 = vmul.f32 %v1891_v36, %v3010_v0 }
 0x400   :  { %v1616_v1 = vmul.f32 %v1893_v32, %v3003_v24 }
 0x401   :  { %1637 = vst [vmem:[%s3217_s6 + $0x60] sm:$0xff] %v1618_v9 }
 0x402   :  { %v1895_v59 = vpop.eup %1894  ;;  %1636 = vst [vmem:[%s3217_s6 + $0x58] sm:$0xff] %v1616_v1 }
 0x403   :  { %v1622_v3 = vmul.f32 %v1895_v59, %v3020_v50 }
 0x405   :  { %v1897_v29 = vpop.eup %1896  ;;  %1639 = vst [vmem:[%s3217_s6 + $0x70] sm:$0xff] %v1622_v3 }
 0x406   :  { %v1620_v0 = vmul.f32 %v1897_v29, %v3015_v38 }
 0x407   :  { %v1899_v22 = vpop.eup %1898 }
 0x408   :  { %1638 = vst [vmem:[%s3217_s6 + $0x68] sm:$0xff] %v1620_v0  ;;  %v1624_v24 = vmul.f32 %v1899_v22, %v3023_v52 }
 0x40a   :  { %1640 = vst [vmem:[%s3217_s6 + $0x78] sm:$0xff] %v1624_v24 }

</bundles_post_ra>
